<compile_context>
chip_gen: v6e
topology: v6e:2x2x1
jax: 0.10.0
libtpu: 0.0.40
codegen_flags: <defaults>
</compile_context>

<pallas_src>
import math
from functools import partial

import numpy as np
import jax
import jax.numpy as jnp
from jax.experimental import pallas as pl
from jax.experimental.pallas import tpu as pltpu

EPS = 1e-5


# ---------------------------------------------------------------------------
# helpers
# ---------------------------------------------------------------------------
def _pick_row_tile(rows, row_bytes, target_bytes=1 << 20):
    """Largest multiple-of-8 divisor of `rows` giving ~target-sized blocks.
    Falls back to the full extent when `rows` is not 8-divisible."""
    if rows % 8 != 0:
        return rows  # TODO(synk): pad+mask tail instead for huge odd extents
    t = max(8, min(rows, (target_bytes // max(row_bytes, 1)) // 8 * 8))
    while rows % t:
        t -= 8
    return t


def bn_scale_shift(s1, s2, gamma, beta, count):
    """Finalize BN batch statistics from partial sums (tiny O(C) glue)."""
    s1 = jnp.sum(s1, axis=0)                       # (1, C)
    s2 = jnp.sum(s2, axis=0)
    mean = s1 / count
    var = s2 / count - mean * mean                 # biased var, like torch BN
    scale = gamma * jax.lax.rsqrt(var + EPS)
    return scale, beta - mean * scale


# ---------------------------------------------------------------------------
# Kernel 1: fused 3x3 conv -> 3 MXU matmuls (K = 3*Cin) over a bf16 slab,
#           with per-image f32 BN partial statistics as an epilogue.
# ---------------------------------------------------------------------------
def _conv3x3_kernel(xs_ref, w_ref, y_ref, s1_ref, s2_ref, *, taps, m_rows):
    acc = None
    for kh, start in taps:                          # 3 static row-offset taps
        part = jnp.dot(xs_ref[0, pl.ds(start, m_rows), :], w_ref[kh],
                       preferred_element_type=jnp.float32)
        acc = part if acc is None else acc + part
    # BN-statistics epilogue from the f32 accumulator (finalized in JAX).
    s1_ref[0] = jnp.sum(acc, axis=0, keepdims=True)
    s2_ref[0] = jnp.sum(acc * acc, axis=0, keepdims=True)
    y_ref[0] = acc.astype(y_ref.dtype)              # compact bf16 store


def conv3x3_bn_stats(x, w3, stride):
    """x: (N,H,W,Cin) f32 NHWC.  w3: (3, 3*Cin, Cout) bf16 (HWIO flattened over
    kw,cin).  3x3 conv, padding=1, no bias, given stride.

    Returns (y (N, OH*OW, Cout) bf16, sum (N,1,Cout) f32, sumsq (N,1,Cout) f32,
             dims=(N, OH, OW, Cout))."""
    N, H, W, Cin = x.shape
    Cout = w3.shape[-1]
    S = stride
    OH = (H - 1) // S + 1
    OW = (W - 1) // S + 1
    PH = OH + 2 // S                   # rows per height-phase region

    # 1-pixel spatial zero pad, then fold the 3 width taps into the channel
    # axis:  win[n, h, ow, kw*Cin + c] = xp[n, h, kw + S*ow, c].
    xp = jnp.pad(x, ((0, 0), (1, 1), (1, 1), (0, 0)))
    win = jnp.concatenate(
        [xp[:, :, kw: kw + S * (OW - 1) + 1: S, :] for kw in range(3)],
        axis=-1)                                       # (N, H+2, OW, 3*Cin)

    # Height phase split for stride > 1 so each kh tap is a contiguous offset.
    if S == 1:
        slab4 = win                                    # (N, PH, OW, 3*Cin)
    else:
        phases = []
        for p in range(S):
            ph = win[:, p::S, :, :][:, :PH]
            if ph.shape[1] < PH:
                ph = jnp.pad(ph, ((0, 0), (0, PH - ph.shape[1]),
                                  (0, 0), (0, 0)))
            phases.append(ph)
        slab4 = jnp.concatenate(phases, axis=1)        # (N, S*PH, OW, 3*Cin)

    L = slab4.shape[1] * OW
    slab = slab4.reshape(N, L, 3 * Cin).astype(jnp.bfloat16)   # bf16 DMA

    m_rows = OH * OW
    # static flat row offset of kernel-height tap kh inside the slab
    taps = tuple((kh, (kh % S) * PH * OW + (kh // S) * OW) for kh in range(3))

    y, s1, s2 = pl.pallas_call(
        partial(_conv3x3_kernel, taps=taps, m_rows=m_rows),
        out_shape=(jax.ShapeDtypeStruct((N, m_rows, Cout), jnp.bfloat16),
                   jax.ShapeDtypeStruct((N, 1, Cout), jnp.float32),
                   jax.ShapeDtypeStruct((N, 1, Cout), jnp.float32)),
        grid=(N,),
        in_specs=[pl.BlockSpec((1, L, 3 * Cin), lambda n: (n, 0, 0)),
                  pl.BlockSpec((3, 3 * Cin, Cout), lambda n: (0, 0, 0))],
        out_specs=(pl.BlockSpec((1, m_rows, Cout), lambda n: (n, 0, 0)),
                   pl.BlockSpec((1, 1, Cout), lambda n: (n, 0, 0)),
                   pl.BlockSpec((1, 1, Cout), lambda n: (n, 0, 0))),
        compiler_params=pltpu.CompilerParams(
            dimension_semantics=("parallel",)),
    )(slab, w3)
    return y, s1, s2, (N, OH, OW, Cout)


# ---------------------------------------------------------------------------
# Kernel 2: 1x1 (downsample) conv as a row-tiled matmul + BN partial stats.
# ---------------------------------------------------------------------------
def _mm_stats_kernel(x_ref, w_ref, y_ref, s1_ref, s2_ref):
    acc = jnp.dot(x_ref[...], w_ref[...], preferred_element_type=jnp.float32)
    s1_ref[0] = jnp.sum(acc, axis=0, keepdims=True)
    s2_ref[0] = jnp.sum(acc * acc, axis=0, keepdims=True)
    y_ref[...] = acc.astype(y_ref.dtype)


def conv1x1_bn_stats(x, w_io, stride):
    """x: (N,H,W,Cin) f32, w_io: (Cin,Cout) bf16; stride-s 1x1 conv + stats.
    Returns (y (N*OH*OW, Cout) bf16, sum (G,1,Cout), sumsq (G,1,Cout))."""
    xs = x[:, ::stride, ::stride, :]
    N, OH, OW, Cin = xs.shape
    Cout = w_io.shape[-1]
    M = N * OH * OW
    xflat = xs.reshape(M, Cin).astype(jnp.bfloat16)        # bf16 DMA
    TM = _pick_row_tile(M, 2 * (Cin + Cout))
    G = M // TM
    y, s1, s2 = pl.pallas_call(
        _mm_stats_kernel,
        out_shape=(jax.ShapeDtypeStruct((M, Cout), jnp.bfloat16),
                   jax.ShapeDtypeStruct((G, 1, Cout), jnp.float32),
                   jax.ShapeDtypeStruct((G, 1, Cout), jnp.float32)),
        grid=(G,),
        in_specs=[pl.BlockSpec((TM, Cin), lambda i: (i, 0)),
                  pl.BlockSpec((Cin, Cout), lambda i: (0, 0))],
        out_specs=(pl.BlockSpec((TM, Cout), lambda i: (i, 0)),
                   pl.BlockSpec((1, 1, Cout), lambda i: (i, 0, 0)),
                   pl.BlockSpec((1, 1, Cout), lambda i: (i, 0, 0))),
        compiler_params=pltpu.CompilerParams(
            dimension_semantics=("parallel",)),
    )(xflat, w_io)
    return y, s1, s2


# ---------------------------------------------------------------------------
# Kernel 3: lane-dense BN affine apply over (N*OH, OW*C), fused with residual
#           add (optionally with its own affine for the downsample branch)
#           and ReLU.
# ---------------------------------------------------------------------------
def _bn_apply_kernel(*refs, relu, has_res, res_affine):
    y_ref, sc_ref, sh_ref = refs[0], refs[1], refs[2]
    i = 3
    r_ref = rsc_ref = rsh_ref = None
    if has_res:
        r_ref = refs[i]
        i += 1
        if res_affine:
            rsc_ref, rsh_ref = refs[i], refs[i + 1]
            i += 2
    o_ref = refs[i]

    out = y_ref[...].astype(jnp.float32) * sc_ref[...] + sh_ref[...]
    if has_res:
        r = r_ref[...].astype(jnp.float32)
        if res_affine:
            r = r * rsc_ref[...] + rsh_ref[...]
        out = out + r
    if relu:
        out = jnp.maximum(out, 0.0)
    o_ref[...] = out.astype(o_ref.dtype)


def bn_apply(y, dims, scale, shift, residual=None, res_affine=None, relu=True,
             out_dtype=jnp.float32):
    """y: any array with N*OH*OW*C elements in (N,OH,OW,C) row-major order
    (typically the bf16 conv output).  Returns (N, OH, OW, C) `out_dtype`."""
    N, OH, OW, C = dims
    R, D = N * OH, OW * C
    y2 = y.reshape(R, D)
    sc = jnp.tile(scale.reshape(1, C), (1, OW))            # lane-dense affine
    sh = jnp.tile(shift.reshape(1, C), (1, OW))
    TR = _pick_row_tile(R, 4 * D)

    in_specs = [pl.BlockSpec((TR, D), lambda i: (i, 0)),
                pl.BlockSpec((1, D), lambda i: (0, 0)),
                pl.BlockSpec((1, D), lambda i: (0, 0))]
    args = [y2, sc, sh]
    if residual is not None:
        in_specs.append(pl.BlockSpec((TR, D), lambda i: (i, 0)))
        args.append(residual.reshape(R, D))
        if res_affine is not None:
            in_specs += [pl.BlockSpec((1, D), lambda i: (0, 0)),
                         pl.BlockSpec((1, D), lambda i: (0, 0))]
            args += [jnp.tile(res_affine[0].reshape(1, C), (1, OW)),
                     jnp.tile(res_affine[1].reshape(1, C), (1, OW))]

    out = pl.pallas_call(
        partial(_bn_apply_kernel, relu=relu, has_res=residual is not None,
                res_affine=res_affine is not None),
        out_shape=jax.ShapeDtypeStruct((R, D), out_dtype),
        grid=(R // TR,),
        in_specs=in_specs,
        out_specs=pl.BlockSpec((TR, D), lambda i: (i, 0)),
        compiler_params=pltpu.CompilerParams(
            dimension_semantics=("parallel",)),
    )(*args)
    return out.reshape(N, OH, OW, C)


# ---------------------------------------------------------------------------
# BasicBlock forward / init (mirrors the PyTorch module; NCHW at the boundary)
# ---------------------------------------------------------------------------
def basic_block_forward(params, x):
    """x: (N,H,W,Cin) NHWC f32 -> (N,OH,OW,planes) NHWC f32."""
    s = params['stride']
    y1, a1, b1, dims1 = conv3x3_bn_stats(x, params['conv1_w3'], s)
    N, OH, OW, _ = dims1
    cnt = float(N * OH * OW)
    sc1, sh1 = bn_scale_shift(a1, b1, params['bn1_g'], params['bn1_b'], cnt)
    h = bn_apply(y1, dims1, sc1, sh1, relu=True)           # conv1 -> bn1 -> relu

    y2, a2, b2, dims2 = conv3x3_bn_stats(h, params['conv2_w3'], 1)
    sc2, sh2 = bn_scale_shift(a2, b2, params['bn2_g'], params['bn2_b'], cnt)

    if 'down_w' in params:                                  # downsample branch
        yd, d1, d2 = conv1x1_bn_stats(x, params['down_w'], s)
        scd, shd = bn_scale_shift(d1, d2, params['down_g'], params['down_b'],
                                  cnt)
        out = bn_apply(y2, dims2, sc2, sh2, residual=yd,
                       res_affine=(scd, shd), relu=True)    # bn2 + BN(ds) + relu
    else:
        out = bn_apply(y2, dims2, sc2, sh2, residual=x, relu=True)
    return out


def basic_block_apply(params, x_nchw):
    x = jnp.transpose(x_nchw, (0, 2, 3, 1)).astype(jnp.float32)  # NCHW -> NHWC
    out = basic_block_forward(params, x)
    return jnp.transpose(out, (0, 3, 1, 2))                      # NHWC -> NCHW


def init_basic_block(key, inplanes, planes, stride=1):
    kc1, kc2, kd = jax.random.split(key, 3)

    def conv_w(k, kh, kw, cin, cout):
        fan_out = cout * kh * kw               # kaiming_normal_, fan_out, relu
        std = math.sqrt(2.0 / fan_out)
        return std * jax.random.normal(k, (kh, kw, cin, cout), jnp.float32)

    p = {
        'stride': stride,
        # conv weights pre-reshaped to (3, 3*Cin, Cout) (kw folded into K) and
        # pre-cast to bf16 for the MXU (accumulation stays f32 in-kernel).
        'conv1_w3': conv_w(kc1, 3, 3, inplanes, planes)
        .reshape(3, 3 * inplanes, planes).astype(jnp.bfloat16),
        'bn1_g': jnp.ones((1, planes), jnp.float32),
        'bn1_b': jnp.zeros((1, planes), jnp.float32),
        'conv2_w3': conv_w(kc2, 3, 3, planes, planes)
        .reshape(3, 3 * planes, planes).astype(jnp.bfloat16),
        'bn2_g': jnp.ones((1, planes), jnp.float32),
        'bn2_b': jnp.zeros((1, planes), jnp.float32),
    }
    if stride != 1 or inplanes != planes:      # downsample = conv1x1 + BN
        std = math.sqrt(2.0 / planes)
        p['down_w'] = (std * jax.random.normal(
            kd, (inplanes, planes), jnp.float32)).astype(jnp.bfloat16)
        p['down_g'] = jnp.ones((1, planes), jnp.float32)
        p['down_b'] = jnp.zeros((1, planes), jnp.float32)
    return p


# ---------------------------------------------------------------------------
# Plain-JAX reference (same parameters) for a parity check
# ---------------------------------------------------------------------------
def basic_block_reference(params, x_nchw):
    x = jnp.transpose(x_nchw, (0, 2, 3, 1)).astype(jnp.float32)

    def conv3(v, w3, stride):
        _, k3, cout = w3.shape
        cin = k3 // 3
        w = w3.astype(jnp.float32).reshape(3, 3, cin, cout)
        return jax.lax.conv_general_dilated(
            v, w, (stride, stride), ((1, 1), (1, 1)),
            dimension_numbers=('NHWC', 'HWIO', 'NHWC'))

    def bn(v, g, b):
        mean = jnp.mean(v, axis=(0, 1, 2), keepdims=True)
        var = jnp.mean((v - mean) ** 2, axis=(0, 1, 2), keepdims=True)
        return ((v - mean) * jax.lax.rsqrt(var + EPS)
                * g.reshape(1, 1, 1, -1) + b.reshape(1, 1, 1, -1))

    s = params['stride']
    h = jax.nn.relu(bn(conv3(x, params['conv1_w3'], s),
                       params['bn1_g'], params['bn1_b']))
    h2 = bn(conv3(h, params['conv2_w3'], 1), params['bn2_g'], params['bn2_b'])
    if 'down_w' in params:
        ident = bn(x[:, ::s, ::s, :] @ params['down_w'].astype(jnp.float32),
                   params['down_g'], params['down_b'])
    else:
        ident = x
    return jnp.transpose(jax.nn.relu(h2 + ident), (0, 3, 1, 2))


# ---------------------------------------------------------------------------
if __name__ == "__main__":
    key = jax.random.PRNGKey(0)
    k1, k2, kx = jax.random.split(key, 3)

    # identity block (module defaults: stride=1, downsample=None) and a
    # downsample block (stride=2, conv1x1+BN shortcut), small demo shapes.
    blk1 = init_basic_block(k1, inplanes=32, planes=32, stride=1)
    blk2 = init_basic_block(k2, inplanes=32, planes=64, stride=2)
    x = jax.random.normal(kx, (2, 32, 16, 16), dtype=jnp.float32)   # NCHW

    @jax.jit
    def run(xin):
        o1 = basic_block_apply(blk1, xin)
        o2 = basic_block_apply(blk2, o1)
        return o1, o2

    out1, out2 = run(x)
    jax.block_until_ready(out2)
    assert out1.shape == (2, 32, 16, 16)
    assert out2.shape == (2, 64, 8, 8)

    # parity check vs plain-JAX reference (loose tol: bf16 MXU operands and
    # bf16 intermediate activation storage)
    ref1 = basic_block_reference(blk1, x)
    ref2 = basic_block_reference(blk2, out1)
    np.testing.assert_allclose(np.asarray(out1), np.asarray(ref1),
                               atol=1e-1, rtol=1e-1)
    np.testing.assert_allclose(np.asarray(out2), np.asarray(ref2),
                               atol=1e-1, rtol=1e-1)

    print("KERNEL_OK")
</pallas_src>

<mosaic_0001>
module attributes {stable_mosaic.version = 11 : i64} {
  func.func @_conv3x3_kernel(%arg0: i32, %arg1: memref<1x288x96xbf16, #tpu.memory_space<vmem>>, %arg2: memref<3x96x32xbf16, #tpu.memory_space<vmem>>, %arg3: memref<1x256x32xbf16, #tpu.memory_space<vmem>>, %arg4: memref<1x1x32xf32, #tpu.memory_space<vmem>>, %arg5: memref<1x1x32xf32, #tpu.memory_space<vmem>>) attributes {dimension_semantics = [#tpu.dimension_semantics<parallel>], iteration_bounds = array<i64: 2>, scalar_prefetch = 0 : i64, scratch_operands = 0 : i64, tpu.core_type = #tpu.core_type<tc>, window_params = [{transform_indices = @transform_0, window_bounds = array<i64: 1, 288, 96>}, {pipeline_mode = #tpu.pipeline_mode<synchronous>, transform_indices = @transform_1, window_bounds = array<i64: 3, 96, 32>}, {transform_indices = @transform_2, window_bounds = array<i64: 1, 256, 32>}, {transform_indices = @transform_3, window_bounds = array<i64: 1, 1, 32>}, {transform_indices = @transform_4, window_bounds = array<i64: 1, 1, 32>}]} {
    %c0 = arith.constant 0 : index
    %c0_0 = arith.constant 0 : index
    %c0_1 = arith.constant 0 : index
    %0 = vector.load %arg1[%c0, %c0_0, %c0_1] : memref<1x288x96xbf16, #tpu.memory_space<vmem>>, vector<1x256x96xbf16>
    %1 = vector.shape_cast %0 : vector<1x256x96xbf16> to vector<256x96xbf16>
    %c0_2 = arith.constant 0 : index
    %c0_3 = arith.constant 0 : index
    %c0_4 = arith.constant 0 : index
    %2 = vector.load %arg2[%c0_2, %c0_3, %c0_4] : memref<3x96x32xbf16, #tpu.memory_space<vmem>>, vector<1x96x32xbf16>
    %3 = vector.shape_cast %2 : vector<1x96x32xbf16> to vector<96x32xbf16>
    %cst = arith.constant dense<0.000000e+00> : vector<256x32xf32>
    %4 = tpu.matmul %1, %3, %cst {dimension_numbers = #tpu.dot_dimension_numbers<[1], [0], [0], [1], [0, 0, 1, 1], [], []>} : vector<256x96xbf16>, vector<96x32xbf16>, vector<256x32xf32> -> vector<256x32xf32>
    %c0_5 = arith.constant 0 : index
    %c16 = arith.constant 16 : index
    %c0_6 = arith.constant 0 : index
    %5 = vector.load %arg1[%c0_5, %c16, %c0_6] : memref<1x288x96xbf16, #tpu.memory_space<vmem>>, vector<1x256x96xbf16>
    %6 = vector.shape_cast %5 : vector<1x256x96xbf16> to vector<256x96xbf16>
    %c1 = arith.constant 1 : index
    %c0_7 = arith.constant 0 : index
    %c0_8 = arith.constant 0 : index
    %7 = vector.load %arg2[%c1, %c0_7, %c0_8] : memref<3x96x32xbf16, #tpu.memory_space<vmem>>, vector<1x96x32xbf16>
    %8 = vector.shape_cast %7 : vector<1x96x32xbf16> to vector<96x32xbf16>
    %cst_9 = arith.constant dense<0.000000e+00> : vector<256x32xf32>
    %9 = tpu.matmul %6, %8, %cst_9 {dimension_numbers = #tpu.dot_dimension_numbers<[1], [0], [0], [1], [0, 0, 1, 1], [], []>} : vector<256x96xbf16>, vector<96x32xbf16>, vector<256x32xf32> -> vector<256x32xf32>
    %10 = arith.addf %4, %9 : vector<256x32xf32>
    %c0_10 = arith.constant 0 : index
    %c32 = arith.constant 32 : index
    %c0_11 = arith.constant 0 : index
    %11 = vector.load %arg1[%c0_10, %c32, %c0_11] : memref<1x288x96xbf16, #tpu.memory_space<vmem>>, vector<1x256x96xbf16>
    %12 = vector.shape_cast %11 : vector<1x256x96xbf16> to vector<256x96xbf16>
    %c2 = arith.constant 2 : index
    %c0_12 = arith.constant 0 : index
    %c0_13 = arith.constant 0 : index
    %13 = vector.load %arg2[%c2, %c0_12, %c0_13] : memref<3x96x32xbf16, #tpu.memory_space<vmem>>, vector<1x96x32xbf16>
    %14 = vector.shape_cast %13 : vector<1x96x32xbf16> to vector<96x32xbf16>
    %cst_14 = arith.constant dense<0.000000e+00> : vector<256x32xf32>
    %15 = tpu.matmul %12, %14, %cst_14 {dimension_numbers = #tpu.dot_dimension_numbers<[1], [0], [0], [1], [0, 0, 1, 1], [], []>} : vector<256x96xbf16>, vector<96x32xbf16>, vector<256x32xf32> -> vector<256x32xf32>
    %16 = arith.addf %10, %15 : vector<256x32xf32>
    %cst_15 = arith.constant dense<0.000000e+00> : vector<32xf32>
    %17 = vector.multi_reduction <add>, %16, %cst_15 [0] : vector<256x32xf32> to vector<32xf32>
    %18 = vector.shape_cast %17 : vector<32xf32> to vector<1x32xf32>
    %c0_16 = arith.constant 0 : index
    %c0_17 = arith.constant 0 : index
    %c0_18 = arith.constant 0 : index
    %19 = vector.load %arg4[%c0_16, %c0_17, %c0_18] : memref<1x1x32xf32, #tpu.memory_space<vmem>>, vector<1x1x32xf32>
    %20 = vector.shape_cast %19 : vector<1x1x32xf32> to vector<1x32xf32>
    %21 = vector.shape_cast %18 : vector<1x32xf32> to vector<1x1x32xf32>
    tpu.vector_store %arg4[%c0_16, %c0_17, %c0_18], %21 {strides = array<i32>} : memref<1x1x32xf32, #tpu.memory_space<vmem>>, vector<1x1x32xf32>,
    %22 = arith.mulf %16, %16 : vector<256x32xf32>
    %cst_19 = arith.constant dense<0.000000e+00> : vector<32xf32>
    %23 = vector.multi_reduction <add>, %22, %cst_19 [0] : vector<256x32xf32> to vector<32xf32>
    %24 = vector.shape_cast %23 : vector<32xf32> to vector<1x32xf32>
    %c0_20 = arith.constant 0 : index
    %c0_21 = arith.constant 0 : index
    %c0_22 = arith.constant 0 : index
    %25 = vector.load %arg5[%c0_20, %c0_21, %c0_22] : memref<1x1x32xf32, #tpu.memory_space<vmem>>, vector<1x1x32xf32>
    %26 = vector.shape_cast %25 : vector<1x1x32xf32> to vector<1x32xf32>
    %27 = vector.shape_cast %24 : vector<1x32xf32> to vector<1x1x32xf32>
    tpu.vector_store %arg5[%c0_20, %c0_21, %c0_22], %27 {strides = array<i32>} : memref<1x1x32xf32, #tpu.memory_space<vmem>>, vector<1x1x32xf32>,
    %28 = arith.truncf %16 : vector<256x32xf32> to vector<256x32xbf16>
    %c0_23 = arith.constant 0 : index
    %c0_24 = arith.constant 0 : index
    %c0_25 = arith.constant 0 : index
    %29 = vector.load %arg3[%c0_23, %c0_24, %c0_25] : memref<1x256x32xbf16, #tpu.memory_space<vmem>>, vector<1x256x32xbf16>
    %30 = vector.shape_cast %29 : vector<1x256x32xbf16> to vector<256x32xbf16>
    %31 = vector.shape_cast %28 : vector<256x32xbf16> to vector<1x256x32xbf16>
    tpu.vector_store %arg3[%c0_23, %c0_24, %c0_25], %31 {strides = array<i32>} : memref<1x256x32xbf16, #tpu.memory_space<vmem>>, vector<1x256x32xbf16>,
    return
  }
  func.func @transform_0(%arg0: i32) -> (i32, i32, i32) {
    %c0_i32 = arith.constant 0 : i32
    %c0_i32_0 = arith.constant 0 : i32
    %c0_i32_1 = arith.constant 0 : i32
    return %arg0, %c0_i32, %c0_i32_0 : i32, i32, i32
  }
  func.func @transform_1(%arg0: i32) -> (i32, i32, i32) {
    %c0_i32 = arith.constant 0 : i32
    %c0_i32_0 = arith.constant 0 : i32
    %c0_i32_1 = arith.constant 0 : i32
    %c0_i32_2 = arith.constant 0 : i32
    return %c0_i32, %c0_i32_0, %c0_i32_1 : i32, i32, i32
  }
  func.func @transform_2(%arg0: i32) -> (i32, i32, i32) {
    %c0_i32 = arith.constant 0 : i32
    %c0_i32_0 = arith.constant 0 : i32
    %c0_i32_1 = arith.constant 0 : i32
    return %arg0, %c0_i32, %c0_i32_0 : i32, i32, i32
  }
  func.func @transform_3(%arg0: i32) -> (i32, i32, i32) {
    %c0_i32 = arith.constant 0 : i32
    %c0_i32_0 = arith.constant 0 : i32
    %c0_i32_1 = arith.constant 0 : i32
    return %arg0, %c0_i32, %c0_i32_0 : i32, i32, i32
  }
  func.func @transform_4(%arg0: i32) -> (i32, i32, i32) {
    %c0_i32 = arith.constant 0 : i32
    %c0_i32_0 = arith.constant 0 : i32
    %c0_i32_1 = arith.constant 0 : i32
    return %arg0, %c0_i32, %c0_i32_0 : i32, i32, i32
  }
}

module attributes {stable_mosaic.version = 11 : i64} {
  func.func @_bn_apply_kernel(%arg0: i32, %arg1: memref<32x512xbf16, #tpu.memory_space<vmem>>, %arg2: memref<1x512xf32, #tpu.memory_space<vmem>>, %arg3: memref<1x512xf32, #tpu.memory_space<vmem>>, %arg4: memref<32x512xf32, #tpu.memory_space<vmem>>) attributes {dimension_semantics = [#tpu.dimension_semantics<parallel>], iteration_bounds = array<i64: 1>, scalar_prefetch = 0 : i64, scratch_operands = 0 : i64, tpu.core_type = #tpu.core_type<tc>, window_params = [{transform_indices = @transform_0, window_bounds = array<i64: 32, 512>}, {pipeline_mode = #tpu.pipeline_mode<synchronous>, transform_indices = @transform_1, window_bounds = array<i64: 1, 512>}, {pipeline_mode = #tpu.pipeline_mode<synchronous>, transform_indices = @transform_2, window_bounds = array<i64: 1, 512>}, {transform_indices = @transform_3, window_bounds = array<i64: 32, 512>}]} {
    %c0 = arith.constant 0 : index
    %c0_0 = arith.constant 0 : index
    %0 = vector.load %arg1[%c0, %c0_0] : memref<32x512xbf16, #tpu.memory_space<vmem>>, vector<32x512xbf16>
    %1 = arith.extf %0 : vector<32x512xbf16> to vector<32x512xf32>
    %c0_1 = arith.constant 0 : index
    %c0_2 = arith.constant 0 : index
    %2 = vector.load %arg2[%c0_1, %c0_2] : memref<1x512xf32, #tpu.memory_space<vmem>>, vector<1x512xf32>
    %3 = vector.broadcast %2 : vector<1x512xf32> to vector<32x512xf32>
    %4 = arith.mulf %1, %3 : vector<32x512xf32>
    %c0_3 = arith.constant 0 : index
    %c0_4 = arith.constant 0 : index
    %5 = vector.load %arg3[%c0_3, %c0_4] : memref<1x512xf32, #tpu.memory_space<vmem>>, vector<1x512xf32>
    %6 = vector.broadcast %5 : vector<1x512xf32> to vector<32x512xf32>
    %7 = arith.addf %4, %6 : vector<32x512xf32>
    %cst = arith.constant 0.000000e+00 : f32
    %8 = vector.broadcast %cst : f32 to vector<32x512xf32>
    %9 = arith.maximumf %7, %8 : vector<32x512xf32>
    %c0_5 = arith.constant 0 : index
    %c0_6 = arith.constant 0 : index
    %10 = vector.load %arg4[%c0_5, %c0_6] : memref<32x512xf32, #tpu.memory_space<vmem>>, vector<32x512xf32>
    tpu.vector_store %arg4[%c0_5, %c0_6], %9 {strides = array<i32>} : memref<32x512xf32, #tpu.memory_space<vmem>>, vector<32x512xf32>,
    return
  }
  func.func @transform_0(%arg0: i32) -> (i32, i32) {
    %c0_i32 = arith.constant 0 : i32
    %c0_i32_0 = arith.constant 0 : i32
    return %arg0, %c0_i32 : i32, i32
  }
  func.func @transform_1(%arg0: i32) -> (i32, i32) {
    %c0_i32 = arith.constant 0 : i32
    %c0_i32_0 = arith.constant 0 : i32
    %c0_i32_1 = arith.constant 0 : i32
    return %c0_i32, %c0_i32_0 : i32, i32
  }
  func.func @transform_2(%arg0: i32) -> (i32, i32) {
    %c0_i32 = arith.constant 0 : i32
    %c0_i32_0 = arith.constant 0 : i32
    %c0_i32_1 = arith.constant 0 : i32
    return %c0_i32, %c0_i32_0 : i32, i32
  }
  func.func @transform_3(%arg0: i32) -> (i32, i32) {
    %c0_i32 = arith.constant 0 : i32
    %c0_i32_0 = arith.constant 0 : i32
    return %arg0, %c0_i32 : i32, i32
  }
}

module attributes {stable_mosaic.version = 11 : i64} {
  func.func @_bn_apply_kernel(%arg0: i32, %arg1: memref<32x512xbf16, #tpu.memory_space<vmem>>, %arg2: memref<1x512xf32, #tpu.memory_space<vmem>>, %arg3: memref<1x512xf32, #tpu.memory_space<vmem>>, %arg4: memref<32x512xf32, #tpu.memory_space<vmem>>, %arg5: memref<32x512xf32, #tpu.memory_space<vmem>>) attributes {dimension_semantics = [#tpu.dimension_semantics<parallel>], iteration_bounds = array<i64: 1>, scalar_prefetch = 0 : i64, scratch_operands = 0 : i64, tpu.core_type = #tpu.core_type<tc>, window_params = [{transform_indices = @transform_0, window_bounds = array<i64: 32, 512>}, {pipeline_mode = #tpu.pipeline_mode<synchronous>, transform_indices = @transform_1, window_bounds = array<i64: 1, 512>}, {pipeline_mode = #tpu.pipeline_mode<synchronous>, transform_indices = @transform_2, window_bounds = array<i64: 1, 512>}, {transform_indices = @transform_3, window_bounds = array<i64: 32, 512>}, {transform_indices = @transform_4, window_bounds = array<i64: 32, 512>}]} {
    %c0 = arith.constant 0 : index
    %c0_0 = arith.constant 0 : index
    %0 = vector.load %arg1[%c0, %c0_0] : memref<32x512xbf16, #tpu.memory_space<vmem>>, vector<32x512xbf16>
    %1 = arith.extf %0 : vector<32x512xbf16> to vector<32x512xf32>
    %c0_1 = arith.constant 0 : index
    %c0_2 = arith.constant 0 : index
    %2 = vector.load %arg2[%c0_1, %c0_2] : memref<1x512xf32, #tpu.memory_space<vmem>>, vector<1x512xf32>
    %3 = vector.broadcast %2 : vector<1x512xf32> to vector<32x512xf32>
    %4 = arith.mulf %1, %3 : vector<32x512xf32>
    %c0_3 = arith.constant 0 : index
    %c0_4 = arith.constant 0 : index
    %5 = vector.load %arg3[%c0_3, %c0_4] : memref<1x512xf32, #tpu.memory_space<vmem>>, vector<1x512xf32>
    %6 = vector.broadcast %5 : vector<1x512xf32> to vector<32x512xf32>
    %7 = arith.addf %4, %6 : vector<32x512xf32>
    %c0_5 = arith.constant 0 : index
    %c0_6 = arith.constant 0 : index
    %8 = vector.load %arg4[%c0_5, %c0_6] : memref<32x512xf32, #tpu.memory_space<vmem>>, vector<32x512xf32>
    %9 = arith.addf %7, %8 : vector<32x512xf32>
    %cst = arith.constant 0.000000e+00 : f32
    %10 = vector.broadcast %cst : f32 to vector<32x512xf32>
    %11 = arith.maximumf %9, %10 : vector<32x512xf32>
    %c0_7 = arith.constant 0 : index
    %c0_8 = arith.constant 0 : index
    %12 = vector.load %arg5[%c0_7, %c0_8] : memref<32x512xf32, #tpu.memory_space<vmem>>, vector<32x512xf32>
    tpu.vector_store %arg5[%c0_7, %c0_8], %11 {strides = array<i32>} : memref<32x512xf32, #tpu.memory_space<vmem>>, vector<32x512xf32>,
    return
  }
  func.func @transform_0(%arg0: i32) -> (i32, i32) {
    %c0_i32 = arith.constant 0 : i32
    %c0_i32_0 = arith.constant 0 : i32
    return %arg0, %c0_i32 : i32, i32
  }
  func.func @transform_1(%arg0: i32) -> (i32, i32) {
    %c0_i32 = arith.constant 0 : i32
    %c0_i32_0 = arith.constant 0 : i32
    %c0_i32_1 = arith.constant 0 : i32
    return %c0_i32, %c0_i32_0 : i32, i32
  }
  func.func @transform_2(%arg0: i32) -> (i32, i32) {
    %c0_i32 = arith.constant 0 : i32
    %c0_i32_0 = arith.constant 0 : i32
    %c0_i32_1 = arith.constant 0 : i32
    return %c0_i32, %c0_i32_0 : i32, i32
  }
  func.func @transform_3(%arg0: i32) -> (i32, i32) {
    %c0_i32 = arith.constant 0 : i32
    %c0_i32_0 = arith.constant 0 : i32
    return %arg0, %c0_i32 : i32, i32
  }
  func.func @transform_4(%arg0: i32) -> (i32, i32) {
    %c0_i32 = arith.constant 0 : i32
    %c0_i32_0 = arith.constant 0 : i32
    return %arg0, %c0_i32 : i32, i32
  }
}

module attributes {stable_mosaic.version = 11 : i64} {
  func.func @_conv3x3_kernel(%arg0: i32, %arg1: memref<1x144x96xbf16, #tpu.memory_space<vmem>>, %arg2: memref<3x96x64xbf16, #tpu.memory_space<vmem>>, %arg3: memref<1x64x64xbf16, #tpu.memory_space<vmem>>, %arg4: memref<1x1x64xf32, #tpu.memory_space<vmem>>, %arg5: memref<1x1x64xf32, #tpu.memory_space<vmem>>) attributes {dimension_semantics = [#tpu.dimension_semantics<parallel>], iteration_bounds = array<i64: 2>, scalar_prefetch = 0 : i64, scratch_operands = 0 : i64, tpu.core_type = #tpu.core_type<tc>, window_params = [{transform_indices = @transform_0, window_bounds = array<i64: 1, 144, 96>}, {pipeline_mode = #tpu.pipeline_mode<synchronous>, transform_indices = @transform_1, window_bounds = array<i64: 3, 96, 64>}, {transform_indices = @transform_2, window_bounds = array<i64: 1, 64, 64>}, {transform_indices = @transform_3, window_bounds = array<i64: 1, 1, 64>}, {transform_indices = @transform_4, window_bounds = array<i64: 1, 1, 64>}]} {
    %c0 = arith.constant 0 : index
    %c0_0 = arith.constant 0 : index
    %c0_1 = arith.constant 0 : index
    %0 = vector.load %arg1[%c0, %c0_0, %c0_1] : memref<1x144x96xbf16, #tpu.memory_space<vmem>>, vector<1x64x96xbf16>
    %1 = vector.shape_cast %0 : vector<1x64x96xbf16> to vector<64x96xbf16>
    %c0_2 = arith.constant 0 : index
    %c0_3 = arith.constant 0 : index
    %c0_4 = arith.constant 0 : index
    %2 = vector.load %arg2[%c0_2, %c0_3, %c0_4] : memref<3x96x64xbf16, #tpu.memory_space<vmem>>, vector<1x96x64xbf16>
    %3 = vector.shape_cast %2 : vector<1x96x64xbf16> to vector<96x64xbf16>
    %cst = arith.constant dense<0.000000e+00> : vector<64x64xf32>
    %4 = tpu.matmul %1, %3, %cst {dimension_numbers = #tpu.dot_dimension_numbers<[1], [0], [0], [1], [0, 0, 1, 1], [], []>} : vector<64x96xbf16>, vector<96x64xbf16>, vector<64x64xf32> -> vector<64x64xf32>
    %c0_5 = arith.constant 0 : index
    %c72 = arith.constant 72 : index
    %c0_6 = arith.constant 0 : index
    %5 = vector.load %arg1[%c0_5, %c72, %c0_6] : memref<1x144x96xbf16, #tpu.memory_space<vmem>>, vector<1x64x96xbf16>
    %6 = vector.shape_cast %5 : vector<1x64x96xbf16> to vector<64x96xbf16>
    %c1 = arith.constant 1 : index
    %c0_7 = arith.constant 0 : index
    %c0_8 = arith.constant 0 : index
    %7 = vector.load %arg2[%c1, %c0_7, %c0_8] : memref<3x96x64xbf16, #tpu.memory_space<vmem>>, vector<1x96x64xbf16>
    %8 = vector.shape_cast %7 : vector<1x96x64xbf16> to vector<96x64xbf16>
    %cst_9 = arith.constant dense<0.000000e+00> : vector<64x64xf32>
    %9 = tpu.matmul %6, %8, %cst_9 {dimension_numbers = #tpu.dot_dimension_numbers<[1], [0], [0], [1], [0, 0, 1, 1], [], []>} : vector<64x96xbf16>, vector<96x64xbf16>, vector<64x64xf32> -> vector<64x64xf32>
    %10 = arith.addf %4, %9 : vector<64x64xf32>
    %c0_10 = arith.constant 0 : index
    %c8 = arith.constant 8 : index
    %c0_11 = arith.constant 0 : index
    %11 = vector.load %arg1[%c0_10, %c8, %c0_11] : memref<1x144x96xbf16, #tpu.memory_space<vmem>>, vector<1x64x96xbf16>
    %12 = vector.shape_cast %11 : vector<1x64x96xbf16> to vector<64x96xbf16>
    %c2 = arith.constant 2 : index
    %c0_12 = arith.constant 0 : index
    %c0_13 = arith.constant 0 : index
    %13 = vector.load %arg2[%c2, %c0_12, %c0_13] : memref<3x96x64xbf16, #tpu.memory_space<vmem>>, vector<1x96x64xbf16>
    %14 = vector.shape_cast %13 : vector<1x96x64xbf16> to vector<96x64xbf16>
    %cst_14 = arith.constant dense<0.000000e+00> : vector<64x64xf32>
    %15 = tpu.matmul %12, %14, %cst_14 {dimension_numbers = #tpu.dot_dimension_numbers<[1], [0], [0], [1], [0, 0, 1, 1], [], []>} : vector<64x96xbf16>, vector<96x64xbf16>, vector<64x64xf32> -> vector<64x64xf32>
    %16 = arith.addf %10, %15 : vector<64x64xf32>
    %cst_15 = arith.constant dense<0.000000e+00> : vector<64xf32>
    %17 = vector.multi_reduction <add>, %16, %cst_15 [0] : vector<64x64xf32> to vector<64xf32>
    %18 = vector.shape_cast %17 : vector<64xf32> to vector<1x64xf32>
    %c0_16 = arith.constant 0 : index
    %c0_17 = arith.constant 0 : index
    %c0_18 = arith.constant 0 : index
    %19 = vector.load %arg4[%c0_16, %c0_17, %c0_18] : memref<1x1x64xf32, #tpu.memory_space<vmem>>, vector<1x1x64xf32>
    %20 = vector.shape_cast %19 : vector<1x1x64xf32> to vector<1x64xf32>
    %21 = vector.shape_cast %18 : vector<1x64xf32> to vector<1x1x64xf32>
    tpu.vector_store %arg4[%c0_16, %c0_17, %c0_18], %21 {strides = array<i32>} : memref<1x1x64xf32, #tpu.memory_space<vmem>>, vector<1x1x64xf32>,
    %22 = arith.mulf %16, %16 : vector<64x64xf32>
    %cst_19 = arith.constant dense<0.000000e+00> : vector<64xf32>
    %23 = vector.multi_reduction <add>, %22, %cst_19 [0] : vector<64x64xf32> to vector<64xf32>
    %24 = vector.shape_cast %23 : vector<64xf32> to vector<1x64xf32>
    %c0_20 = arith.constant 0 : index
    %c0_21 = arith.constant 0 : index
    %c0_22 = arith.constant 0 : index
    %25 = vector.load %arg5[%c0_20, %c0_21, %c0_22] : memref<1x1x64xf32, #tpu.memory_space<vmem>>, vector<1x1x64xf32>
    %26 = vector.shape_cast %25 : vector<1x1x64xf32> to vector<1x64xf32>
    %27 = vector.shape_cast %24 : vector<1x64xf32> to vector<1x1x64xf32>
    tpu.vector_store %arg5[%c0_20, %c0_21, %c0_22], %27 {strides = array<i32>} : memref<1x1x64xf32, #tpu.memory_space<vmem>>, vector<1x1x64xf32>,
    %28 = arith.truncf %16 : vector<64x64xf32> to vector<64x64xbf16>
    %c0_23 = arith.constant 0 : index
    %c0_24 = arith.constant 0 : index
    %c0_25 = arith.constant 0 : index
    %29 = vector.load %arg3[%c0_23, %c0_24, %c0_25] : memref<1x64x64xbf16, #tpu.memory_space<vmem>>, vector<1x64x64xbf16>
    %30 = vector.shape_cast %29 : vector<1x64x64xbf16> to vector<64x64xbf16>
    %31 = vector.shape_cast %28 : vector<64x64xbf16> to vector<1x64x64xbf16>
    tpu.vector_store %arg3[%c0_23, %c0_24, %c0_25], %31 {strides = array<i32>} : memref<1x64x64xbf16, #tpu.memory_space<vmem>>, vector<1x64x64xbf16>,
    return
  }
  func.func @transform_0(%arg0: i32) -> (i32, i32, i32) {
    %c0_i32 = arith.constant 0 : i32
    %c0_i32_0 = arith.constant 0 : i32
    %c0_i32_1 = arith.constant 0 : i32
    return %arg0, %c0_i32, %c0_i32_0 : i32, i32, i32
  }
  func.func @transform_1(%arg0: i32) -> (i32, i32, i32) {
    %c0_i32 = arith.constant 0 : i32
    %c0_i32_0 = arith.constant 0 : i32
    %c0_i32_1 = arith.constant 0 : i32
    %c0_i32_2 = arith.constant 0 : i32
    return %c0_i32, %c0_i32_0, %c0_i32_1 : i32, i32, i32
  }
  func.func @transform_2(%arg0: i32) -> (i32, i32, i32) {
    %c0_i32 = arith.constant 0 : i32
    %c0_i32_0 = arith.constant 0 : i32
    %c0_i32_1 = arith.constant 0 : i32
    return %arg0, %c0_i32, %c0_i32_0 : i32, i32, i32
  }
  func.func @transform_3(%arg0: i32) -> (i32, i32, i32) {
    %c0_i32 = arith.constant 0 : i32
    %c0_i32_0 = arith.constant 0 : i32
    %c0_i32_1 = arith.constant 0 : i32
    return %arg0, %c0_i32, %c0_i32_0 : i32, i32, i32
  }
  func.func @transform_4(%arg0: i32) -> (i32, i32, i32) {
    %c0_i32 = arith.constant 0 : i32
    %c0_i32_0 = arith.constant 0 : i32
    %c0_i32_1 = arith.constant 0 : i32
    return %arg0, %c0_i32, %c0_i32_0 : i32, i32, i32
  }
}

module attributes {stable_mosaic.version = 11 : i64} {
  func.func @_bn_apply_kernel(%arg0: i32, %arg1: memref<16x512xbf16, #tpu.memory_space<vmem>>, %arg2: memref<1x512xf32, #tpu.memory_space<vmem>>, %arg3: memref<1x512xf32, #tpu.memory_space<vmem>>, %arg4: memref<16x512xf32, #tpu.memory_space<vmem>>) attributes {dimension_semantics = [#tpu.dimension_semantics<parallel>], iteration_bounds = array<i64: 1>, scalar_prefetch = 0 : i64, scratch_operands = 0 : i64, tpu.core_type = #tpu.core_type<tc>, window_params = [{transform_indices = @transform_0, window_bounds = array<i64: 16, 512>}, {pipeline_mode = #tpu.pipeline_mode<synchronous>, transform_indices = @transform_1, window_bounds = array<i64: 1, 512>}, {pipeline_mode = #tpu.pipeline_mode<synchronous>, transform_indices = @transform_2, window_bounds = array<i64: 1, 512>}, {transform_indices = @transform_3, window_bounds = array<i64: 16, 512>}]} {
    %c0 = arith.constant 0 : index
    %c0_0 = arith.constant 0 : index
    %0 = vector.load %arg1[%c0, %c0_0] : memref<16x512xbf16, #tpu.memory_space<vmem>>, vector<16x512xbf16>
    %1 = arith.extf %0 : vector<16x512xbf16> to vector<16x512xf32>
    %c0_1 = arith.constant 0 : index
    %c0_2 = arith.constant 0 : index
    %2 = vector.load %arg2[%c0_1, %c0_2] : memref<1x512xf32, #tpu.memory_space<vmem>>, vector<1x512xf32>
    %3 = vector.broadcast %2 : vector<1x512xf32> to vector<16x512xf32>
    %4 = arith.mulf %1, %3 : vector<16x512xf32>
    %c0_3 = arith.constant 0 : index
    %c0_4 = arith.constant 0 : index
    %5 = vector.load %arg3[%c0_3, %c0_4] : memref<1x512xf32, #tpu.memory_space<vmem>>, vector<1x512xf32>
    %6 = vector.broadcast %5 : vector<1x512xf32> to vector<16x512xf32>
    %7 = arith.addf %4, %6 : vector<16x512xf32>
    %cst = arith.constant 0.000000e+00 : f32
    %8 = vector.broadcast %cst : f32 to vector<16x512xf32>
    %9 = arith.maximumf %7, %8 : vector<16x512xf32>
    %c0_5 = arith.constant 0 : index
    %c0_6 = arith.constant 0 : index
    %10 = vector.load %arg4[%c0_5, %c0_6] : memref<16x512xf32, #tpu.memory_space<vmem>>, vector<16x512xf32>
    tpu.vector_store %arg4[%c0_5, %c0_6], %9 {strides = array<i32>} : memref<16x512xf32, #tpu.memory_space<vmem>>, vector<16x512xf32>,
    return
  }
  func.func @transform_0(%arg0: i32) -> (i32, i32) {
    %c0_i32 = arith.constant 0 : i32
    %c0_i32_0 = arith.constant 0 : i32
    return %arg0, %c0_i32 : i32, i32
  }
  func.func @transform_1(%arg0: i32) -> (i32, i32) {
    %c0_i32 = arith.constant 0 : i32
    %c0_i32_0 = arith.constant 0 : i32
    %c0_i32_1 = arith.constant 0 : i32
    return %c0_i32, %c0_i32_0 : i32, i32
  }
  func.func @transform_2(%arg0: i32) -> (i32, i32) {
    %c0_i32 = arith.constant 0 : i32
    %c0_i32_0 = arith.constant 0 : i32
    %c0_i32_1 = arith.constant 0 : i32
    return %c0_i32, %c0_i32_0 : i32, i32
  }
  func.func @transform_3(%arg0: i32) -> (i32, i32) {
    %c0_i32 = arith.constant 0 : i32
    %c0_i32_0 = arith.constant 0 : i32
    return %arg0, %c0_i32 : i32, i32
  }
}

module attributes {stable_mosaic.version = 11 : i64} {
  func.func @_conv3x3_kernel(%arg0: i32, %arg1: memref<1x80x192xbf16, #tpu.memory_space<vmem>>, %arg2: memref<3x192x64xbf16, #tpu.memory_space<vmem>>, %arg3: memref<1x64x64xbf16, #tpu.memory_space<vmem>>, %arg4: memref<1x1x64xf32, #tpu.memory_space<vmem>>, %arg5: memref<1x1x64xf32, #tpu.memory_space<vmem>>) attributes {dimension_semantics = [#tpu.dimension_semantics<parallel>], iteration_bounds = array<i64: 2>, scalar_prefetch = 0 : i64, scratch_operands = 0 : i64, tpu.core_type = #tpu.core_type<tc>, window_params = [{transform_indices = @transform_0, window_bounds = array<i64: 1, 80, 192>}, {pipeline_mode = #tpu.pipeline_mode<synchronous>, transform_indices = @transform_1, window_bounds = array<i64: 3, 192, 64>}, {transform_indices = @transform_2, window_bounds = array<i64: 1, 64, 64>}, {transform_indices = @transform_3, window_bounds = array<i64: 1, 1, 64>}, {transform_indices = @transform_4, window_bounds = array<i64: 1, 1, 64>}]} {
    %c0 = arith.constant 0 : index
    %c0_0 = arith.constant 0 : index
    %c0_1 = arith.constant 0 : index
    %0 = vector.load %arg1[%c0, %c0_0, %c0_1] : memref<1x80x192xbf16, #tpu.memory_space<vmem>>, vector<1x64x192xbf16>
    %1 = vector.shape_cast %0 : vector<1x64x192xbf16> to vector<64x192xbf16>
    %c0_2 = arith.constant 0 : index
    %c0_3 = arith.constant 0 : index
    %c0_4 = arith.constant 0 : index
    %2 = vector.load %arg2[%c0_2, %c0_3, %c0_4] : memref<3x192x64xbf16, #tpu.memory_space<vmem>>, vector<1x192x64xbf16>
    %3 = vector.shape_cast %2 : vector<1x192x64xbf16> to vector<192x64xbf16>
    %cst = arith.constant dense<0.000000e+00> : vector<64x64xf32>
    %4 = tpu.matmul %1, %3, %cst {dimension_numbers = #tpu.dot_dimension_numbers<[1], [0], [0], [1], [0, 0, 1, 1], [], []>} : vector<64x192xbf16>, vector<192x64xbf16>, vector<64x64xf32> -> vector<64x64xf32>
    %c0_5 = arith.constant 0 : index
    %c8 = arith.constant 8 : index
    %c0_6 = arith.constant 0 : index
    %5 = vector.load %arg1[%c0_5, %c8, %c0_6] : memref<1x80x192xbf16, #tpu.memory_space<vmem>>, vector<1x64x192xbf16>
    %6 = vector.shape_cast %5 : vector<1x64x192xbf16> to vector<64x192xbf16>
    %c1 = arith.constant 1 : index
    %c0_7 = arith.constant 0 : index
    %c0_8 = arith.constant 0 : index
    %7 = vector.load %arg2[%c1, %c0_7, %c0_8] : memref<3x192x64xbf16, #tpu.memory_space<vmem>>, vector<1x192x64xbf16>
    %8 = vector.shape_cast %7 : vector<1x192x64xbf16> to vector<192x64xbf16>
    %cst_9 = arith.constant dense<0.000000e+00> : vector<64x64xf32>
    %9 = tpu.matmul %6, %8, %cst_9 {dimension_numbers = #tpu.dot_dimension_numbers<[1], [0], [0], [1], [0, 0, 1, 1], [], []>} : vector<64x192xbf16>, vector<192x64xbf16>, vector<64x64xf32> -> vector<64x64xf32>
    %10 = arith.addf %4, %9 : vector<64x64xf32>
    %c0_10 = arith.constant 0 : index
    %c16 = arith.constant 16 : index
    %c0_11 = arith.constant 0 : index
    %11 = vector.load %arg1[%c0_10, %c16, %c0_11] : memref<1x80x192xbf16, #tpu.memory_space<vmem>>, vector<1x64x192xbf16>
    %12 = vector.shape_cast %11 : vector<1x64x192xbf16> to vector<64x192xbf16>
    %c2 = arith.constant 2 : index
    %c0_12 = arith.constant 0 : index
    %c0_13 = arith.constant 0 : index
    %13 = vector.load %arg2[%c2, %c0_12, %c0_13] : memref<3x192x64xbf16, #tpu.memory_space<vmem>>, vector<1x192x64xbf16>
    %14 = vector.shape_cast %13 : vector<1x192x64xbf16> to vector<192x64xbf16>
    %cst_14 = arith.constant dense<0.000000e+00> : vector<64x64xf32>
    %15 = tpu.matmul %12, %14, %cst_14 {dimension_numbers = #tpu.dot_dimension_numbers<[1], [0], [0], [1], [0, 0, 1, 1], [], []>} : vector<64x192xbf16>, vector<192x64xbf16>, vector<64x64xf32> -> vector<64x64xf32>
    %16 = arith.addf %10, %15 : vector<64x64xf32>
    %cst_15 = arith.constant dense<0.000000e+00> : vector<64xf32>
    %17 = vector.multi_reduction <add>, %16, %cst_15 [0] : vector<64x64xf32> to vector<64xf32>
    %18 = vector.shape_cast %17 : vector<64xf32> to vector<1x64xf32>
    %c0_16 = arith.constant 0 : index
    %c0_17 = arith.constant 0 : index
    %c0_18 = arith.constant 0 : index
    %19 = vector.load %arg4[%c0_16, %c0_17, %c0_18] : memref<1x1x64xf32, #tpu.memory_space<vmem>>, vector<1x1x64xf32>
    %20 = vector.shape_cast %19 : vector<1x1x64xf32> to vector<1x64xf32>
    %21 = vector.shape_cast %18 : vector<1x64xf32> to vector<1x1x64xf32>
    tpu.vector_store %arg4[%c0_16, %c0_17, %c0_18], %21 {strides = array<i32>} : memref<1x1x64xf32, #tpu.memory_space<vmem>>, vector<1x1x64xf32>,
    %22 = arith.mulf %16, %16 : vector<64x64xf32>
    %cst_19 = arith.constant dense<0.000000e+00> : vector<64xf32>
    %23 = vector.multi_reduction <add>, %22, %cst_19 [0] : vector<64x64xf32> to vector<64xf32>
    %24 = vector.shape_cast %23 : vector<64xf32> to vector<1x64xf32>
    %c0_20 = arith.constant 0 : index
    %c0_21 = arith.constant 0 : index
    %c0_22 = arith.constant 0 : index
    %25 = vector.load %arg5[%c0_20, %c0_21, %c0_22] : memref<1x1x64xf32, #tpu.memory_space<vmem>>, vector<1x1x64xf32>
    %26 = vector.shape_cast %25 : vector<1x1x64xf32> to vector<1x64xf32>
    %27 = vector.shape_cast %24 : vector<1x64xf32> to vector<1x1x64xf32>
    tpu.vector_store %arg5[%c0_20, %c0_21, %c0_22], %27 {strides = array<i32>} : memref<1x1x64xf32, #tpu.memory_space<vmem>>, vector<1x1x64xf32>,
    %28 = arith.truncf %16 : vector<64x64xf32> to vector<64x64xbf16>
    %c0_23 = arith.constant 0 : index
    %c0_24 = arith.constant 0 : index
    %c0_25 = arith.constant 0 : index
    %29 = vector.load %arg3[%c0_23, %c0_24, %c0_25] : memref<1x64x64xbf16, #tpu.memory_space<vmem>>, vector<1x64x64xbf16>
    %30 = vector.shape_cast %29 : vector<1x64x64xbf16> to vector<64x64xbf16>
    %31 = vector.shape_cast %28 : vector<64x64xbf16> to vector<1x64x64xbf16>
    tpu.vector_store %arg3[%c0_23, %c0_24, %c0_25], %31 {strides = array<i32>} : memref<1x64x64xbf16, #tpu.memory_space<vmem>>, vector<1x64x64xbf16>,
    return
  }
  func.func @transform_0(%arg0: i32) -> (i32, i32, i32) {
    %c0_i32 = arith.constant 0 : i32
    %c0_i32_0 = arith.constant 0 : i32
    %c0_i32_1 = arith.constant 0 : i32
    return %arg0, %c0_i32, %c0_i32_0 : i32, i32, i32
  }
  func.func @transform_1(%arg0: i32) -> (i32, i32, i32) {
    %c0_i32 = arith.constant 0 : i32
    %c0_i32_0 = arith.constant 0 : i32
    %c0_i32_1 = arith.constant 0 : i32
    %c0_i32_2 = arith.constant 0 : i32
    return %c0_i32, %c0_i32_0, %c0_i32_1 : i32, i32, i32
  }
  func.func @transform_2(%arg0: i32) -> (i32, i32, i32) {
    %c0_i32 = arith.constant 0 : i32
    %c0_i32_0 = arith.constant 0 : i32
    %c0_i32_1 = arith.constant 0 : i32
    return %arg0, %c0_i32, %c0_i32_0 : i32, i32, i32
  }
  func.func @transform_3(%arg0: i32) -> (i32, i32, i32) {
    %c0_i32 = arith.constant 0 : i32
    %c0_i32_0 = arith.constant 0 : i32
    %c0_i32_1 = arith.constant 0 : i32
    return %arg0, %c0_i32, %c0_i32_0 : i32, i32, i32
  }
  func.func @transform_4(%arg0: i32) -> (i32, i32, i32) {
    %c0_i32 = arith.constant 0 : i32
    %c0_i32_0 = arith.constant 0 : i32
    %c0_i32_1 = arith.constant 0 : i32
    return %arg0, %c0_i32, %c0_i32_0 : i32, i32, i32
  }
}

module attributes {stable_mosaic.version = 11 : i64} {
  func.func @_mm_stats_kernel(%arg0: i32, %arg1: memref<128x32xbf16, #tpu.memory_space<vmem>>, %arg2: memref<32x64xbf16, #tpu.memory_space<vmem>>, %arg3: memref<128x64xbf16, #tpu.memory_space<vmem>>, %arg4: memref<1x1x64xf32, #tpu.memory_space<vmem>>, %arg5: memref<1x1x64xf32, #tpu.memory_space<vmem>>) attributes {dimension_semantics = [#tpu.dimension_semantics<parallel>], iteration_bounds = array<i64: 1>, scalar_prefetch = 0 : i64, scratch_operands = 0 : i64, tpu.core_type = #tpu.core_type<tc>, window_params = [{transform_indices = @transform_0, window_bounds = array<i64: 128, 32>}, {pipeline_mode = #tpu.pipeline_mode<synchronous>, transform_indices = @transform_1, window_bounds = array<i64: 32, 64>}, {transform_indices = @transform_2, window_bounds = array<i64: 128, 64>}, {transform_indices = @transform_3, window_bounds = array<i64: 1, 1, 64>}, {transform_indices = @transform_4, window_bounds = array<i64: 1, 1, 64>}]} {
    %c0 = arith.constant 0 : index
    %c0_0 = arith.constant 0 : index
    %0 = vector.load %arg1[%c0, %c0_0] : memref<128x32xbf16, #tpu.memory_space<vmem>>, vector<128x32xbf16>
    %c0_1 = arith.constant 0 : index
    %c0_2 = arith.constant 0 : index
    %1 = vector.load %arg2[%c0_1, %c0_2] : memref<32x64xbf16, #tpu.memory_space<vmem>>, vector<32x64xbf16>
    %cst = arith.constant dense<0.000000e+00> : vector<128x64xf32>
    %2 = tpu.matmul %0, %1, %cst {dimension_numbers = #tpu.dot_dimension_numbers<[1], [0], [0], [1], [0, 0, 1, 1], [], []>} : vector<128x32xbf16>, vector<32x64xbf16>, vector<128x64xf32> -> vector<128x64xf32>
    %cst_3 = arith.constant dense<0.000000e+00> : vector<64xf32>
    %3 = vector.multi_reduction <add>, %2, %cst_3 [0] : vector<128x64xf32> to vector<64xf32>
    %4 = vector.shape_cast %3 : vector<64xf32> to vector<1x64xf32>
    %c0_4 = arith.constant 0 : index
    %c0_5 = arith.constant 0 : index
    %c0_6 = arith.constant 0 : index
    %5 = vector.load %arg4[%c0_4, %c0_5, %c0_6] : memref<1x1x64xf32, #tpu.memory_space<vmem>>, vector<1x1x64xf32>
    %6 = vector.shape_cast %5 : vector<1x1x64xf32> to vector<1x64xf32>
    %7 = vector.shape_cast %4 : vector<1x64xf32> to vector<1x1x64xf32>
    tpu.vector_store %arg4[%c0_4, %c0_5, %c0_6], %7 {strides = array<i32>} : memref<1x1x64xf32, #tpu.memory_space<vmem>>, vector<1x1x64xf32>,
    %8 = arith.mulf %2, %2 : vector<128x64xf32>
    %cst_7 = arith.constant dense<0.000000e+00> : vector<64xf32>
    %9 = vector.multi_reduction <add>, %8, %cst_7 [0] : vector<128x64xf32> to vector<64xf32>
    %10 = vector.shape_cast %9 : vector<64xf32> to vector<1x64xf32>
    %c0_8 = arith.constant 0 : index
    %c0_9 = arith.constant 0 : index
    %c0_10 = arith.constant 0 : index
    %11 = vector.load %arg5[%c0_8, %c0_9, %c0_10] : memref<1x1x64xf32, #tpu.memory_space<vmem>>, vector<1x1x64xf32>
    %12 = vector.shape_cast %11 : vector<1x1x64xf32> to vector<1x64xf32>
    %13 = vector.shape_cast %10 : vector<1x64xf32> to vector<1x1x64xf32>
    tpu.vector_store %arg5[%c0_8, %c0_9, %c0_10], %13 {strides = array<i32>} : memref<1x1x64xf32, #tpu.memory_space<vmem>>, vector<1x1x64xf32>,
    %14 = arith.truncf %2 : vector<128x64xf32> to vector<128x64xbf16>
    %c0_11 = arith.constant 0 : index
    %c0_12 = arith.constant 0 : index
    %15 = vector.load %arg3[%c0_11, %c0_12] : memref<128x64xbf16, #tpu.memory_space<vmem>>, vector<128x64xbf16>
    tpu.vector_store %arg3[%c0_11, %c0_12], %14 {strides = array<i32>} : memref<128x64xbf16, #tpu.memory_space<vmem>>, vector<128x64xbf16>,
    return
  }
  func.func @transform_0(%arg0: i32) -> (i32, i32) {
    %c0_i32 = arith.constant 0 : i32
    %c0_i32_0 = arith.constant 0 : i32
    return %arg0, %c0_i32 : i32, i32
  }
  func.func @transform_1(%arg0: i32) -> (i32, i32) {
    %c0_i32 = arith.constant 0 : i32
    %c0_i32_0 = arith.constant 0 : i32
    %c0_i32_1 = arith.constant 0 : i32
    return %c0_i32, %c0_i32_0 : i32, i32
  }
  func.func @transform_2(%arg0: i32) -> (i32, i32) {
    %c0_i32 = arith.constant 0 : i32
    %c0_i32_0 = arith.constant 0 : i32
    return %arg0, %c0_i32 : i32, i32
  }
  func.func @transform_3(%arg0: i32) -> (i32, i32, i32) {
    %c0_i32 = arith.constant 0 : i32
    %c0_i32_0 = arith.constant 0 : i32
    %c0_i32_1 = arith.constant 0 : i32
    return %arg0, %c0_i32, %c0_i32_0 : i32, i32, i32
  }
  func.func @transform_4(%arg0: i32) -> (i32, i32, i32) {
    %c0_i32 = arith.constant 0 : i32
    %c0_i32_0 = arith.constant 0 : i32
    %c0_i32_1 = arith.constant 0 : i32
    return %arg0, %c0_i32, %c0_i32_0 : i32, i32, i32
  }
}

module attributes {stable_mosaic.version = 11 : i64} {
  func.func @_bn_apply_kernel(%arg0: i32, %arg1: memref<16x512xbf16, #tpu.memory_space<vmem>>, %arg2: memref<1x512xf32, #tpu.memory_space<vmem>>, %arg3: memref<1x512xf32, #tpu.memory_space<vmem>>, %arg4: memref<16x512xbf16, #tpu.memory_space<vmem>>, %arg5: memref<1x512xf32, #tpu.memory_space<vmem>>, %arg6: memref<1x512xf32, #tpu.memory_space<vmem>>, %arg7: memref<16x512xf32, #tpu.memory_space<vmem>>) attributes {dimension_semantics = [#tpu.dimension_semantics<parallel>], iteration_bounds = array<i64: 1>, scalar_prefetch = 0 : i64, scratch_operands = 0 : i64, tpu.core_type = #tpu.core_type<tc>, window_params = [{transform_indices = @transform_0, window_bounds = array<i64: 16, 512>}, {pipeline_mode = #tpu.pipeline_mode<synchronous>, transform_indices = @transform_1, window_bounds = array<i64: 1, 512>}, {pipeline_mode = #tpu.pipeline_mode<synchronous>, transform_indices = @transform_2, window_bounds = array<i64: 1, 512>}, {transform_indices = @transform_3, window_bounds = array<i64: 16, 512>}, {pipeline_mode = #tpu.pipeline_mode<synchronous>, transform_indices = @transform_4, window_bounds = array<i64: 1, 512>}, {pipeline_mode = #tpu.pipeline_mode<synchronous>, transform_indices = @transform_5, window_bounds = array<i64: 1, 512>}, {transform_indices = @transform_6, window_bounds = array<i64: 16, 512>}]} {
    %c0 = arith.constant 0 : index
    %c0_0 = arith.constant 0 : index
    %0 = vector.load %arg1[%c0, %c0_0] : memref<16x512xbf16, #tpu.memory_space<vmem>>, vector<16x512xbf16>
    %1 = arith.extf %0 : vector<16x512xbf16> to vector<16x512xf32>
    %c0_1 = arith.constant 0 : index
    %c0_2 = arith.constant 0 : index
    %2 = vector.load %arg2[%c0_1, %c0_2] : memref<1x512xf32, #tpu.memory_space<vmem>>, vector<1x512xf32>
    %3 = vector.broadcast %2 : vector<1x512xf32> to vector<16x512xf32>
    %4 = arith.mulf %1, %3 : vector<16x512xf32>
    %c0_3 = arith.constant 0 : index
    %c0_4 = arith.constant 0 : index
    %5 = vector.load %arg3[%c0_3, %c0_4] : memref<1x512xf32, #tpu.memory_space<vmem>>, vector<1x512xf32>
    %6 = vector.broadcast %5 : vector<1x512xf32> to vector<16x512xf32>
    %7 = arith.addf %4, %6 : vector<16x512xf32>
    %c0_5 = arith.constant 0 : index
    %c0_6 = arith.constant 0 : index
    %8 = vector.load %arg4[%c0_5, %c0_6] : memref<16x512xbf16, #tpu.memory_space<vmem>>, vector<16x512xbf16>
    %9 = arith.extf %8 : vector<16x512xbf16> to vector<16x512xf32>
    %c0_7 = arith.constant 0 : index
    %c0_8 = arith.constant 0 : index
    %10 = vector.load %arg5[%c0_7, %c0_8] : memref<1x512xf32, #tpu.memory_space<vmem>>, vector<1x512xf32>
    %11 = vector.broadcast %10 : vector<1x512xf32> to vector<16x512xf32>
    %12 = arith.mulf %9, %11 : vector<16x512xf32>
    %c0_9 = arith.constant 0 : index
    %c0_10 = arith.constant 0 : index
    %13 = vector.load %arg6[%c0_9, %c0_10] : memref<1x512xf32, #tpu.memory_space<vmem>>, vector<1x512xf32>
    %14 = vector.broadcast %13 : vector<1x512xf32> to vector<16x512xf32>
    %15 = arith.addf %12, %14 : vector<16x512xf32>
    %16 = arith.addf %7, %15 : vector<16x512xf32>
    %cst = arith.constant 0.000000e+00 : f32
    %17 = vector.broadcast %cst : f32 to vector<16x512xf32>
    %18 = arith.maximumf %16, %17 : vector<16x512xf32>
    %c0_11 = arith.constant 0 : index
    %c0_12 = arith.constant 0 : index
    %19 = vector.load %arg7[%c0_11, %c0_12] : memref<16x512xf32, #tpu.memory_space<vmem>>, vector<16x512xf32>
    tpu.vector_store %arg7[%c0_11, %c0_12], %18 {strides = array<i32>} : memref<16x512xf32, #tpu.memory_space<vmem>>, vector<16x512xf32>,
    return
  }
  func.func @transform_0(%arg0: i32) -> (i32, i32) {
    %c0_i32 = arith.constant 0 : i32
    %c0_i32_0 = arith.constant 0 : i32
    return %arg0, %c0_i32 : i32, i32
  }
  func.func @transform_1(%arg0: i32) -> (i32, i32) {
    %c0_i32 = arith.constant 0 : i32
    %c0_i32_0 = arith.constant 0 : i32
    %c0_i32_1 = arith.constant 0 : i32
    return %c0_i32, %c0_i32_0 : i32, i32
  }
  func.func @transform_2(%arg0: i32) -> (i32, i32) {
    %c0_i32 = arith.constant 0 : i32
    %c0_i32_0 = arith.constant 0 : i32
    %c0_i32_1 = arith.constant 0 : i32
    return %c0_i32, %c0_i32_0 : i32, i32
  }
  func.func @transform_3(%arg0: i32) -> (i32, i32) {
    %c0_i32 = arith.constant 0 : i32
    %c0_i32_0 = arith.constant 0 : i32
    return %arg0, %c0_i32 : i32, i32
  }
  func.func @transform_4(%arg0: i32) -> (i32, i32) {
    %c0_i32 = arith.constant 0 : i32
    %c0_i32_0 = arith.constant 0 : i32
    %c0_i32_1 = arith.constant 0 : i32
    return %c0_i32, %c0_i32_0 : i32, i32
  }
  func.func @transform_5(%arg0: i32) -> (i32, i32) {
    %c0_i32 = arith.constant 0 : i32
    %c0_i32_0 = arith.constant 0 : i32
    %c0_i32_1 = arith.constant 0 : i32
    return %c0_i32, %c0_i32_0 : i32, i32
  }
  func.func @transform_6(%arg0: i32) -> (i32, i32) {
    %c0_i32 = arith.constant 0 : i32
    %c0_i32_0 = arith.constant 0 : i32
    return %arg0, %c0_i32 : i32, i32
  }
}

</mosaic_0001>

<bundles_post_ra>
// kernel: run.10
= control target key start
LH: loop header
LB: loop body
LE: loop exit
PB: predicated region body
PF: predicated region fallthrough
CT: control target
= control target key end

     0   :  { %v40_v0 = vlaneseq  ;;  %s254_s0 = inlined_call_operand.vmem [shape: bf16[32,512], index: 0, kind: input, shape index: {}]   ;;  %s255_s1 = inlined_call_operand.vmem [shape: f32[1,512], index: 1, kind: input, shape index: {}]   ;;  %s256_s2 = inlined_call_operand.vmem [shape: f32[1,512], index: 2, kind: input, shape index: {}]   ;;  %s257_s3 = inlined_call_operand.vmem [shape: f32[32,512], index: 3, kind: output, shape index: {}]  }
   0x1   :  { %v14_v1 = vld [vmem:[%s254_s0] sm:$0xff]  ;;  %v15_v5 = vld [vmem:[%s254_s0 + $0x8] sm:$0xff]  ;;  %v16_v6 = vld [vmem:[%s254_s0 + $0x10] sm:$0xff] }
   0x2   :  { %v22_v2 = vunpack.c.l.bf16 %v14_v1  ;;  %v41_v3 = vshrl.u32 %v40_v0, 7  ;;  %v23_v4 = vunpack.c.h.bf16 %v14_v1  ;;  %v17_v7 = vld [vmem:[%s254_s0 + $0x18] sm:$0xff]  ;;  %v38_v8 = vld [vmem:[%s255_s1] sm:$0xf]  ;;  %v24_v10 = vunpack.c.l.bf16 %v15_v5  ;;  %v19_v47 = vld [vmem:[%s254_s0 + $0x28] sm:$0xff] }
   0x3   :  { %v76_v9 = vld [vmem:[%s256_s2] sm:$0xf]  ;;  %v25_v11 = vunpack.c.h.bf16 %v15_v5  ;;  %v26_v12 = vunpack.c.l.bf16 %v16_v6  ;;  %v27_v13 = vunpack.c.h.bf16 %v16_v6  ;;  %v28_v19 = vunpack.c.l.bf16 %v17_v7  ;;  %v20_v52 = vld [vmem:[%s254_s0 + $0x30] sm:$0xff]  ;;  %v21_v53 = vld [vmem:[%s254_s0 + $0x38] sm:$0xff] }
   0x4   :  { %v18_v14 = vld [vmem:[%s254_s0 + $0x20] sm:$0xff]  ;;  %v42_v15 = vsub.s32 0, %v41_v3  ;;  %v46_v16 = vsub.s32 1, %v41_v3  ;;  %v50_v17 = vsub.s32 2, %v41_v3  ;;  %v54_v18 = vsub.s32 3, %v41_v3 }
   0x5   :  { %v29_v20 = vunpack.c.h.bf16 %v17_v7  ;;  %v30_v21 = vunpack.c.l.bf16 %v18_v14  ;;  %v31_v22 = vunpack.c.h.bf16 %v18_v14  ;;  %v32_v60 = vunpack.c.l.bf16 %v19_v47 }
   0x6   :  { %v43_v23 = vrot.slane %v38_v8, %v42_v15  ;;  %v191_v24 = vrot.slane %v76_v9, %v42_v15  ;;  %v47_v25 = vrot.slane %v38_v8, %v46_v16  ;;  %v85_v26 = vrot.slane %v76_v9, %v46_v16 }
   0x7   :  { %v51_v27 = vrot.slane %v38_v8, %v50_v17  ;;  %v89_v28 = vrot.slane %v76_v9, %v50_v17  ;;  %v55_v29 = vrot.slane %v38_v8, %v54_v18  ;;  %v93_v30 = vrot.slane %v76_v9, %v54_v18 }
   0x8   :  { %v60_v31 = vmul.f32 %v43_v23, %v22_v2  ;;  %v61_v32 = vmul.f32 %v47_v25, %v23_v4  ;;  %v64_v33 = vmul.f32 %v43_v23, %v26_v12  ;;  %v65_v34 = vmul.f32 %v47_v25, %v27_v13 }
   0x9   :  { %v62_v35 = vmul.f32 %v51_v27, %v24_v10  ;;  %v63_v36 = vmul.f32 %v55_v29, %v25_v11  ;;  %v66_v37 = vmul.f32 %v51_v27, %v28_v19  ;;  %v67_v38 = vmul.f32 %v55_v29, %v29_v20 }
   0xa   :  { %v98_v39 = vadd.f32 %v191_v24, %v60_v31  ;;  %v99_v40 = vadd.f32 %v85_v26, %v61_v32  ;;  %v102_v41 = vadd.f32 %v191_v24, %v64_v33  ;;  %v103_v42 = vadd.f32 %v85_v26, %v65_v34 }
   0xb   :  { %v100_v43 = vadd.f32 %v89_v28, %v62_v35  ;;  %v101_v44 = vadd.f32 %v93_v30, %v63_v36  ;;  %v104_v45 = vadd.f32 %v89_v28, %v66_v37  ;;  %v105_v46 = vadd.f32 %v93_v30, %v67_v38 }
   0xc   :  { %v114_v48 = vmax.f32 %v98_v39, 0.0  ;;  %v115_v49 = vmax.f32 %v99_v40, 0.0  ;;  %v118_v50 = vmax.f32 %v102_v41, 0.0  ;;  %v119_v51 = vmax.f32 %v103_v42, 0.0 }
   0xd   :  { %v116_v54 = vmax.f32 %v100_v43, 0.0  ;;  %v117_v55 = vmax.f32 %v101_v44, 0.0  ;;  %v120_v56 = vmax.f32 %v104_v45, 0.0  ;;  %v121_v57 = vmax.f32 %v105_v46, 0.0 }
   0xe   :  { %130 = vst [vmem:[%s257_s3] sm:$0xff] %v114_v48  ;;  %131 = vst [vmem:[%s257_s3 + $0x8] sm:$0xff] %v115_v49  ;;  %v68_v58 = vmul.f32 %v43_v23, %v30_v21  ;;  %v69_v59 = vmul.f32 %v47_v25, %v31_v22  ;;  %v33_v61 = vunpack.c.h.bf16 %v19_v47  ;;  %v34_v62 = vunpack.c.l.bf16 %v20_v52 }
   0xf   :  { %134 = vst [vmem:[%s257_s3 + $0x20] sm:$0xff] %v118_v50  ;;  %135 = vst [vmem:[%s257_s3 + $0x28] sm:$0xff] %v119_v51  ;;  %v35_v63 = vunpack.c.h.bf16 %v20_v52  ;;  %v36_v0 = vunpack.c.l.bf16 %v21_v53  ;;  %v37_v1 = vunpack.c.h.bf16 %v21_v53  ;;  %v70_v4 = vmul.f32 %v51_v27, %v32_v60 }
  0x10   :  { %132 = vst [vmem:[%s257_s3 + $0x10] sm:$0xff] %v116_v54  ;;  %133 = vst [vmem:[%s257_s3 + $0x18] sm:$0xff] %v117_v55  ;;  %v106_v2 = vadd.f32 %v191_v24, %v68_v58  ;;  %v107_v3 = vadd.f32 %v85_v26, %v69_v59  ;;  %v71_v5 = vmul.f32 %v55_v29, %v33_v61 }
  0x11   :  { %136 = vst [vmem:[%s257_s3 + $0x30] sm:$0xff] %v120_v56  ;;  %137 = vst [vmem:[%s257_s3 + $0x38] sm:$0xff] %v121_v57  ;;  %v72_v6 = vmul.f32 %v43_v23, %v34_v62  ;;  %v73_v7 = vmul.f32 %v47_v25, %v35_v63  ;;  %v74_v8 = vmul.f32 %v51_v27, %v36_v0 }
  0x12   :  { %v75_v9 = vmul.f32 %v55_v29, %v37_v1  ;;  %v122_v10 = vmax.f32 %v106_v2, 0.0  ;;  %v123_v11 = vmax.f32 %v107_v3, 0.0  ;;  %v108_v12 = vadd.f32 %v89_v28, %v70_v4 }
  0x13   :  { %v109_v13 = vadd.f32 %v93_v30, %v71_v5  ;;  %v110_v14 = vadd.f32 %v191_v24, %v72_v6  ;;  %v111_v15 = vadd.f32 %v85_v26, %v73_v7  ;;  %v112_v16 = vadd.f32 %v89_v28, %v74_v8 }
  0x14   :  { %v113_v17 = vadd.f32 %v93_v30, %v75_v9  ;;  %138 = vst [vmem:[%s257_s3 + $0x40] sm:$0xff] %v122_v10  ;;  %139 = vst [vmem:[%s257_s3 + $0x48] sm:$0xff] %v123_v11  ;;  %v124_v18 = vmax.f32 %v108_v12, 0.0 }
  0x15   :  { %v125_v19 = vmax.f32 %v109_v13, 0.0  ;;  %v126_v20 = vmax.f32 %v110_v14, 0.0  ;;  %v127_v21 = vmax.f32 %v111_v15, 0.0  ;;  %v128_v22 = vmax.f32 %v112_v16, 0.0 }
  0x16   :  { %v129_v23 = vmax.f32 %v113_v17, 0.0  ;;  %140 = vst [vmem:[%s257_s3 + $0x50] sm:$0xff] %v124_v18 }
  0x17   :  { %141 = vst [vmem:[%s257_s3 + $0x58] sm:$0xff] %v125_v19  ;;  %142 = vst [vmem:[%s257_s3 + $0x60] sm:$0xff] %v126_v20 }
  0x18   :  { %143 = vst [vmem:[%s257_s3 + $0x68] sm:$0xff] %v127_v21  ;;  %144 = vst [vmem:[%s257_s3 + $0x70] sm:$0xff] %v128_v22 }
  0x19   :  { %145 = vst [vmem:[%s257_s3 + $0x78] sm:$0xff] %v129_v23 }

// kernel: run.9
= control target key start
LH: loop header
LB: loop body
LE: loop exit
PB: predicated region body
PF: predicated region fallthrough
CT: control target
= control target key end

     0   :  { %s2149_s15 = smov 0   ;;  %s2563_s0 = inlined_call_operand.vmem [shape: bf16[2,288,96], index: 0, kind: input, shape index: {}]   ;;  %s2564_s1 = inlined_call_operand.vmem [shape: bf16[3,96,32], index: 1, kind: input, shape index: {}]   ;;  %s2565_s2 = inlined_call_operand.vmem [shape: bf16[2,256,32], index: 2, kind: output, shape index: {0}]   ;;  %s2566_s3 = inlined_call_operand.vmem [shape: f32[2,1,32], index: 3, kind: output, shape index: {1}]   ;;  %s2567_s4 = inlined_call_operand.vmem [shape: f32[2,1,32], index: 4, kind: output, shape index: {2}]  }
   0x1 LB: > { %s1648_s16 = sadd.s32 4294967295, %s2122_s15   ;;  %p1652_p0 = scmp.ge.s32.totalorder %s2122_s15, 1  ;;  %s2122_s15 = sphi %s2149_s15, %s15_s15  }
   0x2   : > { %p167_p1 = scmp.lt.s32.totalorder %s2122_s15, 3 }
   0x4   : > { %p168_p2 = pnand %p1652_p0, %p167_p1 }
   0x5   : > { %p199_p3 = scmp.lt.s32.totalorder (!%p168_p2), %s1648_s16, 1 }
   0x6   : > { %171 = sbr.rel (%p168_p2) target bundleno = 349 (0x15d), region = 28 }
   0xb   : > { %v2065_v0 = vld [vmem:[%s2564_s1 + $0x58] sm:$0xff]   ;;  %v2066_v1 = vld [vmem:[%s2564_s1 + $0x50] sm:$0xff]   ;;  %s2569_s16 = smov (!%p199_p3, %s1648_s16), 1  ;;  %v2067_v2 = vld [vmem:[%s2564_s1 + $0x48] sm:$0xff]   ;;  %vm391_vm0 = vcmask 785408   ;;  %vm1510_vm1 = vcmask 257024  }
   0xc   : > { %1912 = vmatprep.subr.bf16.mxu0 %v2065_v0  ;;  %2044 = vmatprep.subr.bf16.mxu1 %v2065_v0  ;;  %s2056_s23 = smul.u32 144, %s2569_s16  ;;  %v2068_v3 = vld [vmem:[%s2564_s1 + $0x40] sm:$0xff]   ;;  %v2069_v6 = vld [vmem:[%s2564_s1 + $0x38] sm:$0xff]   ;;  %v2070_v7 = vld [vmem:[%s2564_s1 + $0x30] sm:$0xff]   ;;  %vm1208_vm2 = vcmask 261120   ;;  %s211_s13 = scalar_lea.vmem %s2566_s3, %s2569_s16  ;;  %vm1278_vm3 = vcmask 253952  }
   0xd   : > { %1913 = vmatpush3.bf16.msra.mxu0 %v2065_v0  ;;  %2050 = vmatpush3.bf16.msra.mxu1 %v2065_v0  ;;  %v2075_v8 = vld [vmem:[%s2564_s1 + $0x28] sm:$0xff]   ;;  %v2077_v12 = vld [vmem:[%s2564_s1 + $0x20] sm:$0xff]   ;;  %v2083_v16 = vld [vmem:[%s2564_s1 + $0x18] sm:$0xff]   ;;  %s214_s18 = scalar_lea.vmem %s2567_s4, %s2569_s16 }
   0xe   : > { %1914 = vmatprep.subr.bf16.mxu0 %v2066_v1  ;;  %2045 = vmatprep.subr.bf16.mxu1 %v2066_v1  ;;  %s2175_s28 = scalar_lea.vmem %s2563_s0, %s2056_s23  ;;  %v2076_v10 = vld [vmem:[%s2564_s1 + $0x88] sm:$0xff]   ;;  %v2082_v15 = vld [vmem:[%s2564_s1 + $0x80] sm:$0xff]   ;;  %v2084_v18 = vld [vmem:[%s2564_s1 + $0x78] sm:$0xff]  }
   0xf   : > { %v2178_v4 = vld [vmem:[%s2175_s28 + $0x8] sm:$0xff]   ;;  %v2197_v9 = vld [vmem:[%s2175_s28 + $0x10] sm:$0xff]   ;;  %v2209_v13 = vld [vmem:[%s2175_s28 + $0x18] sm:$0xff]  }
  0x10   : > { %v2181_v5 = vld [vmem:[%s2175_s28 + $0x48] sm:$0xff]   ;;  %1924 = vmatprep.mubr.msk.bf16.mxu0 %vm391_vm0, %v2178_v4  ;;  %v2203_v11 = vld [vmem:[%s2175_s28 + $0x50] sm:$0xff]   ;;  %v2212_v14 = vld [vmem:[%s2175_s28 + $0x58] sm:$0xff]  }
  0x11   : > { %1915 = vmatpush3.bf16.msra.mxu0 %v2066_v1  ;;  %2051 = vmatpush3.bf16.msra.mxu1 %v2066_v1  ;;  %v2080_v17 = vld [vmem:[%s2175_s28 + $0x20] sm:$0xff]   ;;  %v2085_v20 = vld [vmem:[%s2175_s28 + $0x28] sm:$0xff]   ;;  %v2089_v22 = vld [vmem:[%s2564_s1 + $0x10] sm:$0xff]  }
  0x12   : > { %1916 = vmatprep.subr.bf16.mxu0 %v2067_v2  ;;  %2046 = vmatprep.subr.bf16.mxu1 %v2067_v2  ;;  %v2233_v19 = vld [vmem:[%s2175_s28 + $0x60] sm:$0xff]   ;;  %v2237_v21 = vld [vmem:[%s2175_s28 + $0x68] sm:$0xff]   ;;  %v2090_v23 = vld [vmem:[%s2564_s1 + $0x70] sm:$0xff]  }
  0x13   : > { %1940 = vmatprep.mubr.msk.bf16.mxu1 %vm391_vm0, %v2181_v5  ;;  %v2091_v24 = vld [vmem:[%s2564_s1 + $0x8] sm:$0xff]   ;;  %v2087_v25 = vld [vmem:[%s2175_s28 + $0x30] sm:$0xff]   ;;  %v2092_v28 = vld [vmem:[%s2175_s28 + $0x38] sm:$0xff]  }
  0x14   : > { %v2096_v26 = vld [vmem:[%s2564_s1 + $0x68] sm:$0xff]   ;;  %v2259_v27 = vld [vmem:[%s2175_s28 + $0x70] sm:$0xff]   ;;  %v2263_v29 = vld [vmem:[%s2175_s28 + $0x78] sm:$0xff]  }
  0x15   : > { %1917 = vmatpush3.bf16.msra.mxu0 %v2067_v2  ;;  %2052 = vmatpush3.bf16.msra.mxu1 %v2067_v2  ;;  %v2097_v30 = vld [vmem:[%s2564_s1] sm:$0xff]   ;;  %v2100_v35 = vld [vmem:[%s2175_s28 + $0x10] sm:$0xff]   ;;  %v2101_v36 = vld [vmem:[%s2175_s28 + $0x18] sm:$0xff]  }
  0x16   : > { %1918 = vmatprep.subr.bf16.mxu0 %v2068_v3  ;;  %2047 = vmatprep.subr.bf16.mxu1 %v2068_v3  ;;  %v2098_v31 = vld [vmem:[%s2564_s1 + $0x60] sm:$0xff]   ;;  %v2103_v38 = vld [vmem:[%s2175_s28 + $0x28] sm:$0xff]   ;;  %v2104_v39 = vld [vmem:[%s2175_s28 + $0x30] sm:$0xff]  }
  0x17   : > { %v2094_v32 = vld [vmem:[%s2175_s28 + $0x40] sm:$0xff]   ;;  %v2105_v40 = vld [vmem:[%s2175_s28 + $0x38] sm:$0xff]   ;;  %v2107_v42 = vld [vmem:[%s2175_s28 + $0x48] sm:$0xff]  }
  0x18   : > { %v2095_v33 = vld [vmem:[%s2175_s28 + $0x80] sm:$0xff]   ;;  %v2108_v43 = vld [vmem:[%s2175_s28 + $0x50] sm:$0xff]   ;;  %v2109_v44 = vld [vmem:[%s2175_s28 + $0x58] sm:$0xff]  }
  0x19   : > { %1919 = vmatpush3.bf16.msra.mxu0 %v2068_v3  ;;  %2053 = vmatpush3.bf16.msra.mxu1 %v2068_v3  ;;  %v2099_v34 = vld [vmem:[%s2175_s28] sm:$0xff]   ;;  %v2111_v46 = vld [vmem:[%s2175_s28 + $0x68] sm:$0xff]   ;;  %v2112_v47 = vld [vmem:[%s2175_s28 + $0x70] sm:$0xff]  }
  0x1a   : > { %1920 = vmatprep.subr.bf16.mxu0 %v2069_v6  ;;  %2048 = vmatprep.subr.bf16.mxu1 %v2069_v6  ;;  %v2102_v37 = vld [vmem:[%s2175_s28 + $0x20] sm:$0xff]   ;;  %v2113_v48 = vld [vmem:[%s2175_s28 + $0x78] sm:$0xff]   ;;  %v2115_v50 = vld [vmem:[%s2175_s28 + $0x88] sm:$0xff]  }
  0x1b   : > { %v2106_v41 = vld [vmem:[%s2175_s28 + $0x40] sm:$0xff]  }
  0x1c   : > { %v2110_v45 = vld [vmem:[%s2175_s28 + $0x60] sm:$0xff]  }
  0x1d   : > { %1921 = vmatpush3.bf16.msra.mxu0 %v2069_v6  ;;  %2054 = vmatpush3.bf16.msra.mxu1 %v2069_v6  ;;  %v2114_v49 = vld [vmem:[%s2175_s28 + $0x80] sm:$0xff]   ;;  %s1813_s28 = sshll.u32 %s2569_s16, 7 }
  0x1e   : > { %1922 = vmatprep.subr.bf16.mxu0 %v2070_v7  ;;  %2049 = vmatprep.subr.bf16.mxu1 %v2070_v7  ;;  %s2396_s10 = scalar_lea.vmem %s2565_s2, %s1813_s28 }
  0x21   : > { %1923 = vmatpush3.bf16.msra.mxu0 %v2070_v7  ;;  %2055 = vmatpush3.bf16.msra.mxu1 %v2070_v7 }
  0x22   : > { %1956 = vmatprep.subr.bf16.mxu1 %v2075_v8  ;;  %2000 = vmatprep.subr.bf16.mxu0 %v2076_v10 }
  0x24   : > { %1925 = vmatmul.mubr.msk.bf16.vlgmr.msra.gmra.mxu0 %vm391_vm0, %v2197_v9  ;;  %1941 = vmatmul.mubr.msk.bf16.vlgmr.msra.gmra.mxu1 %vm391_vm0, %v2203_v11 }
  0x25   : > { %1957 = vmatpush3.bf16.msra.mxu1 %v2075_v8  ;;  %2001 = vmatpush3.bf16.msra.mxu0 %v2076_v10 }
  0x26   : > { %1958 = vmatprep.subr.bf16.mxu1 %v2077_v12  ;;  %1928 = vmatprep.mubr.msk.bf16.mxu0 %vm391_vm0, %v2209_v13 }
  0x27   : > { %1944 = vmatprep.mubr.msk.bf16.mxu1 %vm391_vm0, %v2212_v14  ;;  %2002 = vmatprep.subr.bf16.mxu0 %v2082_v15 }
  0x29   : > { %1959 = vmatpush3.bf16.msra.mxu1 %v2077_v12  ;;  %2003 = vmatpush3.bf16.msra.mxu0 %v2082_v15 }
  0x2a   : > { %1960 = vmatprep.subr.bf16.mxu1 %v2083_v16  ;;  %2004 = vmatprep.subr.bf16.mxu0 %v2084_v18 }
  0x2c   : > { %1929 = vmatmul.mubr.msk.bf16.gmra.mxu0 %vm391_vm0, %v2080_v17  ;;  %1945 = vmatmul.mubr.msk.bf16.gmra.mxu1 %vm391_vm0, %v2233_v19 }
  0x2d   : > { %1961 = vmatpush3.bf16.msra.mxu1 %v2083_v16  ;;  %2005 = vmatpush3.bf16.msra.mxu0 %v2084_v18 }
  0x2e   : > { %1932 = vmatprep.mubr.msk.bf16.mxu0 %vm391_vm0, %v2085_v20  ;;  %1948 = vmatprep.mubr.msk.bf16.mxu1 %vm391_vm0, %v2237_v21 }
  0x2f   : > { %1962 = vmatprep.subr.bf16.mxu1 %v2089_v22  ;;  %2006 = vmatprep.subr.bf16.mxu0 %v2090_v23 }
  0x31   : > { %1963 = vmatpush3.bf16.msra.mxu1 %v2089_v22  ;;  %2007 = vmatpush3.bf16.msra.mxu0 %v2090_v23 }
  0x32   : > { %1964 = vmatprep.subr.bf16.mxu1 %v2091_v24  ;;  %2008 = vmatprep.subr.bf16.mxu0 %v2096_v26 }
  0x34   : > { %1933 = vmatmul.mubr.msk.bf16.gmra.mxu0 %vm391_vm0, %v2087_v25  ;;  %1949 = vmatmul.mubr.msk.bf16.gmra.mxu1 %vm391_vm0, %v2259_v27 }
  0x35   : > { %1936 = vmatprep.mubr.msk.bf16.mxu0 %vm391_vm0, %v2092_v28  ;;  %1952 = vmatprep.mubr.msk.bf16.mxu1 %vm391_vm0, %v2263_v29 }
  0x36   : > { %1965 = vmatpush3.bf16.msra.mxu1 %v2091_v24  ;;  %2009 = vmatpush3.bf16.msra.mxu0 %v2096_v26 }
  0x37   : > { %1966 = vmatprep.subr.bf16.mxu1 %v2097_v30  ;;  %2010 = vmatprep.subr.bf16.mxu0 %v2098_v31 }
  0x3a   : > { %1967 = vmatpush3.bf16.msra.mxu1 %v2097_v30  ;;  %2011 = vmatpush3.bf16.msra.mxu0 %v2098_v31 }
  0x3c   : > { %1937 = vmatmul.mubr.msk.bf16.gmra.mxu0 %vm391_vm0, %v2094_v32  ;;  %1953 = vmatmul.mubr.msk.bf16.gmra.mxu1 %vm391_vm0, %v2095_v33 }
  0x3d   : > { %1968 = vmatprep.mubr.msk.bf16.mxu1 %vm391_vm0, %v2099_v34  ;;  %2012 = vmatprep.mubr.msk.bf16.mxu0 %vm391_vm0, %v2100_v35 }
  0x44   : > { %1969 = vmatmul.mubr.msk.bf16.vlgmr.msra.gmra.mxu1 %vm391_vm0, %v2178_v4  ;;  %2013 = vmatmul.mubr.msk.bf16.vlgmr.msra.gmra.mxu0 %vm391_vm0, %v2101_v36 }
  0x45   : > { %1972 = vmatprep.mubr.msk.bf16.mxu1 %vm391_vm0, %v2197_v9  ;;  %2016 = vmatprep.mubr.msk.bf16.mxu0 %vm391_vm0, %v2102_v37 }
  0x4c   : > { %1973 = vmatmul.mubr.msk.bf16.gmra.mxu1 %vm391_vm0, %v2209_v13  ;;  %2017 = vmatmul.mubr.msk.bf16.gmra.mxu0 %vm391_vm0, %v2103_v38 }
  0x4d   : > { %1976 = vmatprep.mubr.msk.bf16.mxu1 %vm391_vm0, %v2080_v17  ;;  %2020 = vmatprep.mubr.msk.bf16.mxu0 %vm391_vm0, %v2104_v39 }
  0x54   : > { %1977 = vmatmul.mubr.msk.bf16.gmra.mxu1 %vm391_vm0, %v2085_v20  ;;  %2021 = vmatmul.mubr.msk.bf16.gmra.mxu0 %vm391_vm0, %v2105_v40 }
  0x55   : > { %1980 = vmatprep.mubr.msk.bf16.mxu1 %vm391_vm0, %v2087_v25  ;;  %2024 = vmatprep.mubr.msk.bf16.mxu0 %vm391_vm0, %v2106_v41 }
  0x5c   : > { %1981 = vmatmul.mubr.msk.bf16.gmra.mxu1 %vm391_vm0, %v2092_v28  ;;  %2025 = vmatmul.mubr.msk.bf16.gmra.mxu0 %vm391_vm0, %v2107_v42 }
  0x5d   : > { %1984 = vmatprep.mubr.msk.bf16.mxu1 %vm391_vm0, %v2094_v32  ;;  %2028 = vmatprep.mubr.msk.bf16.mxu0 %vm391_vm0, %v2108_v43 }
  0x64   : > { %1985 = vmatmul.mubr.msk.bf16.gmra.mxu1 %vm391_vm0, %v2181_v5  ;;  %2029 = vmatmul.mubr.msk.bf16.gmra.mxu0 %vm391_vm0, %v2109_v44 }
  0x65   : > { %1988 = vmatprep.mubr.msk.bf16.mxu1 %vm391_vm0, %v2203_v11  ;;  %2032 = vmatprep.mubr.msk.bf16.mxu0 %vm391_vm0, %v2110_v45 }
  0x6c   : > { %1989 = vmatmul.mubr.msk.bf16.gmra.mxu1 %vm391_vm0, %v2212_v14  ;;  %2033 = vmatmul.mubr.msk.bf16.gmra.mxu0 %vm391_vm0, %v2111_v46 }
  0x6d   : > { %1992 = vmatprep.mubr.msk.bf16.mxu1 %vm391_vm0, %v2233_v19  ;;  %2036 = vmatprep.mubr.msk.bf16.mxu0 %vm391_vm0, %v2112_v47 }
  0x74   : > { %1993 = vmatmul.mubr.msk.bf16.gmra.mxu1 %vm391_vm0, %v2237_v21  ;;  %2037 = vmatmul.mubr.msk.bf16.gmra.mxu0 %vm391_vm0, %v2113_v48 }
  0x75   : > { %1996 = vmatprep.mubr.msk.bf16.mxu1 %vm391_vm0, %v2259_v27  ;;  %2040 = vmatprep.mubr.msk.bf16.mxu0 %vm391_vm0, %v2114_v49 }
  0x7c   : > { %1997 = vmatmul.mubr.msk.bf16.gmra.mxu1 %vm391_vm0, %v2263_v29  ;;  %2041 = vmatmul.mubr.msk.bf16.gmra.mxu0 %vm391_vm0, %v2115_v50 }
  0xe4   : > { %v1926_v51 = vpop.f32.mrf.mxu0  ;;  %v2340_v52 = vpop.f32.mrf.mxu1 }
  0xe6   : > { %v474_v53 = vpop.f32.mrf.mxu0  ;;  %v2342_v54 = vpop.f32.mrf.mxu1 }
  0xe8   : > { %v1927_v55 = vpop.f32.mrf.mxu0  ;;  %v2344_v56 = vpop.f32.mrf.mxu1 }
  0xea   : > { %v477_v57 = vpop.f32.mrf.mxu0  ;;  %v2346_v58 = vpop.f32.mrf.mxu1 }
  0xec   : > { %v1930_v59 = vpop.f32.mrf.mxu0  ;;  %v2348_v60 = vpop.f32.mrf.mxu1 }
  0xee   : > { %v490_v61 = vpop.f32.mrf.mxu0  ;;  %v2350_v62 = vpop.f32.mrf.mxu1 }
  0xf0   : > { %v2352_v63 = vpop.f32.mrf.mxu0  ;;  %v2354_v0 = vpop.f32.mrf.mxu1 }
  0xf2   : > { %v2356_v1 = vpop.f32.mrf.mxu0  ;;  %v2358_v2 = vpop.f32.mrf.mxu1 }
  0xf4   : > { %v2360_v3 = vpop.f32.mrf.mxu0  ;;  %v2362_v4 = vpop.f32.mrf.mxu1 }
  0xf6   : > { %v2364_v5 = vpop.f32.mrf.mxu0  ;;  %v2366_v6 = vpop.f32.mrf.mxu1 }
  0xf8   : > { %v2368_v7 = vpop.f32.mrf.mxu0  ;;  %v2370_v8 = vpop.f32.mrf.mxu1 }
  0xfa   : > { %v2372_v9 = vpop.f32.mrf.mxu0  ;;  %v2374_v10 = vpop.f32.mrf.mxu1 }
  0xfc   : > { %v2376_v11 = vpop.f32.mrf.mxu0  ;;  %v2378_v12 = vpop.f32.mrf.mxu1 }
  0xfe   : > { %v2380_v13 = vpop.f32.mrf.mxu0  ;;  %v2382_v14 = vpop.f32.mrf.mxu1 }
 0x100   : > { %v2384_v15 = vpop.f32.mrf.mxu0  ;;  %v2386_v16 = vpop.f32.mrf.mxu1 }
 0x102   : > { %v2388_v17 = vpop.f32.mrf.mxu0  ;;  %v2390_v18 = vpop.f32.mrf.mxu1 }
 0x104   : > { %v1970_v19 = vpop.f32.mrf.mxu1  ;;  %v2014_v20 = vpop.f32.mrf.mxu0 }
 0x105   : > { %v688_v21 = vadd.f32 %v1970_v19, %v1926_v51 }
 0x106   : > { %v679_v22 = vpop.f32.mrf.mxu1  ;;  %v1049_v23 = vpop.f32.mrf.mxu0 }
 0x107   : > { %v1178_v24 = vadd.f32 %v2014_v20, %v688_v21  ;;  %v680_v25 = vadd.f32 %v679_v22, %v474_v53 }
 0x108   : > { %v1971_v26 = vpop.f32.mrf.mxu1  ;;  %v2015_v27 = vpop.f32.mrf.mxu0 }
 0x109   : > { %v1816_v28 = vpack.c.bf16 %v1178_v24, %v1178_v24  ;;  %v1176_v29 = vadd.f32 %v1049_v23, %v680_v25  ;;  %v691_v30 = vadd.f32 %v1971_v26, %v1927_v55  ;;  %v1282_v38 = vmul.f32 %v1178_v24, %v1178_v24 }
 0x10a   : > { %v682_v31 = vpop.f32.mrf.mxu1  ;;  %v1052_v32 = vpop.f32.mrf.mxu0 }
 0x10b   : > { %1513 = vst.msk [vmem:[%s2396_s10 + $0x8] sm:$0xf] %vm1510_vm1, %v1816_v28  ;;  %v1814_v33 = vpack.c.bf16 %v1176_v29, %v1176_v29  ;;  %v1179_v34 = vadd.f32 %v2015_v27, %v691_v30  ;;  %v683_v35 = vadd.f32 %v682_v31, %v477_v57  ;;  %v1280_v40 = vmul.f32 %v1176_v29, %v1176_v29 }
 0x10c   : > { %v1974_v36 = vpop.f32.mrf.mxu1  ;;  %v2018_v37 = vpop.f32.mrf.mxu0  ;;  %v1209_v45 = vsel %vm1208_vm2, %v1176_v29, 0.0  ;;  %v1212_v57 = vsel %vm1208_vm2, %v1178_v24, 0.0 }
 0x10d   : > { %1511 = vst.msk [vmem:[%s2396_s10] sm:$0xf] %vm1510_vm1, %v1814_v33  ;;  %v704_v39 = vadd.f32 %v1974_v36, %v1930_v59  ;;  %v1817_v41 = vpack.c.bf16 %v1179_v34, %v1179_v34  ;;  %v1177_v42 = vadd.f32 %v1052_v32, %v683_v35  ;;  %v1283_v48 = vmul.f32 %v1179_v34, %v1179_v34 }
 0x10e   : > { %v695_v43 = vpop.f32.mrf.mxu1  ;;  %v1065_v44 = vpop.f32.mrf.mxu0  ;;  %v1315_v59 = vsel %vm1208_vm2, %v1282_v38, 0.0  ;;  %v1312_v21 = vsel %vm1208_vm2, %v1280_v40, 0.0  ;;  %v1214_v27 = vsel %vm1208_vm2, %v1179_v34, 0.0 }
 0x10f   : > { %v1182_v46 = vadd.f32 %v2018_v37, %v704_v39  ;;  %v696_v47 = vadd.f32 %v695_v43, %v490_v61  ;;  %1514 = vst.msk [vmem:[%s2396_s10 + $0xc] sm:$0xf] %vm1510_vm1, %v1817_v41  ;;  %v1210_v49 = vsel %vm1208_vm2, %v1177_v42, 0.0  ;;  %v1281_v50 = vmul.f32 %v1177_v42, %v1177_v42 }
 0x110   : > { %v1815_v51 = vpack.c.bf16 %v1177_v42, %v1177_v42  ;;  %v1975_v53 = vpop.f32.mrf.mxu1  ;;  %v2019_v55 = vpop.f32.mrf.mxu0  ;;  %v1211_v19 = vadd.f32 %v1210_v49, %v1209_v45  ;;  %v1317_v30 = vsel %vm1208_vm2, %v1283_v48, 0.0 }
 0x111   : > { %v1820_v20 = vpack.c.bf16 %v1182_v46, %v1182_v46  ;;  %v1313_v61 = vsel %vm1208_vm2, %v1281_v50, 0.0  ;;  %v1180_v22 = vadd.f32 %v1065_v44, %v696_v47  ;;  %v707_v23 = vadd.f32 %v1975_v53, %v2352_v63 }
 0x112   : > { %1512 = vst.msk [vmem:[%s2396_s10 + $0x4] sm:$0xf] %vm1510_vm1, %v1815_v51  ;;  %v698_v25 = vpop.f32.mrf.mxu1  ;;  %v1068_v26 = vpop.f32.mrf.mxu0  ;;  %v1213_v28 = vadd.f32 %v1212_v57, %v1211_v19  ;;  %v1314_v29 = vadd.f32 %v1313_v61, %v1312_v21  ;;  %v1286_v39 = vmul.f32 %v1182_v46, %v1182_v46  ;;  %v1220_v21 = vsel %vm1208_vm2, %v1182_v46, 0.0 }
 0x113   : > { %1517 = vst.msk [vmem:[%s2396_s10 + $0x18] sm:$0xf] %vm1510_vm1, %v1820_v20  ;;  %v699_v24 = vadd.f32 %v698_v25, %v2356_v1  ;;  %v1284_v31 = vmul.f32 %v1180_v22, %v1180_v22  ;;  %v1818_v32 = vpack.c.bf16 %v1180_v22, %v1180_v22  ;;  %v1183_v33 = vadd.f32 %v2019_v55, %v707_v23 }
 0x114   : > { %v1978_v35 = vpop.f32.mrf.mxu1  ;;  %v2022_v36 = vpop.f32.mrf.mxu0  ;;  %v1316_v37 = vadd.f32 %v1315_v59, %v1314_v29  ;;  %v1215_v63 = vadd.f32 %v1214_v27, %v1213_v28  ;;  %v1216_v40 = vsel %vm1208_vm2, %v1180_v22, 0.0  ;;  %v1323_v61 = vsel %vm1208_vm2, %v1286_v39, 0.0 }
 0x115   : > { %v1181_v38 = vadd.f32 %v1068_v26, %v699_v24  ;;  %v720_v34 = vadd.f32 %v1978_v35, %v2360_v3  ;;  %v1319_v41 = vsel %vm1208_vm2, %v1284_v31, 0.0  ;;  %1515 = vst.msk [vmem:[%s2396_s10 + $0x10] sm:$0xf] %vm1510_vm1, %v1818_v32  ;;  %v1821_v1 = vpack.c.bf16 %v1183_v33, %v1183_v33 }
 0x116   : > { %v711_v42 = vpop.f32.mrf.mxu1  ;;  %v1081_v43 = vpop.f32.mrf.mxu0  ;;  %v1217_v44 = vadd.f32 %v1216_v40, %v1215_v63  ;;  %v1318_v45 = vadd.f32 %v1317_v30, %v1316_v37  ;;  %v1287_v49 = vmul.f32 %v1183_v33, %v1183_v33  ;;  %v1222_v24 = vsel %vm1208_vm2, %v1183_v33, 0.0 }
 0x117   : > { %v1218_v47 = vsel %vm1208_vm2, %v1181_v38, 0.0  ;;  %v1285_v48 = vmul.f32 %v1181_v38, %v1181_v38  ;;  %1518 = vst.msk [vmem:[%s2396_s10 + $0x1c] sm:$0xf] %vm1510_vm1, %v1821_v1  ;;  %v1819_v3 = vpack.c.bf16 %v1181_v38, %v1181_v38  ;;  %v1186_v50 = vadd.f32 %v2022_v36, %v720_v34 }
 0x118   : > { %v712_v51 = vadd.f32 %v711_v42, %v2364_v5  ;;  %v1979_v53 = vpop.f32.mrf.mxu1  ;;  %v2023_v55 = vpop.f32.mrf.mxu0  ;;  %v1320_v57 = vadd.f32 %v1319_v41, %v1318_v45  ;;  %v1219_v59 = vadd.f32 %v1218_v47, %v1217_v44 }
 0x119   : > { %v1321_v19 = vsel %vm1208_vm2, %v1285_v48, 0.0  ;;  %v723_v20 = vadd.f32 %v1979_v53, %v2368_v7  ;;  %1516 = vst.msk [vmem:[%s2396_s10 + $0x14] sm:$0xf] %vm1510_vm1, %v1819_v3  ;;  %v1824_v22 = vpack.c.bf16 %v1186_v50, %v1186_v50  ;;  %v1325_v7 = vsel %vm1208_vm2, %v1287_v49, 0.0 }
 0x11a   : > { %v1184_v23 = vadd.f32 %v1081_v43, %v712_v51  ;;  %v714_v25 = vpop.f32.mrf.mxu1  ;;  %v1084_v26 = vpop.f32.mrf.mxu0  ;;  %v1221_v5 = vadd.f32 %v1220_v21, %v1219_v59  ;;  %v1322_v27 = vadd.f32 %v1321_v19, %v1320_v57  ;;  %v1290_v36 = vmul.f32 %v1186_v50, %v1186_v50 }
 0x11b   : > { %v1187_v28 = vadd.f32 %v2023_v55, %v723_v20  ;;  %v715_v29 = vadd.f32 %v714_v25, %v2372_v9  ;;  %1521 = vst.msk [vmem:[%s2396_s10 + $0x28] sm:$0xf] %vm1510_vm1, %v1824_v22  ;;  %v1228_v57 = vsel %vm1208_vm2, %v1186_v50, 0.0 }
 0x11c   : > { %v1288_v46 = vmul.f32 %v1184_v23, %v1184_v23  ;;  %v1822_v30 = vpack.c.bf16 %v1184_v23, %v1184_v23  ;;  %v1982_v31 = vpop.f32.mrf.mxu1  ;;  %v2026_v32 = vpop.f32.mrf.mxu0  ;;  %v1324_v35 = vadd.f32 %v1323_v61, %v1322_v27  ;;  %v1223_v37 = vadd.f32 %v1222_v24, %v1221_v5 }
 0x11d   : > { %v1224_v63 = vsel %vm1208_vm2, %v1184_v23, 0.0  ;;  %v1291_v38 = vmul.f32 %v1187_v28, %v1187_v28  ;;  %v1825_v9 = vpack.c.bf16 %v1187_v28, %v1187_v28  ;;  %v1185_v34 = vadd.f32 %v1084_v26, %v715_v29 }
 0x11e   : > { %1519 = vst.msk [vmem:[%s2396_s10 + $0x20] sm:$0xf] %vm1510_vm1, %v1822_v30  ;;  %v736_v33 = vadd.f32 %v1982_v31, %v2376_v11  ;;  %v727_v39 = vpop.f32.mrf.mxu1  ;;  %v1097_v40 = vpop.f32.mrf.mxu0  ;;  %v1225_v41 = vadd.f32 %v1224_v63, %v1223_v37  ;;  %v1326_v1 = vadd.f32 %v1325_v7, %v1324_v35  ;;  %v1327_v42 = vsel %vm1208_vm2, %v1288_v46, 0.0 }
 0x11f   : > { %v728_v43 = vadd.f32 %v727_v39, %v2380_v13  ;;  %1522 = vst.msk [vmem:[%s2396_s10 + $0x2c] sm:$0xf] %vm1510_vm1, %v1825_v9  ;;  %v1226_v44 = vsel %vm1208_vm2, %v1185_v34, 0.0  ;;  %v1289_v45 = vmul.f32 %v1185_v34, %v1185_v34  ;;  %v1823_v47 = vpack.c.bf16 %v1185_v34, %v1185_v34 }
 0x120   : > { %v1190_v48 = vadd.f32 %v2026_v32, %v736_v33  ;;  %v1983_v49 = vpop.f32.mrf.mxu1  ;;  %v2027_v3 = vpop.f32.mrf.mxu0  ;;  %v1328_v51 = vadd.f32 %v1327_v42, %v1326_v1  ;;  %v1227_v11 = vadd.f32 %v1226_v44, %v1225_v41  ;;  %v1331_v59 = vsel %vm1208_vm2, %v1290_v36, 0.0 }
 0x121   : > { %v1188_v53 = vadd.f32 %v1097_v40, %v728_v43  ;;  %v739_v55 = vadd.f32 %v1983_v49, %v2384_v15  ;;  %v1329_v13 = vsel %vm1208_vm2, %v1289_v45, 0.0  ;;  %1520 = vst.msk [vmem:[%s2396_s10 + $0x24] sm:$0xf] %vm1510_vm1, %v1823_v47  ;;  %v1230_v61 = vsel %vm1208_vm2, %v1187_v28, 0.0 }
 0x122   : > { %v1828_v19 = vpack.c.bf16 %v1190_v48, %v1190_v48  ;;  %v730_v20 = vpop.f32.mrf.mxu1  ;;  %v1100_v21 = vpop.f32.mrf.mxu0  ;;  %v1229_v22 = vadd.f32 %v1228_v57, %v1227_v11  ;;  %v1330_v23 = vadd.f32 %v1329_v13, %v1328_v51  ;;  %v1333_v26 = vsel %vm1208_vm2, %v1291_v38, 0.0 }
 0x123   : > { %v1292_v25 = vmul.f32 %v1188_v53, %v1188_v53  ;;  %v1826_v15 = vpack.c.bf16 %v1188_v53, %v1188_v53  ;;  %v1191_v50 = vadd.f32 %v2027_v3, %v739_v55  ;;  %v731_v5 = vadd.f32 %v730_v20, %v2388_v17 }
 0x124   : > { %1525 = vst.msk [vmem:[%s2396_s10 + $0x38] sm:$0xf] %vm1510_vm1, %v1828_v19  ;;  %v1986_v27 = vpop.f32.mrf.mxu1  ;;  %v2030_v29 = vpop.f32.mrf.mxu0  ;;  %v1332_v24 = vadd.f32 %v1331_v59, %v1330_v23  ;;  %v1294_v7 = vmul.f32 %v1190_v48, %v1190_v48  ;;  %v1231_v46 = vadd.f32 %v1230_v61, %v1229_v22  ;;  %v1232_v30 = vsel %vm1208_vm2, %v1188_v53, 0.0 }
 0x125   : > { %v752_v28 = vadd.f32 %v1986_v27, %v2340_v52  ;;  %v1335_v31 = vsel %vm1208_vm2, %v1292_v25, 0.0  ;;  %1523 = vst.msk [vmem:[%s2396_s10 + $0x30] sm:$0xf] %vm1510_vm1, %v1826_v15  ;;  %v1829_v32 = vpack.c.bf16 %v1191_v50, %v1191_v50  ;;  %v1189_v35 = vadd.f32 %v1100_v21, %v731_v5 }
 0x126   : > { %v743_v36 = vpop.f32.mrf.mxu1  ;;  %v1113_v37 = vpop.f32.mrf.mxu0  ;;  %v1233_v63 = vadd.f32 %v1232_v30, %v1231_v46  ;;  %v1334_v17 = vadd.f32 %v1333_v26, %v1332_v24  ;;  %v1295_v34 = vmul.f32 %v1191_v50, %v1191_v50  ;;  %v1236_v1 = vsel %vm1208_vm2, %v1190_v48, 0.0 }
 0x127   : > { %v1194_v38 = vadd.f32 %v2030_v29, %v752_v28  ;;  %v744_v9 = vadd.f32 %v743_v36, %v2342_v54  ;;  %1526 = vst.msk [vmem:[%s2396_s10 + $0x3c] sm:$0xf] %vm1510_vm1, %v1829_v32  ;;  %v1234_v52 = vsel %vm1208_vm2, %v1189_v35, 0.0  ;;  %v1293_v33 = vmul.f32 %v1189_v35, %v1189_v35 }
 0x128   : > { %v1827_v39 = vpack.c.bf16 %v1189_v35, %v1189_v35  ;;  %v1987_v40 = vpop.f32.mrf.mxu1  ;;  %v2031_v41 = vpop.f32.mrf.mxu0  ;;  %v1339_v42 = vsel %vm1208_vm2, %v1294_v7, 0.0  ;;  %v1336_v43 = vadd.f32 %v1335_v31, %v1334_v17  ;;  %v1235_v44 = vadd.f32 %v1234_v52, %v1233_v63 }
 0x129   : > { %v1337_v45 = vsel %vm1208_vm2, %v1293_v33, 0.0  ;;  %v1832_v54 = vpack.c.bf16 %v1194_v38, %v1194_v38  ;;  %v1192_v47 = vadd.f32 %v1113_v37, %v744_v9  ;;  %v755_v49 = vadd.f32 %v1987_v40, %v2344_v56 }
 0x12a   : > { %1524 = vst.msk [vmem:[%s2396_s10 + $0x34] sm:$0xf] %vm1510_vm1, %v1827_v39  ;;  %v746_v3 = vpop.f32.mrf.mxu1  ;;  %v1116_v51 = vpop.f32.mrf.mxu0  ;;  %v1238_v11 = vsel %vm1208_vm2, %v1191_v50, 0.0  ;;  %v1237_v53 = vadd.f32 %v1236_v1, %v1235_v44  ;;  %v1338_v55 = vadd.f32 %v1337_v45, %v1336_v43  ;;  %v1341_v57 = vsel %vm1208_vm2, %v1295_v34, 0.0 }
 0x12b   : > { %v747_v48 = vadd.f32 %v746_v3, %v2346_v58  ;;  %1529 = vst.msk [vmem:[%s2396_s10 + $0x48] sm:$0xf] %vm1510_vm1, %v1832_v54  ;;  %v1296_v59 = vmul.f32 %v1192_v47, %v1192_v47  ;;  %v1830_v13 = vpack.c.bf16 %v1192_v47, %v1192_v47  ;;  %v1195_v19 = vadd.f32 %v2031_v41, %v755_v49 }
 0x12c   : > { %v1990_v20 = vpop.f32.mrf.mxu1  ;;  %v2034_v21 = vpop.f32.mrf.mxu0  ;;  %v1340_v61 = vadd.f32 %v1339_v42, %v1338_v55  ;;  %v1239_v56 = vadd.f32 %v1238_v11, %v1237_v53  ;;  %v1298_v25 = vmul.f32 %v1194_v38, %v1194_v38  ;;  %v1240_v26 = vsel %vm1208_vm2, %v1192_v47, 0.0 }
 0x12d   : > { %v1193_v22 = vadd.f32 %v1116_v51, %v747_v48  ;;  %v768_v23 = vadd.f32 %v1990_v20, %v2348_v60  ;;  %v1343_v58 = vsel %vm1208_vm2, %v1296_v59, 0.0  ;;  %1527 = vst.msk [vmem:[%s2396_s10 + $0x40] sm:$0xf] %vm1510_vm1, %v1830_v13  ;;  %v1833_v15 = vpack.c.bf16 %v1195_v19, %v1195_v19 }
 0x12e   : > { %v759_v50 = vpop.f32.mrf.mxu1  ;;  %v1129_v5 = vpop.f32.mrf.mxu0  ;;  %v1241_v27 = vadd.f32 %v1240_v26, %v1239_v56  ;;  %v1342_v29 = vadd.f32 %v1341_v57, %v1340_v61  ;;  %v1299_v46 = vmul.f32 %v1195_v19, %v1195_v19  ;;  %v1244_v17 = vsel %vm1208_vm2, %v1194_v38, 0.0 }
 0x12f   : > { %v1242_v24 = vsel %vm1208_vm2, %v1193_v22, 0.0  ;;  %v1297_v7 = vmul.f32 %v1193_v22, %v1193_v22  ;;  %1530 = vst.msk [vmem:[%s2396_s10 + $0x4c] sm:$0xf] %vm1510_vm1, %v1833_v15  ;;  %v1831_v60 = vpack.c.bf16 %v1193_v22, %v1193_v22  ;;  %v1198_v28 = vadd.f32 %v2034_v21, %v768_v23 }
 0x130   : > { %v760_v30 = vadd.f32 %v759_v50, %v2350_v62  ;;  %v1991_v31 = vpop.f32.mrf.mxu1  ;;  %v2035_v32 = vpop.f32.mrf.mxu0  ;;  %v1344_v35 = vadd.f32 %v1343_v58, %v1342_v29  ;;  %v1243_v36 = vadd.f32 %v1242_v24, %v1241_v27  ;;  %v1347_v9 = vsel %vm1208_vm2, %v1298_v25, 0.0 }
 0x131   : > { %v1345_v37 = vsel %vm1208_vm2, %v1297_v7, 0.0  ;;  %v771_v63 = vadd.f32 %v1991_v31, %v2354_v0  ;;  %1528 = vst.msk [vmem:[%s2396_s10 + $0x44] sm:$0xf] %vm1510_vm1, %v1831_v60  ;;  %v1836_v34 = vpack.c.bf16 %v1198_v28, %v1198_v28  ;;  %v1246_v42 = vsel %vm1208_vm2, %v1195_v19, 0.0 }
 0x132   : > { %v1196_v52 = vadd.f32 %v1129_v5, %v760_v30  ;;  %v762_v33 = vpop.f32.mrf.mxu1  ;;  %v1132_v39 = vpop.f32.mrf.mxu0  ;;  %v1245_v62 = vadd.f32 %v1244_v17, %v1243_v36  ;;  %v1346_v40 = vadd.f32 %v1345_v37, %v1344_v35  ;;  %v1349_v0 = vsel %vm1208_vm2, %v1299_v46, 0.0 }
 0x133   : > { %v1199_v41 = vadd.f32 %v2035_v32, %v771_v63  ;;  %v763_v1 = vadd.f32 %v762_v33, %v2358_v2  ;;  %1533 = vst.msk [vmem:[%s2396_s10 + $0x58] sm:$0xf] %vm1510_vm1, %v1836_v34  ;;  %v1302_v47 = vmul.f32 %v1198_v28, %v1198_v28  ;;  %v1252_v15 = vsel %vm1208_vm2, %v1198_v28, 0.0 }
 0x134   : > { %v1300_v38 = vmul.f32 %v1196_v52, %v1196_v52  ;;  %v1834_v43 = vpack.c.bf16 %v1196_v52, %v1196_v52  ;;  %v1994_v44 = vpop.f32.mrf.mxu1  ;;  %v2038_v45 = vpop.f32.mrf.mxu0  ;;  %v1348_v54 = vadd.f32 %v1347_v9, %v1346_v40  ;;  %v1247_v49 = vadd.f32 %v1246_v42, %v1245_v62 }
 0x135   : > { %v1248_v3 = vsel %vm1208_vm2, %v1196_v52, 0.0  ;;  %v1303_v51 = vmul.f32 %v1199_v41, %v1199_v41  ;;  %v1837_v2 = vpack.c.bf16 %v1199_v41, %v1199_v41  ;;  %v1197_v11 = vadd.f32 %v1132_v39, %v763_v1 }
 0x136   : > { %1531 = vst.msk [vmem:[%s2396_s10 + $0x50] sm:$0xf] %vm1510_vm1, %v1834_v43  ;;  %v784_v53 = vadd.f32 %v1994_v44, %v2362_v4  ;;  %v775_v55 = vpop.f32.mrf.mxu1  ;;  %v1145_v48 = vpop.f32.mrf.mxu0  ;;  %v1249_v57 = vadd.f32 %v1248_v3, %v1247_v49  ;;  %v1350_v59 = vadd.f32 %v1349_v0, %v1348_v54  ;;  %v1351_v13 = vsel %vm1208_vm2, %v1300_v38, 0.0 }
 0x137   : > { %v776_v19 = vadd.f32 %v775_v55, %v2366_v6  ;;  %1534 = vst.msk [vmem:[%s2396_s10 + $0x5c] sm:$0xf] %vm1510_vm1, %v1837_v2  ;;  %v1250_v20 = vsel %vm1208_vm2, %v1197_v11, 0.0  ;;  %v1301_v21 = vmul.f32 %v1197_v11, %v1197_v11  ;;  %v1835_v61 = vpack.c.bf16 %v1197_v11, %v1197_v11 }
 0x138   : > { %v1202_v56 = vadd.f32 %v2038_v45, %v784_v53  ;;  %v1995_v22 = vpop.f32.mrf.mxu1  ;;  %v2039_v23 = vpop.f32.mrf.mxu0  ;;  %v1352_v4 = vadd.f32 %v1351_v13, %v1350_v59  ;;  %v1251_v25 = vadd.f32 %v1250_v20, %v1249_v57  ;;  %v1355_v29 = vsel %vm1208_vm2, %v1302_v47, 0.0 }
 0x139   : > { %v1200_v26 = vadd.f32 %v1145_v48, %v776_v19  ;;  %v787_v58 = vadd.f32 %v1995_v22, %v2370_v8  ;;  %v1353_v50 = vsel %vm1208_vm2, %v1301_v21, 0.0  ;;  %1532 = vst.msk [vmem:[%s2396_s10 + $0x54] sm:$0xf] %vm1510_vm1, %v1835_v61  ;;  %v1254_v24 = vsel %vm1208_vm2, %v1199_v41, 0.0 }
 0x13a   : > { %v1840_v6 = vpack.c.bf16 %v1202_v56, %v1202_v56  ;;  %v778_v5 = vpop.f32.mrf.mxu1  ;;  %v1148_v27 = vpop.f32.mrf.mxu0  ;;  %v1253_v7 = vadd.f32 %v1252_v15, %v1251_v25  ;;  %v1354_v46 = vadd.f32 %v1353_v50, %v1352_v4  ;;  %v1357_v35 = vsel %vm1208_vm2, %v1303_v51, 0.0 }
 0x13b   : > { %v1304_v60 = vmul.f32 %v1200_v26, %v1200_v26  ;;  %v1838_v8 = vpack.c.bf16 %v1200_v26, %v1200_v26  ;;  %v1203_v30 = vadd.f32 %v2039_v23, %v787_v58  ;;  %v779_v28 = vadd.f32 %v778_v5, %v2374_v10 }
 0x13c   : > { %1537 = vst.msk [vmem:[%s2396_s10 + $0x68] sm:$0xf] %vm1510_vm1, %v1840_v6  ;;  %v1998_v31 = vpop.f32.mrf.mxu1  ;;  %v2042_v32 = vpop.f32.mrf.mxu0  ;;  %v1356_v36 = vadd.f32 %v1355_v29, %v1354_v46  ;;  %v1255_v37 = vadd.f32 %v1254_v24, %v1253_v7  ;;  %v1306_v17 = vmul.f32 %v1202_v56, %v1202_v56  ;;  %v1256_v9 = vsel %vm1208_vm2, %v1200_v26, 0.0 }
 0x13d   : > { %v800_v63 = vadd.f32 %v1998_v31, %v2378_v12  ;;  %1535 = vst.msk [vmem:[%s2396_s10 + $0x60] sm:$0xf] %vm1510_vm1, %v1838_v8  ;;  %v1841_v34 = vpack.c.bf16 %v1203_v30, %v1203_v30  ;;  %v1201_v52 = vadd.f32 %v1148_v27, %v779_v28  ;;  %v1359_v1 = vsel %vm1208_vm2, %v1304_v60, 0.0 }
 0x13e   : > { %v791_v33 = vpop.f32.mrf.mxu1  ;;  %v1161_v39 = vpop.f32.mrf.mxu0  ;;  %v1257_v62 = vadd.f32 %v1256_v9, %v1255_v37  ;;  %v1358_v10 = vadd.f32 %v1357_v35, %v1356_v36  ;;  %v1260_v44 = vsel %vm1208_vm2, %v1202_v56, 0.0  ;;  %v1307_v54 = vmul.f32 %v1203_v30, %v1203_v30 }
 0x13f   : > { %v1206_v40 = vadd.f32 %v2042_v32, %v800_v63  ;;  %v792_v41 = vadd.f32 %v791_v33, %v2382_v14  ;;  %1538 = vst.msk [vmem:[%s2396_s10 + $0x6c] sm:$0xf] %vm1510_vm1, %v1841_v34  ;;  %v1258_v12 = vsel %vm1208_vm2, %v1201_v52, 0.0  ;;  %v1305_v42 = vmul.f32 %v1201_v52, %v1201_v52 }
 0x140   : > { %v1839_v0 = vpack.c.bf16 %v1201_v52, %v1201_v52  ;;  %v1999_v38 = vpop.f32.mrf.mxu1  ;;  %v2043_v43 = vpop.f32.mrf.mxu0  ;;  %v1360_v45 = vadd.f32 %v1359_v1, %v1358_v10  ;;  %v1259_v47 = vadd.f32 %v1258_v12, %v1257_v62  ;;  %v1363_v11 = vsel %vm1208_vm2, %v1306_v17, 0.0 }
 0x141   : > { %v1361_v49 = vsel %vm1208_vm2, %v1305_v42, 0.0  ;;  %v1844_v14 = vpack.c.bf16 %v1206_v40, %v1206_v40  ;;  %v1204_v3 = vadd.f32 %v1161_v39, %v792_v41  ;;  %v803_v51 = vadd.f32 %v1999_v38, %v2386_v16 }
 0x142   : > { %1536 = vst.msk [vmem:[%s2396_s10 + $0x64] sm:$0xf] %vm1510_vm1, %v1839_v0  ;;  %v794_v2 = vpop.f32.mrf.mxu1  ;;  %v1261_v53 = vadd.f32 %v1260_v44, %v1259_v47  ;;  %v1362_v55 = vadd.f32 %v1361_v49, %v1360_v45  ;;  %v1262_v57 = vsel %vm1208_vm2, %v1203_v30, 0.0  ;;  %v1164_v20 = vpop.f32.mrf.mxu0  ;;  %v1365_v56 = vsel %vm1208_vm2, %v1307_v54, 0.0 }
 0x143   : > { %v795_v48 = vadd.f32 %v794_v2, %v2390_v18  ;;  %1541 = vst.msk [vmem:[%s2396_s10 + $0x78] sm:$0xf] %vm1510_vm1, %v1844_v14  ;;  %v1308_v59 = vmul.f32 %v1204_v3, %v1204_v3  ;;  %v1842_v13 = vpack.c.bf16 %v1204_v3, %v1204_v3  ;;  %v1207_v19 = vadd.f32 %v2043_v43, %v803_v51 }
 0x144   : > { %v1364_v21 = vadd.f32 %v1363_v11, %v1362_v55  ;;  %v1263_v61 = vadd.f32 %v1262_v57, %v1261_v53  ;;  %v1264_v22 = vsel %vm1208_vm2, %v1204_v3, 0.0  ;;  %v1310_v58 = vmul.f32 %v1206_v40, %v1206_v40 }
 0x145   : > { %v1205_v16 = vadd.f32 %v1164_v20, %v795_v48  ;;  %1539 = vst.msk [vmem:[%s2396_s10 + $0x70] sm:$0xf] %vm1510_vm1, %v1842_v13  ;;  %v1845_v18 = vpack.c.bf16 %v1207_v19, %v1207_v19  ;;  %v1367_v15 = vsel %vm1208_vm2, %v1308_v59, 0.0  ;;  %v1268_v29 = vsel %vm1208_vm2, %v1206_v40, 0.0 }
 0x146   : > { %v1265_v23 = vadd.f32 %v1264_v22, %v1263_v61  ;;  %v1366_v4 = vadd.f32 %v1365_v56, %v1364_v21  ;;  %v1311_v24 = vmul.f32 %v1207_v19, %v1207_v19  ;;  %v1371_v60 = vsel %vm1208_vm2, %v1310_v58, 0.0 }
 0x147   : > { %v1266_v25 = vsel %vm1208_vm2, %v1205_v16, 0.0  ;;  %v1309_v26 = vmul.f32 %v1205_v16, %v1205_v16  ;;  %1542 = vst.msk [vmem:[%s2396_s10 + $0x7c] sm:$0xf] %vm1510_vm1, %v1845_v18  ;;  %v1843_v50 = vpack.c.bf16 %v1205_v16, %v1205_v16  ;;  %v1270_v8 = vsel %vm1208_vm2, %v1207_v19, 0.0 }
 0x148   : > { %v1368_v6 = vadd.f32 %v1367_v15, %v1366_v4  ;;  %v1267_v5 = vadd.f32 %v1266_v25, %v1265_v23  ;;  %v1373_v31 = vsel %vm1208_vm2, %v1311_v24, 0.0 }
 0x149   : > { %v1369_v27 = vsel %vm1208_vm2, %v1309_v26, 0.0  ;;  %1540 = vst.msk [vmem:[%s2396_s10 + $0x74] sm:$0xf] %vm1510_vm1, %v1843_v50 }
 0x14a   : > { %v1269_v7 = vadd.f32 %v1268_v29, %v1267_v5  ;;  %v1370_v46 = vadd.f32 %v1369_v27, %v1368_v6 }
 0x14c   : > { %v1271_v30 = vadd.f32 %v1270_v8, %v1269_v7  ;;  %v1372_v28 = vadd.f32 %v1371_v60, %v1370_v46 }
 0x14e   : > { %v1272_v32 = vrot.slane %v1271_v30, 4  ;;  %v1374_v35 = vadd.f32 %v1373_v31, %v1372_v28 }
 0x150   : > { %v1273_v36 = vadd.f32 %v1272_v32, %v1271_v30  ;;  %v1375_v37 = vrot.slane %v1374_v35, 4 }
 0x152   : > { %v1274_v63 = vrot.slane %v1273_v36, 2  ;;  %v1376_v17 = vadd.f32 %v1375_v37, %v1374_v35 }
 0x154   : > { %v1275_v9 = vadd.f32 %v1274_v63, %v1273_v36  ;;  %v1377_v34 = vrot.slane %v1376_v17, 2 }
 0x156   : > { %v1276_v52 = vrot.slane %v1275_v9, 1  ;;  %v1378_v33 = vadd.f32 %v1377_v34, %v1376_v17 }
 0x158   : > { %v1277_v39 = vadd.f32 %v1276_v52, %v1275_v9  ;;  %v1379_v62 = vrot.slane %v1378_v33, 1 }
 0x15a   : > { %1279 = vst.msk [vmem:[%s211_s13] sm:$0x1] %vm1278_vm3, %v1277_v39  ;;  %v1380_v10 = vadd.f32 %v1379_v62, %v1378_v33 }
 0x15c   : > { %1381 = vst.msk [vmem:[%s214_s18] sm:$0x1] %vm1278_vm3, %v1380_v10 }
 0x15d PF: > { %s15_s15 = sadd.s32 1, %s2122_s15  }
 0x15e   : > { %p12_p4 = scmp.ge.s32.totalorder %s15_s15, 4  }
 0x160   :  { %14 = sbr.rel (!%p12_p4) target bundleno = 1 (0x1), region = 84 }

// kernel: run.12
= control target key start
LH: loop header
LB: loop body
LE: loop exit
PB: predicated region body
PF: predicated region fallthrough
CT: control target
= control target key end

     0   :  { %v43_v0 = vlaneseq  ;;  %s384_s0 = inlined_call_operand.vmem [shape: bf16[32,512], index: 0, kind: input, shape index: {}]   ;;  %s385_s1 = inlined_call_operand.vmem [shape: f32[1,512], index: 1, kind: input, shape index: {}]   ;;  %s386_s2 = inlined_call_operand.vmem [shape: f32[1,512], index: 2, kind: input, shape index: {}]   ;;  %s387_s3 = inlined_call_operand.vmem [shape: f32[32,512], index: 3, kind: input, shape index: {}]   ;;  %s388_s4 = inlined_call_operand.vmem [shape: f32[32,512], index: 4, kind: output, shape index: {}]  }
   0x1   :  { %v17_v1 = vld [vmem:[%s384_s0] sm:$0xff]  ;;  %v18_v3 = vld [vmem:[%s384_s0 + $0x8] sm:$0xff]  ;;  %v19_v8 = vld [vmem:[%s384_s0 + $0x10] sm:$0xff] }
   0x2   :  { %v44_v2 = vshrl.u32 %v43_v0, 7  ;;  %v25_v4 = vunpack.c.l.bf16 %v17_v1  ;;  %v41_v5 = vld [vmem:[%s385_s1] sm:$0xf]  ;;  %v26_v7 = vunpack.c.h.bf16 %v17_v1  ;;  %v27_v13 = vunpack.c.l.bf16 %v18_v3  ;;  %v20_v21 = vld [vmem:[%s384_s0 + $0x18] sm:$0xff]  ;;  %v118_v31 = vld [vmem:[%s387_s3 + $0x8] sm:$0xff] }
   0x3   :  { %v79_v6 = vld [vmem:[%s386_s2] sm:$0xf]  ;;  %v28_v14 = vunpack.c.h.bf16 %v18_v3  ;;  %v29_v15 = vunpack.c.l.bf16 %v19_v8  ;;  %v30_v16 = vunpack.c.h.bf16 %v19_v8  ;;  %v122_v35 = vld [vmem:[%s387_s3 + $0x28] sm:$0xff]  ;;  %v31_v36 = vunpack.c.l.bf16 %v20_v21  ;;  %v119_v40 = vld [vmem:[%s387_s3 + $0x10] sm:$0xff] }
   0x4   :  { %v45_v9 = vsub.s32 0, %v44_v2  ;;  %v49_v10 = vsub.s32 1, %v44_v2  ;;  %v53_v11 = vsub.s32 2, %v44_v2  ;;  %v57_v12 = vsub.s32 3, %v44_v2  ;;  %v117_v27 = vld [vmem:[%s387_s3] sm:$0xff]  ;;  %v120_v41 = vld [vmem:[%s387_s3 + $0x18] sm:$0xff] }
   0x5   :  { %v121_v34 = vld [vmem:[%s387_s3 + $0x20] sm:$0xff]  ;;  %v32_v37 = vunpack.c.h.bf16 %v20_v21  ;;  %v123_v52 = vld [vmem:[%s387_s3 + $0x30] sm:$0xff]  ;;  %v124_v53 = vld [vmem:[%s387_s3 + $0x38] sm:$0xff] }
   0x6   :  { %v225_v17 = vrot.slane %v41_v5, %v45_v9  ;;  %v227_v18 = vrot.slane %v79_v6, %v45_v9  ;;  %v229_v19 = vrot.slane %v41_v5, %v49_v10  ;;  %v231_v20 = vrot.slane %v79_v6, %v49_v10  ;;  %v21_v58 = vld [vmem:[%s384_s0 + $0x20] sm:$0xff]  ;;  %v22_v59 = vld [vmem:[%s384_s0 + $0x28] sm:$0xff]  ;;  %v23_v0 = vld [vmem:[%s384_s0 + $0x30] sm:$0xff] }
   0x7   :  { %v236_v22 = vrot.slane %v41_v5, %v53_v11  ;;  %v238_v23 = vrot.slane %v79_v6, %v53_v11  ;;  %v240_v24 = vrot.slane %v41_v5, %v57_v12  ;;  %v242_v25 = vrot.slane %v79_v6, %v57_v12  ;;  %v24_v9 = vld [vmem:[%s384_s0 + $0x38] sm:$0xff] }
   0x8   :  { %v63_v26 = vmul.f32 %v225_v17, %v25_v4  ;;  %v64_v28 = vmul.f32 %v229_v19, %v26_v7  ;;  %v67_v29 = vmul.f32 %v225_v17, %v29_v15  ;;  %v68_v30 = vmul.f32 %v229_v19, %v30_v16  ;;  %v125_v15 = vld [vmem:[%s387_s3 + $0x40] sm:$0xff] }
   0x9   :  { %v65_v32 = vmul.f32 %v236_v22, %v27_v13  ;;  %v66_v33 = vmul.f32 %v240_v24, %v28_v14  ;;  %v69_v46 = vmul.f32 %v236_v22, %v31_v36  ;;  %v70_v47 = vmul.f32 %v240_v24, %v32_v37 }
   0xa   :  { %v101_v38 = vadd.f32 %v227_v18, %v63_v26  ;;  %v102_v39 = vadd.f32 %v231_v20, %v64_v28  ;;  %v105_v42 = vadd.f32 %v227_v18, %v67_v29  ;;  %v106_v43 = vadd.f32 %v231_v20, %v68_v30  ;;  %v127_v28 = vld [vmem:[%s387_s3 + $0x50] sm:$0xff]  ;;  %v128_v29 = vld [vmem:[%s387_s3 + $0x58] sm:$0xff] }
   0xb   :  { %v103_v44 = vadd.f32 %v238_v23, %v65_v32  ;;  %v104_v45 = vadd.f32 %v242_v25, %v66_v33  ;;  %v107_v56 = vadd.f32 %v238_v23, %v69_v46  ;;  %v108_v57 = vadd.f32 %v242_v25, %v70_v47  ;;  %v131_v46 = vld [vmem:[%s387_s3 + $0x70] sm:$0xff]  ;;  %v132_v47 = vld [vmem:[%s387_s3 + $0x78] sm:$0xff] }
   0xc   :  { %v133_v48 = vadd.f32 %v117_v27, %v101_v38  ;;  %v134_v49 = vadd.f32 %v118_v31, %v102_v39  ;;  %v137_v50 = vadd.f32 %v121_v34, %v105_v42  ;;  %v138_v51 = vadd.f32 %v122_v35, %v106_v43  ;;  %v126_v27 = vld [vmem:[%s387_s3 + $0x48] sm:$0xff]  ;;  %v129_v38 = vld [vmem:[%s387_s3 + $0x60] sm:$0xff] }
   0xd   :  { %v135_v54 = vadd.f32 %v119_v40, %v103_v44  ;;  %v136_v55 = vadd.f32 %v120_v41, %v104_v45  ;;  %v139_v3 = vadd.f32 %v123_v52, %v107_v56  ;;  %v140_v4 = vadd.f32 %v124_v53, %v108_v57 }
   0xe   :  { %v149_v60 = vmax.f32 %v133_v48, 0.0  ;;  %v150_v61 = vmax.f32 %v134_v49, 0.0  ;;  %v153_v62 = vmax.f32 %v137_v50, 0.0  ;;  %v154_v63 = vmax.f32 %v138_v51, 0.0 }
   0xf   :  { %v151_v1 = vmax.f32 %v135_v54, 0.0  ;;  %v152_v2 = vmax.f32 %v136_v55, 0.0  ;;  %v33_v5 = vunpack.c.l.bf16 %v21_v58  ;;  %v34_v6 = vunpack.c.h.bf16 %v21_v58 }
  0x10   :  { %165 = vst [vmem:[%s388_s4] sm:$0xff] %v149_v60  ;;  %166 = vst [vmem:[%s388_s4 + $0x8] sm:$0xff] %v150_v61  ;;  %v35_v7 = vunpack.c.l.bf16 %v22_v59  ;;  %v36_v8 = vunpack.c.h.bf16 %v22_v59  ;;  %v155_v10 = vmax.f32 %v139_v3, 0.0  ;;  %v156_v11 = vmax.f32 %v140_v4, 0.0 }
  0x11   :  { %169 = vst [vmem:[%s388_s4 + $0x20] sm:$0xff] %v153_v62  ;;  %170 = vst [vmem:[%s388_s4 + $0x28] sm:$0xff] %v154_v63  ;;  %v37_v12 = vunpack.c.l.bf16 %v23_v0  ;;  %v38_v13 = vunpack.c.h.bf16 %v23_v0  ;;  %v71_v14 = vmul.f32 %v225_v17, %v33_v5  ;;  %v72_v16 = vmul.f32 %v229_v19, %v34_v6 }
  0x12   :  { %167 = vst [vmem:[%s388_s4 + $0x10] sm:$0xff] %v151_v1  ;;  %168 = vst [vmem:[%s388_s4 + $0x18] sm:$0xff] %v152_v2  ;;  %v73_v21 = vmul.f32 %v236_v22, %v35_v7  ;;  %v74_v26 = vmul.f32 %v240_v24, %v36_v8  ;;  %v39_v32 = vunpack.c.l.bf16 %v24_v9  ;;  %v40_v33 = vunpack.c.h.bf16 %v24_v9 }
  0x13   :  { %171 = vst [vmem:[%s388_s4 + $0x30] sm:$0xff] %v155_v10  ;;  %172 = vst [vmem:[%s388_s4 + $0x38] sm:$0xff] %v156_v11  ;;  %v75_v30 = vmul.f32 %v225_v17, %v37_v12  ;;  %v76_v31 = vmul.f32 %v229_v19, %v38_v13  ;;  %v109_v34 = vadd.f32 %v227_v18, %v71_v14  ;;  %v130_v17 = vld [vmem:[%s387_s3 + $0x68] sm:$0xff] }
  0x14   :  { %v110_v35 = vadd.f32 %v231_v20, %v72_v16  ;;  %v111_v36 = vadd.f32 %v238_v23, %v73_v21  ;;  %v112_v37 = vadd.f32 %v242_v25, %v74_v26  ;;  %v77_v40 = vmul.f32 %v236_v22, %v39_v32 }
  0x15   :  { %v113_v19 = vadd.f32 %v227_v18, %v75_v30  ;;  %v114_v39 = vadd.f32 %v231_v20, %v76_v31  ;;  %v78_v41 = vmul.f32 %v240_v24, %v40_v33  ;;  %v141_v42 = vadd.f32 %v125_v15, %v109_v34 }
  0x16   :  { %v142_v43 = vadd.f32 %v126_v27, %v110_v35  ;;  %v143_v44 = vadd.f32 %v127_v28, %v111_v36  ;;  %v144_v45 = vadd.f32 %v128_v29, %v112_v37  ;;  %v115_v20 = vadd.f32 %v238_v23, %v77_v40 }
  0x17   :  { %v145_v48 = vadd.f32 %v129_v38, %v113_v19  ;;  %v146_v18 = vadd.f32 %v130_v17, %v114_v39  ;;  %v116_v22 = vadd.f32 %v242_v25, %v78_v41  ;;  %v157_v49 = vmax.f32 %v141_v42, 0.0 }
  0x18   :  { %v158_v24 = vmax.f32 %v142_v43, 0.0  ;;  %v159_v50 = vmax.f32 %v143_v44, 0.0  ;;  %v160_v51 = vmax.f32 %v144_v45, 0.0  ;;  %v147_v54 = vadd.f32 %v131_v46, %v115_v20 }
  0x19   :  { %v161_v52 = vmax.f32 %v145_v48, 0.0  ;;  %v162_v53 = vmax.f32 %v146_v18, 0.0  ;;  %v148_v55 = vadd.f32 %v132_v47, %v116_v22  ;;  %173 = vst [vmem:[%s388_s4 + $0x40] sm:$0xff] %v157_v49 }
  0x1a   :  { %174 = vst [vmem:[%s388_s4 + $0x48] sm:$0xff] %v158_v24  ;;  %175 = vst [vmem:[%s388_s4 + $0x50] sm:$0xff] %v159_v50  ;;  %v163_v23 = vmax.f32 %v147_v54, 0.0 }
  0x1b   :  { %176 = vst [vmem:[%s388_s4 + $0x58] sm:$0xff] %v160_v51  ;;  %177 = vst [vmem:[%s388_s4 + $0x60] sm:$0xff] %v161_v52  ;;  %v164_v25 = vmax.f32 %v148_v55, 0.0 }
  0x1c   :  { %178 = vst [vmem:[%s388_s4 + $0x68] sm:$0xff] %v162_v53  ;;  %179 = vst [vmem:[%s388_s4 + $0x70] sm:$0xff] %v163_v23 }
  0x1d   :  { %180 = vst [vmem:[%s388_s4 + $0x78] sm:$0xff] %v164_v25 }

// kernel: run.14
= control target key start
LH: loop header
LB: loop body
LE: loop exit
PB: predicated region body
PF: predicated region fallthrough
CT: control target
= control target key end

     0   :  { %v28_v0 = vlaneseq  ;;  %s168_s0 = inlined_call_operand.vmem [shape: bf16[16,512], index: 0, kind: input, shape index: {}]   ;;  %s169_s1 = inlined_call_operand.vmem [shape: f32[1,512], index: 1, kind: input, shape index: {}]   ;;  %s170_s2 = inlined_call_operand.vmem [shape: f32[1,512], index: 2, kind: input, shape index: {}]   ;;  %s171_s3 = inlined_call_operand.vmem [shape: f32[16,512], index: 3, kind: output, shape index: {}]  }
   0x1   :  { %v14_v1 = vld [vmem:[%s168_s0] sm:$0xff]  ;;  %v15_v3 = vld [vmem:[%s168_s0 + $0x8] sm:$0xff]  ;;  %v16_v4 = vld [vmem:[%s168_s0 + $0x10] sm:$0xff] }
   0x2   :  { %v29_v2 = vshrl.u32 %v28_v0, 7  ;;  %v17_v5 = vld [vmem:[%s168_s0 + $0x18] sm:$0xff]  ;;  %v18_v6 = vunpack.c.l.bf16 %v14_v1  ;;  %v26_v7 = vld [vmem:[%s169_s1] sm:$0xf]  ;;  %v19_v9 = vunpack.c.h.bf16 %v14_v1  ;;  %v22_v10 = vunpack.c.l.bf16 %v16_v4 }
   0x3   :  { %v56_v8 = vld [vmem:[%s170_s2] sm:$0xf]  ;;  %v23_v11 = vunpack.c.h.bf16 %v16_v4  ;;  %v20_v16 = vunpack.c.l.bf16 %v15_v3  ;;  %v21_v17 = vunpack.c.h.bf16 %v15_v3  ;;  %v24_v18 = vunpack.c.l.bf16 %v17_v5 }
   0x4   :  { %v30_v12 = vsub.s32 0, %v29_v2  ;;  %v34_v13 = vsub.s32 1, %v29_v2  ;;  %v38_v14 = vsub.s32 2, %v29_v2  ;;  %v42_v15 = vsub.s32 3, %v29_v2 }
   0x5   :  { %v25_v19 = vunpack.c.h.bf16 %v17_v5 }
   0x6   :  { %v31_v20 = vrot.slane %v26_v7, %v30_v12  ;;  %v61_v21 = vrot.slane %v56_v8, %v30_v12  ;;  %v35_v22 = vrot.slane %v26_v7, %v34_v13  ;;  %v65_v23 = vrot.slane %v56_v8, %v34_v13 }
   0x7   :  { %v39_v24 = vrot.slane %v26_v7, %v38_v14  ;;  %v69_v25 = vrot.slane %v56_v8, %v38_v14  ;;  %v43_v26 = vrot.slane %v26_v7, %v42_v15  ;;  %v73_v27 = vrot.slane %v56_v8, %v42_v15 }
   0x8   :  { %v48_v28 = vmul.f32 %v31_v20, %v18_v6  ;;  %v49_v29 = vmul.f32 %v35_v22, %v19_v9  ;;  %v52_v30 = vmul.f32 %v31_v20, %v22_v10  ;;  %v53_v31 = vmul.f32 %v35_v22, %v23_v11 }
   0x9   :  { %v50_v32 = vmul.f32 %v39_v24, %v20_v16  ;;  %v51_v33 = vmul.f32 %v43_v26, %v21_v17  ;;  %v54_v34 = vmul.f32 %v39_v24, %v24_v18  ;;  %v55_v35 = vmul.f32 %v43_v26, %v25_v19 }
   0xa   :  { %v78_v36 = vadd.f32 %v61_v21, %v48_v28  ;;  %v79_v37 = vadd.f32 %v65_v23, %v49_v29  ;;  %v82_v38 = vadd.f32 %v61_v21, %v52_v30  ;;  %v83_v39 = vadd.f32 %v65_v23, %v53_v31 }
   0xb   :  { %v80_v40 = vadd.f32 %v69_v25, %v50_v32  ;;  %v81_v41 = vadd.f32 %v73_v27, %v51_v33  ;;  %v84_v42 = vadd.f32 %v69_v25, %v54_v34  ;;  %v85_v43 = vadd.f32 %v73_v27, %v55_v35 }
   0xc   :  { %v86_v44 = vmax.f32 %v78_v36, 0.0  ;;  %v87_v45 = vmax.f32 %v79_v37, 0.0  ;;  %v90_v46 = vmax.f32 %v82_v38, 0.0  ;;  %v91_v47 = vmax.f32 %v83_v39, 0.0 }
   0xd   :  { %v88_v48 = vmax.f32 %v80_v40, 0.0  ;;  %v89_v49 = vmax.f32 %v81_v41, 0.0  ;;  %v92_v50 = vmax.f32 %v84_v42, 0.0  ;;  %v93_v51 = vmax.f32 %v85_v43, 0.0 }
   0xe   :  { %94 = vst [vmem:[%s171_s3] sm:$0xff] %v86_v44  ;;  %95 = vst [vmem:[%s171_s3 + $0x8] sm:$0xff] %v87_v45 }
   0xf   :  { %98 = vst [vmem:[%s171_s3 + $0x20] sm:$0xff] %v90_v46  ;;  %99 = vst [vmem:[%s171_s3 + $0x28] sm:$0xff] %v91_v47 }
  0x10   :  { %96 = vst [vmem:[%s171_s3 + $0x10] sm:$0xff] %v88_v48  ;;  %97 = vst [vmem:[%s171_s3 + $0x18] sm:$0xff] %v89_v49 }
  0x11   :  { %100 = vst [vmem:[%s171_s3 + $0x30] sm:$0xff] %v92_v50  ;;  %101 = vst [vmem:[%s171_s3 + $0x38] sm:$0xff] %v93_v51 }

// kernel: run.13
= control target key start
LH: loop header
LB: loop body
LE: loop exit
PB: predicated region body
PF: predicated region fallthrough
CT: control target
= control target key end

     0   :  { %s1153_s15 = smov 0   ;;  %s1296_s0 = inlined_call_operand.vmem [shape: bf16[2,144,96], index: 0, kind: input, shape index: {}]   ;;  %s1297_s1 = inlined_call_operand.vmem [shape: bf16[3,96,64], index: 1, kind: input, shape index: {}]   ;;  %s1298_s2 = inlined_call_operand.vmem [shape: bf16[2,64,64], index: 2, kind: output, shape index: {0}]   ;;  %s1299_s3 = inlined_call_operand.vmem [shape: f32[2,1,64], index: 3, kind: output, shape index: {1}]   ;;  %s1300_s4 = inlined_call_operand.vmem [shape: f32[2,1,64], index: 4, kind: output, shape index: {2}]  }
   0x1 LB: > { %s886_s16 = sadd.s32 4294967295, %s1126_s15   ;;  %p890_p0 = scmp.ge.s32.totalorder %s1126_s15, 1  ;;  %s1126_s15 = sphi %s1153_s15, %s15_s15  }
   0x2   : > { %p167_p1 = scmp.lt.s32.totalorder %s1126_s15, 3 }
   0x4   : > { %p168_p2 = pnand %p890_p0, %p167_p1 }
   0x5   : > { %p199_p3 = scmp.lt.s32.totalorder (!%p168_p2), %s886_s16, 1 }
   0x6   : > { %171 = sbr.rel (%p168_p2) target bundleno = 291 (0x123), region = 28 }
   0xb   : > { %v1090_v0 = vld [vmem:[%s1297_s1 + $0x58] sm:$0xff]   ;;  %v1091_v1 = vld [vmem:[%s1297_s1 + $0x28] sm:$0xff]   ;;  %v1092_v2 = vld [vmem:[%s1297_s1 + $0x50] sm:$0xff]   ;;  %s1302_s16 = smov (!%p199_p3, %s886_s16), 1  ;;  %vm313_vm0 = vcmask 785408   ;;  %vm772_vm1 = vcmask 519168  }
   0xc   : > { %1009 = vmatprep.subr.bf16.mxu0 %v1090_v0  ;;  %1029 = vmatprep.subr.bf16.mxu1 %v1091_v1  ;;  %v1093_v3 = vld [vmem:[%s1297_s1 + $0x20] sm:$0xff]   ;;  %v1094_v4 = vld [vmem:[%s1297_s1 + $0x48] sm:$0xff]   ;;  %v1095_v5 = vld [vmem:[%s1297_s1 + $0x18] sm:$0xff]   ;;  %s1081_s29 = smul.u32 72, %s1302_s16  ;;  %s970_s7 = sshll.u32 %s1302_s16, 5  ;;  %vm686_vm2 = vcmask 523264  }
   0xd   : > { %1010 = vmatpush3.bf16.msra.mxu0 %v1090_v0  ;;  %1030 = vmatpush3.bf16.msra.mxu1 %v1091_v1  ;;  %v1096_v6 = vld [vmem:[%s1297_s1 + $0x40] sm:$0xff]   ;;  %v1097_v7 = vld [vmem:[%s1297_s1 + $0x10] sm:$0xff]   ;;  %v1098_v8 = vld [vmem:[%s1297_s1 + $0x38] sm:$0xff]   ;;  %s211_s13 = scalar_lea.vmem %s1299_s3, %s1302_s16  ;;  %vm708_vm3 = vcmask 516096   ;;  %s214_s18 = scalar_lea.vmem %s1300_s4, %s1302_s16 }
   0xe   : > { %1011 = vmatprep.subr.bf16.mxu0 %v1092_v2  ;;  %1031 = vmatprep.subr.bf16.mxu1 %v1093_v3  ;;  %s1191_s10 = scalar_lea.vmem %s1296_s0, %s1081_s29  ;;  %v1099_v9 = vld [vmem:[%s1297_s1 + $0x8] sm:$0xff]   ;;  %v1100_v12 = vld [vmem:[%s1297_s1 + $0x30] sm:$0xff]   ;;  %v1101_v13 = vld [vmem:[%s1297_s1] sm:$0xff]  }
   0xf   : > { %v1102_v10 = vld [vmem:[%s1191_s10 + $0x24] sm:$0xff]   ;;  %v1104_v15 = vld [vmem:[%s1191_s10 + $0x2c] sm:$0xff]   ;;  %v1109_v18 = vld [vmem:[%s1191_s10 + $0x34] sm:$0xff]  }
  0x10   : > { %v1103_v11 = vld [vmem:[%s1191_s10] sm:$0xff]   ;;  %1021 = vmatprep.mubr.msk.bf16.mxu0 %vm313_vm0, %v1102_v10  ;;  %v1106_v14 = vld [vmem:[%s1297_s1 + $0x88] sm:$0xff]   ;;  %v1110_v19 = vld [vmem:[%s1191_s10 + $0x10] sm:$0xff]  }
  0x11   : > { %1012 = vmatpush3.bf16.msra.mxu0 %v1092_v2  ;;  %1032 = vmatpush3.bf16.msra.mxu1 %v1093_v3  ;;  %v1105_v16 = vld [vmem:[%s1191_s10 + $0x8] sm:$0xff]   ;;  %v1107_v17 = vld [vmem:[%s1297_s1 + $0x80] sm:$0xff]   ;;  %v1108_v20 = vld [vmem:[%s1297_s1 + $0x78] sm:$0xff]  }
  0x12   : > { %1013 = vmatprep.subr.bf16.mxu0 %v1094_v4  ;;  %1033 = vmatprep.subr.bf16.mxu1 %v1095_v5  ;;  %v1111_v21 = vld [vmem:[%s1191_s10 + $0x3c] sm:$0xff]   ;;  %v1113_v23 = vld [vmem:[%s1297_s1 + $0x70] sm:$0xff]   ;;  %v1116_v24 = vld [vmem:[%s1191_s10 + $0x4] sm:$0xff]  }
  0x13   : > { %1041 = vmatprep.mubr.msk.bf16.mxu1 %vm313_vm0, %v1103_v11  ;;  %v1112_v22 = vld [vmem:[%s1191_s10 + $0x18] sm:$0xff]   ;;  %v1114_v26 = vld [vmem:[%s1297_s1 + $0x68] sm:$0xff]   ;;  %v1115_v27 = vld [vmem:[%s1297_s1 + $0x60] sm:$0xff]  }
  0x14   : > { %v1117_v25 = vld [vmem:[%s1191_s10 + $0x14] sm:$0xff]   ;;  %v1118_v28 = vld [vmem:[%s1191_s10 + $0xc] sm:$0xff]   ;;  %v1119_v29 = vld [vmem:[%s1191_s10 + $0x1c] sm:$0xff]   ;;  %s1251_s10 = scalar_lea.vmem %s1298_s2, %s970_s7 }
  0x15   : > { %1014 = vmatpush3.bf16.msra.mxu0 %v1094_v4  ;;  %1034 = vmatpush3.bf16.msra.mxu1 %v1095_v5 }
  0x16   : > { %1015 = vmatprep.subr.bf16.mxu0 %v1096_v6  ;;  %1035 = vmatprep.subr.bf16.mxu1 %v1097_v7 }
  0x19   : > { %1016 = vmatpush3.bf16.msra.mxu0 %v1096_v6  ;;  %1036 = vmatpush3.bf16.msra.mxu1 %v1097_v7 }
  0x1a   : > { %1017 = vmatprep.subr.bf16.mxu0 %v1098_v8  ;;  %1037 = vmatprep.subr.bf16.mxu1 %v1099_v9 }
  0x1d   : > { %1018 = vmatpush3.bf16.msra.mxu0 %v1098_v8  ;;  %1038 = vmatpush3.bf16.msra.mxu1 %v1099_v9 }
  0x1e   : > { %1019 = vmatprep.subr.bf16.mxu0 %v1100_v12  ;;  %1039 = vmatprep.subr.bf16.mxu1 %v1101_v13 }
  0x21   : > { %1020 = vmatpush3.bf16.msra.mxu0 %v1100_v12  ;;  %1040 = vmatpush3.bf16.msra.mxu1 %v1101_v13 }
  0x22   : > { %1049 = vmatprep.subr.bf16.mxu0 %v1106_v14  ;;  %1069 = vmatprep.subr.bf16.mxu1 %v1106_v14 }
  0x24   : > { %1022 = vmatmul.mubr.msk.bf16.vlgmr.msra.gmra.mxu0 %vm313_vm0, %v1104_v15  ;;  %1042 = vmatmul.mubr.msk.bf16.vlgmr.msra.gmra.mxu1 %vm313_vm0, %v1105_v16 }
  0x25   : > { %1050 = vmatpush3.bf16.msra.mxu0 %v1106_v14  ;;  %1075 = vmatpush3.bf16.msra.mxu1 %v1106_v14 }
  0x26   : > { %1051 = vmatprep.subr.bf16.mxu0 %v1107_v17  ;;  %1070 = vmatprep.subr.bf16.mxu1 %v1107_v17 }
  0x27   : > { %1025 = vmatprep.mubr.msk.bf16.mxu0 %vm313_vm0, %v1109_v18  ;;  %1045 = vmatprep.mubr.msk.bf16.mxu1 %vm313_vm0, %v1110_v19 }
  0x29   : > { %1052 = vmatpush3.bf16.msra.mxu0 %v1107_v17  ;;  %1076 = vmatpush3.bf16.msra.mxu1 %v1107_v17 }
  0x2a   : > { %1053 = vmatprep.subr.bf16.mxu0 %v1108_v20  ;;  %1071 = vmatprep.subr.bf16.mxu1 %v1108_v20 }
  0x2c   : > { %1026 = vmatmul.mubr.msk.bf16.gmra.mxu0 %vm313_vm0, %v1111_v21  ;;  %1046 = vmatmul.mubr.msk.bf16.gmra.mxu1 %vm313_vm0, %v1112_v22 }
  0x2d   : > { %1054 = vmatpush3.bf16.msra.mxu0 %v1108_v20  ;;  %1077 = vmatpush3.bf16.msra.mxu1 %v1108_v20 }
  0x2e   : > { %1055 = vmatprep.subr.bf16.mxu0 %v1113_v23  ;;  %1072 = vmatprep.subr.bf16.mxu1 %v1113_v23 }
  0x2f   : > { %1061 = vmatprep.mubr.msk.bf16.mxu0 %vm313_vm0, %v1116_v24  ;;  %1065 = vmatprep.mubr.msk.bf16.mxu1 %vm313_vm0, %v1117_v25 }
  0x31   : > { %1056 = vmatpush3.bf16.msra.mxu0 %v1113_v23  ;;  %1078 = vmatpush3.bf16.msra.mxu1 %v1113_v23 }
  0x32   : > { %1057 = vmatprep.subr.bf16.mxu0 %v1114_v26  ;;  %1073 = vmatprep.subr.bf16.mxu1 %v1114_v26 }
  0x35   : > { %1058 = vmatpush3.bf16.msra.mxu0 %v1114_v26  ;;  %1079 = vmatpush3.bf16.msra.mxu1 %v1114_v26 }
  0x36   : > { %1059 = vmatprep.subr.bf16.mxu0 %v1115_v27  ;;  %1074 = vmatprep.subr.bf16.mxu1 %v1115_v27 }
  0x39   : > { %1060 = vmatpush3.bf16.msra.mxu0 %v1115_v27  ;;  %1080 = vmatpush3.bf16.msra.mxu1 %v1115_v27 }
  0x3c   : > { %1062 = vmatmul.mubr.msk.bf16.vlgmr.msra.gmra.mxu0 %vm313_vm0, %v1118_v28  ;;  %1066 = vmatmul.mubr.msk.bf16.vlgmr.msra.gmra.mxu1 %vm313_vm0, %v1119_v29 }
  0xe4   : > { %v1023_v30 = vpop.f32.mrf.mxu0  ;;  %v1043_v31 = vpop.f32.mrf.mxu1 }
  0xe5   : > { %v502_v45 = vadd.f32 %v1043_v31, %v1023_v30 }
  0xe6   : > { %v360_v32 = vpop.f32.mrf.mxu0  ;;  %v493_v33 = vpop.f32.mrf.mxu1 }
  0xe7   : > { %v494_v49 = vadd.f32 %v493_v33, %v360_v32 }
  0xe8   : > { %v1024_v34 = vpop.f32.mrf.mxu0  ;;  %v1044_v35 = vpop.f32.mrf.mxu1 }
  0xe9   : > { %v505_v61 = vadd.f32 %v1044_v35, %v1024_v34 }
  0xea   : > { %v363_v36 = vpop.f32.mrf.mxu0  ;;  %v496_v37 = vpop.f32.mrf.mxu1 }
  0xeb   : > { %v497_v62 = vadd.f32 %v496_v37, %v363_v36 }
  0xec   : > { %v1027_v38 = vpop.f32.mrf.mxu0  ;;  %v1047_v39 = vpop.f32.mrf.mxu1 }
  0xed   : > { %v518_v47 = vadd.f32 %v1047_v39, %v1027_v38 }
  0xee   : > { %v376_v40 = vpop.f32.mrf.mxu0  ;;  %v509_v41 = vpop.f32.mrf.mxu1 }
  0xef   : > { %v510_v52 = vadd.f32 %v509_v41, %v376_v40 }
  0xf0   : > { %v1028_v42 = vpop.f32.mrf.mxu0  ;;  %v1048_v43 = vpop.f32.mrf.mxu1 }
  0xf1   : > { %v521_v63 = vadd.f32 %v1048_v43, %v1028_v42 }
  0xf2   : > { %v379_v44 = vpop.f32.mrf.mxu0  ;;  %v512_v46 = vpop.f32.mrf.mxu1 }
  0xf3   : > { %v513_v2 = vadd.f32 %v512_v46, %v379_v44 }
  0xfc   : > { %v1063_v48 = vpop.f32.mrf.mxu0  ;;  %v1067_v51 = vpop.f32.mrf.mxu1 }
  0xfd   : > { %v680_v50 = vadd.f32 %v1063_v48, %v502_v45  ;;  %v684_v53 = vadd.f32 %v1067_v51, %v518_v47 }
  0xfe   : > { %v647_v54 = vpop.f32.mrf.mxu0  ;;  %v663_v57 = vpop.f32.mrf.mxu1 }
  0xff   : > { %v973_v55 = vpack.c.bf16 %v680_v50, %v680_v50  ;;  %v678_v56 = vadd.f32 %v647_v54, %v494_v49  ;;  %v977_v58 = vpack.c.bf16 %v684_v53, %v684_v53  ;;  %v682_v59 = vadd.f32 %v663_v57, %v510_v52 }
 0x100   : > { %v1064_v60 = vpop.f32.mrf.mxu0  ;;  %v1068_v1 = vpop.f32.mrf.mxu1  ;;  %v712_v11 = vmul.f32 %v680_v50, %v680_v50  ;;  %v690_v17 = vsel %vm686_vm2, %v680_v50, 0.0  ;;  %v716_v36 = vmul.f32 %v684_v53, %v684_v53  ;;  %v698_v41 = vsel %vm686_vm2, %v684_v53, 0.0 }
 0x101   : > { %775 = vst.msk [vmem:[%s1251_s10 + $0x8] sm:$0xf] %vm772_vm1, %v973_v55  ;;  %v971_v0 = vpack.c.bf16 %v678_v56, %v678_v56  ;;  %779 = vst.msk [vmem:[%s1251_s10 + $0x18] sm:$0xf] %vm772_vm1, %v977_v58  ;;  %v975_v3 = vpack.c.bf16 %v682_v59, %v682_v59  ;;  %v681_v5 = vadd.f32 %v1064_v60, %v505_v61  ;;  %v687_v13 = vsel %vm686_vm2, %v678_v56, 0.0 }
 0x102   : > { %v650_v4 = vpop.f32.mrf.mxu0  ;;  %v685_v6 = vadd.f32 %v1068_v1, %v521_v63  ;;  %v666_v8 = vpop.f32.mrf.mxu1  ;;  %v710_v9 = vmul.f32 %v678_v56, %v678_v56  ;;  %v721_v26 = vsel %vm686_vm2, %v712_v11, 0.0  ;;  %v714_v27 = vmul.f32 %v682_v59, %v682_v59 }
 0x103   : > { %773 = vst.msk [vmem:[%s1251_s10] sm:$0xf] %vm772_vm1, %v971_v0  ;;  %v679_v7 = vadd.f32 %v650_v4, %v497_v62  ;;  %777 = vst.msk [vmem:[%s1251_s10 + $0x10] sm:$0xf] %vm772_vm1, %v975_v3  ;;  %v683_v10 = vadd.f32 %v666_v8, %v513_v2  ;;  %v974_v12 = vpack.c.bf16 %v681_v5, %v681_v5  ;;  %v692_v28 = vsel %vm686_vm2, %v681_v5, 0.0 }
 0x104   : > { %v978_v14 = vpack.c.bf16 %v685_v6, %v685_v6  ;;  %v718_v20 = vsel %vm686_vm2, %v710_v9, 0.0  ;;  %v713_v21 = vmul.f32 %v681_v5, %v681_v5  ;;  %v694_v31 = vsel %vm686_vm2, %v682_v59, 0.0 }
 0x105   : > { %v688_v15 = vsel %vm686_vm2, %v679_v7, 0.0  ;;  %v711_v16 = vmul.f32 %v679_v7, %v679_v7  ;;  %776 = vst.msk [vmem:[%s1251_s10 + $0xc] sm:$0xf] %vm772_vm1, %v974_v12  ;;  %v972_v19 = vpack.c.bf16 %v679_v7, %v679_v7  ;;  %v976_v23 = vpack.c.bf16 %v683_v10, %v683_v10 }
 0x106   : > { %v689_v18 = vadd.f32 %v688_v15, %v687_v13  ;;  %780 = vst.msk [vmem:[%s1251_s10 + $0x1c] sm:$0xf] %vm772_vm1, %v978_v14  ;;  %v723_v32 = vsel %vm686_vm2, %v713_v21, 0.0  ;;  %v715_v33 = vmul.f32 %v683_v10, %v683_v10  ;;  %v725_v37 = vsel %vm686_vm2, %v714_v27, 0.0 }
 0x107   : > { %v719_v22 = vsel %vm686_vm2, %v711_v16, 0.0  ;;  %774 = vst.msk [vmem:[%s1251_s10 + $0x4] sm:$0xf] %vm772_vm1, %v972_v19  ;;  %778 = vst.msk [vmem:[%s1251_s10 + $0x14] sm:$0xf] %vm772_vm1, %v976_v23  ;;  %v696_v38 = vsel %vm686_vm2, %v683_v10, 0.0  ;;  %v717_v42 = vmul.f32 %v685_v6, %v685_v6 }
 0x108   : > { %v691_v24 = vadd.f32 %v690_v17, %v689_v18  ;;  %v720_v25 = vadd.f32 %v719_v22, %v718_v20  ;;  %v727_v43 = vsel %vm686_vm2, %v715_v33, 0.0  ;;  %v729_v46 = vsel %vm686_vm2, %v716_v36, 0.0 }
 0x109   : > { %v700_v47 = vsel %vm686_vm2, %v685_v6, 0.0  ;;  %v731_v50 = vsel %vm686_vm2, %v717_v42, 0.0 }
 0x10a   : > { %v722_v29 = vadd.f32 %v721_v26, %v720_v25  ;;  %v693_v30 = vadd.f32 %v692_v28, %v691_v24 }
 0x10c   : > { %v695_v34 = vadd.f32 %v694_v31, %v693_v30  ;;  %v724_v35 = vadd.f32 %v723_v32, %v722_v29 }
 0x10e   : > { %v697_v39 = vadd.f32 %v696_v38, %v695_v34  ;;  %v726_v40 = vadd.f32 %v725_v37, %v724_v35 }
 0x110   : > { %v699_v44 = vadd.f32 %v698_v41, %v697_v39  ;;  %v728_v45 = vadd.f32 %v727_v43, %v726_v40 }
 0x112   : > { %v701_v48 = vadd.f32 %v700_v47, %v699_v44  ;;  %v730_v49 = vadd.f32 %v729_v46, %v728_v45 }
 0x114   : > { %v702_v51 = vrot.slane %v701_v48, 4  ;;  %v732_v52 = vadd.f32 %v731_v50, %v730_v49 }
 0x116   : > { %v703_v54 = vadd.f32 %v702_v51, %v701_v48  ;;  %v733_v55 = vrot.slane %v732_v52, 4 }
 0x118   : > { %v704_v53 = vrot.slane %v703_v54, 2  ;;  %v734_v56 = vadd.f32 %v733_v55, %v732_v52 }
 0x11a   : > { %v705_v57 = vadd.f32 %v704_v53, %v703_v54  ;;  %v735_v58 = vrot.slane %v734_v56, 2 }
 0x11c   : > { %v706_v59 = vrot.slane %v705_v57, 1  ;;  %v736_v60 = vadd.f32 %v735_v58, %v734_v56 }
 0x11e   : > { %v707_v61 = vadd.f32 %v706_v59, %v705_v57  ;;  %v737_v62 = vrot.slane %v736_v60, 1 }
 0x120   : > { %709 = vst.msk [vmem:[%s211_s13] sm:$0x1] %vm708_vm3, %v707_v61  ;;  %v738_v63 = vadd.f32 %v737_v62, %v736_v60 }
 0x122   : > { %739 = vst.msk [vmem:[%s214_s18] sm:$0x1] %vm708_vm3, %v738_v63 }
 0x123 PF: > { %s15_s15 = sadd.s32 1, %s1126_s15  }
 0x124   : > { %p12_p4 = scmp.ge.s32.totalorder %s15_s15, 4  }
 0x126   :  { %14 = sbr.rel (!%p12_p4) target bundleno = 1 (0x1), region = 84 }

// kernel: run.17
= control target key start
LH: loop header
LB: loop body
LE: loop exit
PB: predicated region body
PF: predicated region fallthrough
CT: control target
= control target key end

     0   :  { %v37_v0 = vlaneseq  ;;  %s290_s0 = inlined_call_operand.vmem [shape: bf16[16,512], index: 0, kind: input, shape index: {}]   ;;  %s291_s1 = inlined_call_operand.vmem [shape: f32[1,512], index: 1, kind: input, shape index: {}]   ;;  %s292_s2 = inlined_call_operand.vmem [shape: f32[1,512], index: 2, kind: input, shape index: {}]   ;;  %s293_s3 = inlined_call_operand.vmem [shape: bf16[16,512], index: 3, kind: input, shape index: {}]   ;;  %s294_s4 = inlined_call_operand.vmem [shape: f32[1,512], index: 4, kind: input, shape index: {}]   ;;  %s295_s5 = inlined_call_operand.vmem [shape: f32[1,512], index: 5, kind: input, shape index: {}]   ;;  %s296_s6 = inlined_call_operand.vmem [shape: f32[16,512], index: 6, kind: output, shape index: {}]  }
   0x1   :  { %v23_v1 = vld [vmem:[%s290_s0] sm:$0xff]  ;;  %v24_v12 = vld [vmem:[%s290_s0 + $0x8] sm:$0xff]  ;;  %v25_v42 = vld [vmem:[%s290_s0 + $0x10] sm:$0xff] }
   0x2   :  { %v35_v2 = vld [vmem:[%s291_s1] sm:$0xf]  ;;  %v38_v3 = vshrl.u32 %v37_v0, 7  ;;  %v27_v7 = vunpack.c.l.bf16 %v23_v1  ;;  %v28_v10 = vunpack.c.h.bf16 %v23_v1  ;;  %v96_v13 = vld [vmem:[%s293_s3 + $0x8] sm:$0xff]  ;;  %v29_v16 = vunpack.c.l.bf16 %v24_v12  ;;  %v97_v47 = vld [vmem:[%s293_s3 + $0x10] sm:$0xff] }
   0x3   :  { %v65_v4 = vld [vmem:[%s292_s2] sm:$0xf]  ;;  %v101_v18 = vunpack.c.l.bf16 %v96_v13  ;;  %v30_v19 = vunpack.c.h.bf16 %v24_v12  ;;  %v102_v21 = vunpack.c.h.bf16 %v96_v13  ;;  %v31_v55 = vunpack.c.l.bf16 %v25_v42  ;;  %v26_v56 = vld [vmem:[%s290_s0 + $0x18] sm:$0xff] }
   0x4   :  { %v95_v5 = vld [vmem:[%s293_s3] sm:$0xff]  ;;  %v39_v14 = vsub.s32 0, %v38_v3  ;;  %v43_v15 = vsub.s32 1, %v38_v3  ;;  %v47_v17 = vsub.s32 2, %v38_v3  ;;  %v51_v20 = vsub.s32 3, %v38_v3  ;;  %v98_v61 = vld [vmem:[%s293_s3 + $0x18] sm:$0xff] }
   0x5   :  { %v107_v6 = vld [vmem:[%s294_s4] sm:$0xf]  ;;  %v99_v8 = vunpack.c.l.bf16 %v95_v5  ;;  %v100_v11 = vunpack.c.h.bf16 %v95_v5  ;;  %v103_v60 = vunpack.c.l.bf16 %v97_v47  ;;  %v32_v1 = vunpack.c.h.bf16 %v25_v42 }
   0x6   :  { %v137_v9 = vld [vmem:[%s295_s5] sm:$0xf]  ;;  %v40_v22 = vrot.slane %v35_v2, %v39_v14  ;;  %v70_v23 = vrot.slane %v65_v4, %v39_v14  ;;  %v112_v24 = vrot.slane %v107_v6, %v39_v14  ;;  %v44_v26 = vrot.slane %v35_v2, %v43_v15 }
   0x7   :  { %v142_v25 = vrot.slane %v137_v9, %v39_v14  ;;  %v74_v27 = vrot.slane %v65_v4, %v43_v15  ;;  %v116_v28 = vrot.slane %v107_v6, %v43_v15  ;;  %v146_v29 = vrot.slane %v137_v9, %v43_v15 }
   0x8   :  { %v57_v30 = vmul.f32 %v40_v22, %v27_v7  ;;  %v129_v31 = vmul.f32 %v112_v24, %v99_v8  ;;  %v48_v32 = vrot.slane %v35_v2, %v47_v17  ;;  %v78_v33 = vrot.slane %v65_v4, %v47_v17 }
   0x9   :  { %v58_v34 = vmul.f32 %v44_v26, %v28_v10  ;;  %v130_v35 = vmul.f32 %v116_v28, %v100_v11  ;;  %v120_v36 = vrot.slane %v107_v6, %v47_v17  ;;  %v150_v37 = vrot.slane %v137_v9, %v47_v17 }
   0xa   :  { %v87_v38 = vadd.f32 %v70_v23, %v57_v30  ;;  %v159_v39 = vadd.f32 %v142_v25, %v129_v31  ;;  %v59_v40 = vmul.f32 %v48_v32, %v29_v16  ;;  %v52_v41 = vrot.slane %v35_v2, %v51_v20 }
   0xb   :  { %v88_v43 = vadd.f32 %v74_v27, %v58_v34  ;;  %v160_v44 = vadd.f32 %v146_v29, %v130_v35  ;;  %v131_v45 = vmul.f32 %v120_v36, %v101_v18  ;;  %v82_v46 = vrot.slane %v65_v4, %v51_v20 }
   0xc   :  { %v167_v48 = vadd.f32 %v159_v39, %v87_v38  ;;  %v89_v49 = vadd.f32 %v78_v33, %v59_v40  ;;  %v60_v50 = vmul.f32 %v52_v41, %v30_v19  ;;  %v124_v51 = vrot.slane %v107_v6, %v51_v20 }
   0xd   :  { %v168_v52 = vadd.f32 %v160_v44, %v88_v43  ;;  %v161_v53 = vadd.f32 %v150_v37, %v131_v45  ;;  %v154_v54 = vrot.slane %v137_v9, %v51_v20  ;;  %v61_v0 = vmul.f32 %v40_v22, %v31_v55 }
   0xe   :  { %v175_v57 = vmax.f32 %v167_v48, 0.0  ;;  %v90_v58 = vadd.f32 %v82_v46, %v60_v50  ;;  %v132_v59 = vmul.f32 %v124_v51, %v102_v21  ;;  %v133_v3 = vmul.f32 %v112_v24, %v103_v60 }
   0xf   :  { %v176_v62 = vmax.f32 %v168_v52, 0.0  ;;  %v169_v63 = vadd.f32 %v161_v53, %v89_v49  ;;  %v104_v4 = vunpack.c.h.bf16 %v97_v47  ;;  %v33_v5 = vunpack.c.l.bf16 %v26_v56 }
  0x10   :  { %183 = vst [vmem:[%s296_s6] sm:$0xff] %v175_v57  ;;  %v162_v2 = vadd.f32 %v154_v54, %v132_v59  ;;  %v91_v7 = vadd.f32 %v70_v23, %v61_v0  ;;  %v62_v8 = vmul.f32 %v44_v26, %v32_v1  ;;  %v105_v9 = vunpack.c.l.bf16 %v98_v61 }
  0x11   :  { %184 = vst [vmem:[%s296_s6 + $0x8] sm:$0xff] %v176_v62  ;;  %v177_v6 = vmax.f32 %v169_v63, 0.0  ;;  %v163_v11 = vadd.f32 %v142_v25, %v133_v3  ;;  %v134_v12 = vmul.f32 %v116_v28, %v104_v4  ;;  %v63_v13 = vmul.f32 %v48_v32, %v33_v5 }
  0x12   :  { %v170_v10 = vadd.f32 %v162_v2, %v90_v58  ;;  %v92_v14 = vadd.f32 %v74_v27, %v62_v8  ;;  %v135_v15 = vmul.f32 %v120_v36, %v105_v9  ;;  %v34_v16 = vunpack.c.h.bf16 %v26_v56 }
  0x13   :  { %185 = vst [vmem:[%s296_s6 + $0x10] sm:$0xff] %v177_v6  ;;  %v106_v17 = vunpack.c.h.bf16 %v98_v61  ;;  %v171_v19 = vadd.f32 %v163_v11, %v91_v7  ;;  %v164_v20 = vadd.f32 %v146_v29, %v134_v12  ;;  %v93_v21 = vadd.f32 %v78_v33, %v63_v13 }
  0x14   :  { %v178_v18 = vmax.f32 %v170_v10, 0.0  ;;  %v165_v22 = vadd.f32 %v150_v37, %v135_v15  ;;  %v64_v23 = vmul.f32 %v52_v41, %v34_v16 }
  0x15   :  { %v136_v24 = vmul.f32 %v124_v51, %v106_v17  ;;  %v179_v25 = vmax.f32 %v171_v19, 0.0  ;;  %v172_v26 = vadd.f32 %v164_v20, %v92_v14 }
  0x16   :  { %186 = vst [vmem:[%s296_s6 + $0x18] sm:$0xff] %v178_v18  ;;  %v173_v28 = vadd.f32 %v165_v22, %v93_v21  ;;  %v94_v30 = vadd.f32 %v82_v46, %v64_v23 }
  0x17   :  { %v166_v31 = vadd.f32 %v154_v54, %v136_v24  ;;  %187 = vst [vmem:[%s296_s6 + $0x20] sm:$0xff] %v179_v25  ;;  %v180_v27 = vmax.f32 %v172_v26, 0.0 }
  0x18   :  { %v181_v32 = vmax.f32 %v173_v28, 0.0 }
  0x19   :  { %v174_v29 = vadd.f32 %v166_v31, %v94_v30  ;;  %188 = vst [vmem:[%s296_s6 + $0x28] sm:$0xff] %v180_v27 }
  0x1a   :  { %189 = vst [vmem:[%s296_s6 + $0x30] sm:$0xff] %v181_v32 }
  0x1b   :  { %v182_v33 = vmax.f32 %v174_v29, 0.0 }
  0x1d   :  { %190 = vst [vmem:[%s296_s6 + $0x38] sm:$0xff] %v182_v33 }

// kernel: run.16
= control target key start
LH: loop header
LB: loop body
LE: loop exit
PB: predicated region body
PF: predicated region fallthrough
CT: control target
= control target key end

     0   :  { %vm87_vm0 = vcmask 261120   ;;  %vm367_vm1 = vcmask 519168   ;;  %vm209_vm2 = vcmask 523264   ;;  %vm247_vm3 = vcmask 516096   ;;  %s704_s1 = inlined_call_operand.vmem [shape: bf16[32,64], index: 1, kind: input, shape index: {}]   ;;  %s705_s0 = inlined_call_operand.vmem [shape: bf16[128,32], index: 0, kind: input, shape index: {}]   ;;  %s706_s2 = inlined_call_operand.vmem [shape: bf16[128,64], index: 2, kind: output, shape index: {0}]   ;;  %s707_s3 = inlined_call_operand.vmem [shape: f32[1,1,64], index: 3, kind: output, shape index: {1}]   ;;  %s708_s4 = inlined_call_operand.vmem [shape: f32[1,1,64], index: 4, kind: output, shape index: {2}]  }
   0x1   :  { %v480_v0 = vld [vmem:[%s704_s1 + $0x8] sm:$0xff]   ;;  %v481_v1 = vld [vmem:[%s704_s1] sm:$0xff]   ;;  %v484_v4 = vld [vmem:[%s705_s0 + $0x10] sm:$0xff]  }
   0x2   :  { %456 = vmatprep.subr.bf16.mxu0 %v480_v0  ;;  %v482_v2 = vld [vmem:[%s705_s0] sm:$0xff]   ;;  %476 = vmatprep.subr.bf16.mxu1 %v480_v0  ;;  %v483_v3 = vld [vmem:[%s705_s0 + $0x8] sm:$0xff]   ;;  %v488_v7 = vld [vmem:[%s705_s0 + $0x30] sm:$0xff]  }
   0x3   :  { %457 = vmatpush3.bf16.msra.mxu0 %v480_v0  ;;  %478 = vmatpush3.bf16.msra.mxu1 %v480_v0  ;;  %v486_v5 = vld [vmem:[%s705_s0 + $0x20] sm:$0xff]   ;;  %v487_v6 = vld [vmem:[%s705_s0 + $0x28] sm:$0xff]   ;;  %v485_v8 = vld [vmem:[%s705_s0 + $0x18] sm:$0xff]  }
   0x4   :  { %458 = vmatprep.subr.bf16.mxu0 %v481_v1  ;;  %460 = vmatprep.mubr.msk.bf16.mxu0 %vm87_vm0, %v482_v2  ;;  %v489_v9 = vld [vmem:[%s705_s0 + $0x38] sm:$0xff]  }
   0x5   :  { %477 = vmatprep.subr.bf16.mxu1 %v481_v1  ;;  %468 = vmatprep.mubr.msk.bf16.mxu1 %vm87_vm0, %v486_v5 }
   0x7   :  { %459 = vmatpush3.bf16.msra.mxu0 %v481_v1  ;;  %479 = vmatpush3.bf16.msra.mxu1 %v481_v1 }
   0xa   :  { %461 = vmatmul.mubr.msk.bf16.vlgmr.msra.gmra.mxu0 %vm87_vm0, %v483_v3  ;;  %469 = vmatmul.mubr.msk.bf16.vlgmr.msra.gmra.mxu1 %vm87_vm0, %v487_v6 }
   0xb   :  { %464 = vmatprep.mubr.msk.bf16.mxu0 %vm87_vm0, %v484_v4  ;;  %472 = vmatprep.mubr.msk.bf16.mxu1 %vm87_vm0, %v488_v7 }
  0x12   :  { %465 = vmatmul.mubr.msk.bf16.gmra.mxu0 %vm87_vm0, %v485_v8  ;;  %473 = vmatmul.mubr.msk.bf16.gmra.mxu1 %vm87_vm0, %v489_v9 }
  0xca   :  { %v462_v10 = vpop.f32.mrf.mxu0  ;;  %v553_v11 = vpop.f32.mrf.mxu1 }
  0xcb   :  { %v432_v12 = vpack.c.bf16 %v462_v10, %v462_v10  ;;  %v440_v14 = vpack.c.bf16 %v553_v11, %v553_v11  ;;  %v251_v22 = vmul.f32 %v462_v10, %v462_v10  ;;  %v213_v30 = vsel %vm209_vm2, %v462_v10, 0.0 }
  0xcc   :  { %v146_v13 = vpop.f32.mrf.mxu0  ;;  %v557_v15 = vpop.f32.mrf.mxu1 }
  0xcd   :  { %370 = vst.msk [vmem:[%s706_s2 + $0x8] sm:$0xf] %vm367_vm1, %v432_v12  ;;  %v430_v16 = vpack.c.bf16 %v146_v13, %v146_v13  ;;  %378 = vst.msk [vmem:[%s706_s2 + $0x28] sm:$0xf] %vm367_vm1, %v440_v14  ;;  %v438_v18 = vpack.c.bf16 %v557_v15, %v557_v15  ;;  %v249_v20 = vmul.f32 %v146_v13, %v146_v13  ;;  %v210_v26 = vsel %vm209_vm2, %v146_v13, 0.0 }
  0xce   :  { %v463_v17 = vpop.f32.mrf.mxu0  ;;  %v569_v19 = vpop.f32.mrf.mxu1  ;;  %v268_v43 = vsel %vm209_vm2, %v251_v22, 0.0  ;;  %v257_v12 = vmul.f32 %v557_v15, %v557_v15 }
  0xcf   :  { %368 = vst.msk [vmem:[%s706_s2] sm:$0xf] %vm367_vm1, %v430_v16  ;;  %v433_v21 = vpack.c.bf16 %v463_v17, %v463_v17  ;;  %376 = vst.msk [vmem:[%s706_s2 + $0x20] sm:$0xf] %vm367_vm1, %v438_v18  ;;  %v441_v24 = vpack.c.bf16 %v569_v19, %v569_v19  ;;  %v265_v34 = vsel %vm209_vm2, %v249_v20, 0.0  ;;  %v252_v35 = vmul.f32 %v463_v17, %v463_v17 }
  0xd0   :  { %v149_v23 = vpop.f32.mrf.mxu0  ;;  %v581_v25 = vpop.f32.mrf.mxu1  ;;  %v215_v44 = vsel %vm209_vm2, %v463_v17, 0.0  ;;  %v225_v18 = vsel %vm209_vm2, %v557_v15, 0.0 }
  0xd1   :  { %371 = vst.msk [vmem:[%s706_s2 + $0xc] sm:$0xf] %vm367_vm1, %v433_v21  ;;  %v211_v27 = vsel %vm209_vm2, %v149_v23, 0.0  ;;  %v250_v28 = vmul.f32 %v149_v23, %v149_v23  ;;  %v431_v29 = vpack.c.bf16 %v149_v23, %v149_v23  ;;  %379 = vst.msk [vmem:[%s706_s2 + $0x2c] sm:$0xf] %vm367_vm1, %v441_v24  ;;  %v439_v41 = vpack.c.bf16 %v581_v25, %v581_v25 }
  0xd2   :  { %v212_v31 = vadd.f32 %v211_v27, %v210_v26  ;;  %v466_v32 = vpop.f32.mrf.mxu0  ;;  %v594_v33 = vpop.f32.mrf.mxu1  ;;  %v270_v51 = vsel %vm209_vm2, %v252_v35, 0.0  ;;  %v258_v20 = vmul.f32 %v581_v25, %v581_v25  ;;  %v259_v23 = vmul.f32 %v553_v11, %v553_v11 }
  0xd3   :  { %v266_v36 = vsel %vm209_vm2, %v250_v28, 0.0  ;;  %369 = vst.msk [vmem:[%s706_s2 + $0x4] sm:$0xf] %vm367_vm1, %v431_v29  ;;  %v436_v37 = vpack.c.bf16 %v466_v32, %v466_v32  ;;  %377 = vst.msk [vmem:[%s706_s2 + $0x24] sm:$0xf] %vm367_vm1, %v439_v41  ;;  %v255_v54 = vmul.f32 %v466_v32, %v466_v32  ;;  %v444_v58 = vpack.c.bf16 %v594_v33, %v594_v33 }
  0xd4   :  { %v214_v38 = vadd.f32 %v213_v30, %v212_v31  ;;  %v267_v39 = vadd.f32 %v266_v36, %v265_v34  ;;  %v162_v40 = vpop.f32.mrf.mxu0  ;;  %v604_v42 = vpop.f32.mrf.mxu1  ;;  %v221_v2 = vsel %vm209_vm2, %v466_v32, 0.0  ;;  %v280_v24 = vsel %vm209_vm2, %v257_v12, 0.0 }
  0xd5   :  { %374 = vst.msk [vmem:[%s706_s2 + $0x18] sm:$0xf] %vm367_vm1, %v436_v37  ;;  %v253_v45 = vmul.f32 %v162_v40, %v162_v40  ;;  %v434_v46 = vpack.c.bf16 %v162_v40, %v162_v40  ;;  %v217_v52 = vsel %vm209_vm2, %v162_v40, 0.0  ;;  %382 = vst.msk [vmem:[%s706_s2 + $0x38] sm:$0xf] %vm367_vm1, %v444_v58  ;;  %v442_v5 = vpack.c.bf16 %v604_v42, %v604_v42 }
  0xd6   :  { %v269_v47 = vadd.f32 %v268_v43, %v267_v39  ;;  %v216_v48 = vadd.f32 %v215_v44, %v214_v38  ;;  %v467_v49 = vpop.f32.mrf.mxu0  ;;  %v616_v50 = vpop.f32.mrf.mxu1  ;;  %v276_v9 = vsel %vm209_vm2, %v255_v54, 0.0  ;;  %v227_v26 = vsel %vm209_vm2, %v581_v25, 0.0 }
  0xd7   :  { %372 = vst.msk [vmem:[%s706_s2 + $0x10] sm:$0xf] %vm367_vm1, %v434_v46  ;;  %v437_v53 = vpack.c.bf16 %v467_v49, %v467_v49  ;;  %v272_v59 = vsel %vm209_vm2, %v253_v45, 0.0  ;;  %v256_v3 = vmul.f32 %v467_v49, %v467_v49  ;;  %v445_v8 = vpack.c.bf16 %v616_v50, %v616_v50  ;;  %380 = vst.msk [vmem:[%s706_s2 + $0x30] sm:$0xf] %vm367_vm1, %v442_v5 }
  0xd8   :  { %v218_v55 = vadd.f32 %v217_v52, %v216_v48  ;;  %v271_v56 = vadd.f32 %v270_v51, %v269_v47  ;;  %v165_v57 = vpop.f32.mrf.mxu0  ;;  %v197_v1 = vpop.f32.mrf.mxu1  ;;  %v223_v10 = vsel %vm209_vm2, %v467_v49, 0.0  ;;  %v229_v28 = vsel %vm209_vm2, %v553_v11, 0.0 }
  0xd9   :  { %375 = vst.msk [vmem:[%s706_s2 + $0x1c] sm:$0xf] %vm367_vm1, %v437_v53  ;;  %v219_v60 = vsel %vm209_vm2, %v165_v57, 0.0  ;;  %v254_v61 = vmul.f32 %v165_v57, %v165_v57  ;;  %v435_v62 = vpack.c.bf16 %v165_v57, %v165_v57  ;;  %v443_v13 = vpack.c.bf16 %v197_v1, %v197_v1  ;;  %383 = vst.msk [vmem:[%s706_s2 + $0x3c] sm:$0xf] %vm367_vm1, %v445_v8 }
  0xda   :  { %v273_v63 = vadd.f32 %v272_v59, %v271_v56  ;;  %v220_v0 = vadd.f32 %v219_v60, %v218_v55  ;;  %v278_v17 = vsel %vm209_vm2, %v256_v3, 0.0  ;;  %v260_v29 = vmul.f32 %v569_v19, %v569_v19 }
  0xdb   :  { %v274_v4 = vsel %vm209_vm2, %v254_v61, 0.0  ;;  %373 = vst.msk [vmem:[%s706_s2 + $0x14] sm:$0xf] %vm367_vm1, %v435_v62  ;;  %381 = vst.msk [vmem:[%s706_s2 + $0x34] sm:$0xf] %vm367_vm1, %v443_v13  ;;  %v282_v30 = vsel %vm209_vm2, %v258_v20, 0.0  ;;  %v261_v25 = vmul.f32 %v604_v42, %v604_v42  ;;  %v262_v39 = vmul.f32 %v197_v1, %v197_v1 }
  0xdc   :  { %v222_v6 = vadd.f32 %v221_v2, %v220_v0  ;;  %v275_v7 = vadd.f32 %v274_v4, %v273_v63  ;;  %v284_v34 = vsel %vm209_vm2, %v259_v23, 0.0  ;;  %v231_v35 = vsel %vm209_vm2, %v569_v19, 0.0 }
  0xdd   :  { %v286_v38 = vsel %vm209_vm2, %v260_v29, 0.0  ;;  %v233_v11 = vsel %vm209_vm2, %v604_v42, 0.0  ;;  %v263_v43 = vmul.f32 %v594_v33, %v594_v33  ;;  %v288_v44 = vsel %vm209_vm2, %v261_v25, 0.0 }
  0xde   :  { %v224_v14 = vadd.f32 %v223_v10, %v222_v6  ;;  %v277_v16 = vadd.f32 %v276_v9, %v275_v7  ;;  %v235_v19 = vsel %vm209_vm2, %v197_v1, 0.0  ;;  %v237_v47 = vsel %vm209_vm2, %v594_v33, 0.0 }
  0xdf   :  { %v264_v48 = vmul.f32 %v616_v50, %v616_v50  ;;  %v290_v42 = vsel %vm209_vm2, %v262_v39, 0.0  ;;  %v292_v52 = vsel %vm209_vm2, %v263_v43, 0.0  ;;  %v239_v53 = vsel %vm209_vm2, %v616_v50, 0.0 }
  0xe0   :  { %v279_v21 = vadd.f32 %v278_v17, %v277_v16  ;;  %v226_v22 = vadd.f32 %v225_v18, %v224_v14 }
  0xe1   :  { %v294_v56 = vsel %vm209_vm2, %v264_v48, 0.0 }
  0xe2   :  { %v228_v27 = vadd.f32 %v227_v26, %v226_v22  ;;  %v281_v15 = vadd.f32 %v280_v24, %v279_v21 }
  0xe4   :  { %v230_v31 = vadd.f32 %v229_v28, %v228_v27  ;;  %v283_v32 = vadd.f32 %v282_v30, %v281_v15 }
  0xe6   :  { %v285_v36 = vadd.f32 %v284_v34, %v283_v32  ;;  %v232_v37 = vadd.f32 %v231_v35, %v230_v31 }
  0xe8   :  { %v234_v40 = vadd.f32 %v233_v11, %v232_v37  ;;  %v287_v41 = vadd.f32 %v286_v38, %v285_v36 }
  0xea   :  { %v289_v45 = vadd.f32 %v288_v44, %v287_v41  ;;  %v236_v46 = vadd.f32 %v235_v19, %v234_v40 }
  0xec   :  { %v238_v49 = vadd.f32 %v237_v47, %v236_v46  ;;  %v291_v51 = vadd.f32 %v290_v42, %v289_v45 }
  0xee   :  { %v240_v54 = vadd.f32 %v239_v53, %v238_v49  ;;  %v293_v55 = vadd.f32 %v292_v52, %v291_v51 }
  0xf0   :  { %v241_v57 = vrot.slane %v240_v54, 4  ;;  %v295_v58 = vadd.f32 %v294_v56, %v293_v55 }
  0xf2   :  { %v242_v59 = vadd.f32 %v241_v57, %v240_v54  ;;  %v296_v33 = vrot.slane %v295_v58, 4 }
  0xf4   :  { %v243_v60 = vrot.slane %v242_v59, 2  ;;  %v297_v61 = vadd.f32 %v296_v33, %v295_v58 }
  0xf6   :  { %v244_v62 = vadd.f32 %v243_v60, %v242_v59  ;;  %v298_v63 = vrot.slane %v297_v61, 2 }
  0xf8   :  { %v245_v0 = vrot.slane %v244_v62, 1  ;;  %v299_v1 = vadd.f32 %v298_v63, %v297_v61 }
  0xfa   :  { %v246_v2 = vadd.f32 %v245_v0, %v244_v62  ;;  %v300_v3 = vrot.slane %v299_v1, 1 }
  0xfc   :  { %248 = vst.msk [vmem:[%s707_s3] sm:$0x1] %vm247_vm3, %v246_v2  ;;  %v301_v50 = vadd.f32 %v300_v3, %v299_v1 }
  0xfe   :  { %302 = vst.msk [vmem:[%s708_s4] sm:$0x1] %vm247_vm3, %v301_v50 }

// kernel: run.15
= control target key start
LH: loop header
LB: loop body
LE: loop exit
PB: predicated region body
PF: predicated region fallthrough
CT: control target
= control target key end

     0   :  { %s1318_s15 = smov 0   ;;  %s1579_s0 = inlined_call_operand.vmem [shape: bf16[2,80,192], index: 0, kind: input, shape index: {}]   ;;  %s1580_s1 = inlined_call_operand.vmem [shape: bf16[3,192,64], index: 1, kind: input, shape index: {}]   ;;  %s1581_s2 = inlined_call_operand.vmem [shape: bf16[2,64,64], index: 2, kind: output, shape index: {0}]   ;;  %s1582_s3 = inlined_call_operand.vmem [shape: f32[2,1,64], index: 3, kind: output, shape index: {1}]   ;;  %s1583_s4 = inlined_call_operand.vmem [shape: f32[2,1,64], index: 4, kind: output, shape index: {2}]  }
   0x1 LB: > { %s1049_s16 = sadd.s32 4294967295, %s1290_s15   ;;  %p1053_p0 = scmp.ge.s32.totalorder %s1290_s15, 1  ;;  %s1290_s15 = sphi %s1318_s15, %s15_s15  }
   0x2   : > { %p167_p1 = scmp.lt.s32.totalorder %s1290_s15, 3 }
   0x4   : > { %p168_p2 = pnand %p1053_p0, %p167_p1 }
   0x5   : > { %p199_p3 = scmp.lt.s32.totalorder (!%p168_p2), %s1049_s16, 1 }
   0x6   : > { %171 = sbr.rel (%p168_p2) target bundleno = 341 (0x155), region = 28 }
   0xb   : > { %v1230_v0 = vld [vmem:[%s1580_s1 + $0x98] sm:$0xff]   ;;  %v1292_v1 = vmov 0   ;;  %v1232_v3 = vld [vmem:[%s1580_s1 + $0x90] sm:$0xff]   ;;  %v1234_v5 = vld [vmem:[%s1580_s1 + $0x88] sm:$0xff]   ;;  %s1585_s16 = smov (!%p199_p3, %s1049_s16), 1  ;;  %vm382_vm0 = vcmask 523264  }
   0xc   : > { %395 = vmatprep.subr.bf16.mxu0 %v1292_v1  ;;  %559 = vmatprep.subr.bf16.mxu1 %v1292_v1  ;;  %v1231_v2 = vld [vmem:[%s1580_s1 + $0x38] sm:$0xff]   ;;  %v1233_v4 = vld [vmem:[%s1580_s1 + $0x30] sm:$0xff]   ;;  %v1235_v6 = vld [vmem:[%s1580_s1 + $0x28] sm:$0xff]   ;;  %s1220_s11 = smul.u32 80, %s1585_s16  ;;  %vm935_vm1 = vcmask 519168   ;;  %s211_s28 = scalar_lea.vmem %s1582_s3, %s1585_s16  ;;  %vm871_vm2 = vcmask 516096  }
   0xd   : > { %396 = vmatpush1.bf16.msra.mxu0 %v1230_v0  ;;  %560 = vmatpush1.bf16.msra.mxu1 %v1231_v2  ;;  %v1236_v7 = vld [vmem:[%s1580_s1 + $0x80] sm:$0xff]   ;;  %v1238_v9 = vld [vmem:[%s1580_s1 + $0x78] sm:$0xff]   ;;  %v1240_v11 = vld [vmem:[%s1580_s1 + $0x70] sm:$0xff]   ;;  %s214_s5 = scalar_lea.vmem %s1583_s4, %s1585_s16 }
   0xe   : > { %397 = vmatprep.subr.bf16.mxu0 %v1292_v1  ;;  %561 = vmatprep.subr.bf16.mxu1 %v1292_v1  ;;  %v1237_v8 = vld [vmem:[%s1580_s1 + $0x20] sm:$0xff]   ;;  %v1239_v10 = vld [vmem:[%s1580_s1 + $0x18] sm:$0xff]   ;;  %v1241_v12 = vld [vmem:[%s1580_s1 + $0x10] sm:$0xff]   ;;  %s1380_s20 = scalar_lea.vmem %s1579_s0, %s1220_s11 }
   0xf   : > { %v1242_v13 = vld [vmem:[%s1580_s1 + $0x68] sm:$0xff]   ;;  %v218_v16 = vld [vmem:[%s1380_s20 + $0x10] sm:$0xff]  ;;  %v216_v17 = vld [vmem:[%s1380_s20] sm:$0xff] }
  0x10   : > { %v1243_v14 = vld [vmem:[%s1580_s1 + $0x8] sm:$0xff]   ;;  %v1244_v20 = vld [vmem:[%s1580_s1 + $0x60] sm:$0xff]   ;;  %v1246_v22 = vld [vmem:[%s1580_s1 + $0xb8] sm:$0xff]  }
  0x11   : > { %398 = vmatpush1.bf16.msra.mxu0 %v1232_v3  ;;  %562 = vmatpush1.bf16.msra.mxu1 %v1233_v4  ;;  %v217_v15 = vld [vmem:[%s1380_s20 + $0x8] sm:$0xff]  ;;  %v1245_v21 = vld [vmem:[%s1580_s1] sm:$0xff]   ;;  %v1247_v23 = vld [vmem:[%s1580_s1 + $0x58] sm:$0xff]  }
  0x12   : > { %399 = vmatprep.subr.bf16.mxu0 %v1292_v1  ;;  %563 = vmatprep.subr.bf16.mxu1 %v1292_v1  ;;  %v1082_v18 = vcombine.high %v217_v15, %v218_v16  ;;  %v1106_v19 = vcombine.high %v216_v17, %v217_v15  ;;  %v1248_v24 = vld [vmem:[%s1580_s1 + $0xb0] sm:$0xff]   ;;  %v1250_v26 = vld [vmem:[%s1580_s1 + $0xa8] sm:$0xff]   ;;  %v1252_v28 = vld [vmem:[%s1580_s1 + $0xa0] sm:$0xff]   ;;  %v1081_v30 = vcombine.low %v217_v15, %v218_v16 }
  0x13   : > { %v1249_v25 = vld [vmem:[%s1580_s1 + $0x50] sm:$0xff]   ;;  %v1251_v27 = vld [vmem:[%s1580_s1 + $0x48] sm:$0xff]   ;;  %v1253_v29 = vld [vmem:[%s1580_s1 + $0x40] sm:$0xff]   ;;  %v1105_v33 = vcombine.low %v216_v17, %v217_v15 }
  0x14   : > { %1101 = vmatprep.mubr.msk.bf16.mxu0 %vm382_vm0, %v1082_v18  ;;  %1125 = vmatprep.mubr.msk.bf16.mxu1 %vm382_vm0, %v1106_v19  ;;  %v219_v31 = vld [vmem:[%s1380_s20 + $0x18] sm:$0xff]  ;;  %v220_v32 = vld [vmem:[%s1380_s20 + $0x20] sm:$0xff]  ;;  %v1259_v37 = vld [vmem:[%s1580_s1 + $0xf0] sm:$0xff]  }
  0x15   : > { %400 = vmatpush1.bf16.msra.mxu0 %v1234_v5  ;;  %564 = vmatpush1.bf16.msra.mxu1 %v1235_v6  ;;  %v1258_v34 = vld [vmem:[%s1580_s1 + $0xf8] sm:$0xff]   ;;  %v1084_v35 = vcombine.high %v219_v31, %v220_v32  ;;  %v1442_v36 = vcombine.high %v218_v16, %v219_v31  ;;  %v1083_v38 = vcombine.low %v219_v31, %v220_v32  ;;  %v221_v39 = vld [vmem:[%s1380_s20 + $0x28] sm:$0xff]  ;;  %v222_v40 = vld [vmem:[%s1380_s20 + $0x30] sm:$0xff] }
  0x16   : > { %401 = vmatprep.subr.bf16.mxu0 %v1292_v1  ;;  %565 = vmatprep.subr.bf16.mxu1 %v1292_v1  ;;  %v1260_v41 = vld [vmem:[%s1580_s1 + $0xe8] sm:$0xff]   ;;  %v1457_v42 = vcombine.low %v218_v16, %v219_v31  ;;  %v1086_v43 = vcombine.high %v221_v39, %v222_v40  ;;  %v1461_v44 = vcombine.high %v220_v32, %v221_v39  ;;  %v1261_v45 = vld [vmem:[%s1580_s1 + $0xe0] sm:$0xff]   ;;  %v223_v47 = vld [vmem:[%s1380_s20 + $0x38] sm:$0xff] }
  0x17   : > { %v1085_v46 = vcombine.low %v221_v39, %v222_v40  ;;  %v1474_v48 = vld [vmem:[%s1380_s20 + $0x40] sm:$0xff]  ;;  %v1263_v49 = vld [vmem:[%s1580_s1 + $0xd8] sm:$0xff]   ;;  %v1109_v50 = vcombine.low %v220_v32, %v221_v39  ;;  %v1112_v52 = vcombine.high %v222_v40, %v223_v47  ;;  %v1267_v53 = vld [vmem:[%s1580_s1 + $0xd0] sm:$0xff]   ;;  %v1111_v56 = vcombine.low %v222_v40, %v223_v47 }
  0x18   : > { %v1088_v51 = vcombine.high %v223_v47, %v1474_v48  ;;  %v1087_v54 = vcombine.low %v223_v47, %v1474_v48  ;;  %v1269_v55 = vld [vmem:[%s1580_s1 + $0xc8] sm:$0xff]   ;;  %v1273_v57 = vld [vmem:[%s1580_s1 + $0xc0] sm:$0xff]   ;;  %v1275_v58 = vld [vmem:[%s1580_s1 + $0x118] sm:$0xff]  }
  0x19   : > { %402 = vmatpush1.bf16.msra.mxu0 %v1236_v7  ;;  %566 = vmatpush1.bf16.msra.mxu1 %v1237_v8  ;;  %v1279_v59 = vld [vmem:[%s1580_s1 + $0x110] sm:$0xff]   ;;  %v1280_v60 = vld [vmem:[%s1580_s1 + $0x108] sm:$0xff]   ;;  %v1281_v61 = vld [vmem:[%s1580_s1 + $0x100] sm:$0xff]  }
  0x1a   : > { %403 = vmatprep.subr.bf16.mxu0 %v1292_v1  ;;  %567 = vmatprep.subr.bf16.mxu1 %v1292_v1  ;;  %v631_v62 = vld [vmem:[%s1380_s20 + $0x48] sm:$0xff]  ;;  %s1187_s20 = sshll.u32 %s1585_s16, 5 }
  0x1b   : > { %v1160_v63 = vcombine.high %v1474_v48, %v631_v62  ;;  %v1159_v0 = vcombine.low %v1474_v48, %v631_v62  ;;  %s1534_s25 = scalar_lea.vmem %s1581_s2, %s1187_s20 }
  0x1d   : > { %404 = vmatpush1.bf16.msra.mxu0 %v1238_v9  ;;  %568 = vmatpush1.bf16.msra.mxu1 %v1239_v10 }
  0x1e   : > { %405 = vmatprep.subr.bf16.mxu0 %v1292_v1  ;;  %569 = vmatprep.subr.bf16.mxu1 %v1292_v1 }
  0x21   : > { %406 = vmatpush1.bf16.msra.mxu0 %v1240_v11  ;;  %570 = vmatpush1.bf16.msra.mxu1 %v1241_v12 }
  0x22   : > { %407 = vmatprep.subr.bf16.mxu0 %v1292_v1  ;;  %571 = vmatprep.subr.bf16.mxu1 %v1292_v1 }
  0x25   : > { %408 = vmatpush1.bf16.msra.mxu0 %v1242_v13  ;;  %572 = vmatpush1.bf16.msra.mxu1 %v1243_v14 }
  0x26   : > { %409 = vmatprep.subr.bf16.mxu0 %v1292_v1  ;;  %573 = vmatprep.subr.bf16.mxu1 %v1292_v1 }
  0x29   : > { %410 = vmatpush1.bf16.msra.mxu0 %v1244_v20  ;;  %574 = vmatpush1.bf16.msra.mxu1 %v1245_v21 }
  0x2a   : > { %419 = vmatprep.subr.bf16.mxu0 %v1292_v1  ;;  %583 = vmatprep.subr.bf16.mxu1 %v1292_v1 }
  0x2d   : > { %420 = vmatpush2.bf16.msra.mxu0 %v1246_v22  ;;  %584 = vmatpush2.bf16.msra.mxu1 %v1247_v23 }
  0x2e   : > { %421 = vmatprep.subr.bf16.mxu0 %v1292_v1  ;;  %585 = vmatprep.subr.bf16.mxu1 %v1292_v1 }
  0x31   : > { %422 = vmatpush2.bf16.msra.mxu0 %v1248_v24  ;;  %586 = vmatpush2.bf16.msra.mxu1 %v1249_v25 }
  0x32   : > { %423 = vmatprep.subr.bf16.mxu0 %v1292_v1  ;;  %587 = vmatprep.subr.bf16.mxu1 %v1292_v1 }
  0x35   : > { %424 = vmatpush2.bf16.msra.mxu0 %v1250_v26  ;;  %588 = vmatpush2.bf16.msra.mxu1 %v1251_v27 }
  0x36   : > { %425 = vmatprep.subr.bf16.mxu0 %v1292_v1  ;;  %589 = vmatprep.subr.bf16.mxu1 %v1292_v1 }
  0x39   : > { %426 = vmatpush2.bf16.msra.mxu0 %v1252_v28  ;;  %590 = vmatpush2.bf16.msra.mxu1 %v1253_v29 }
  0x3a   : > { %777 = vmatprep.subr.bf16.mxu0 %v1292_v1  ;;  %1196 = vmatprep.subr.bf16.mxu1 %v1292_v1 }
  0x3c   : > { %428 = vmatmul.mubr.bf16.vlgmr.msra.gmra.mxu0 %v1081_v30  ;;  %592 = vmatmul.mubr.bf16.vlgmr.msra.gmra.mxu1 %v1105_v33 }
  0x3d   : > { %778 = vmatpush1.bf16.msra.mxu0 %v1258_v34  ;;  %1208 = vmatpush1.bf16.msra.mxu1 %v1258_v34 }
  0x3e   : > { %779 = vmatprep.subr.bf16.mxu0 %v1292_v1  ;;  %1197 = vmatprep.subr.bf16.mxu1 %v1292_v1 }
  0x3f   : > { %1102 = vmatprep.mubr.msk.bf16.mxu0 %vm382_vm0, %v1084_v35  ;;  %1126 = vmatprep.mubr.msk.bf16.mxu1 %vm382_vm0, %v1442_v36 }
  0x41   : > { %780 = vmatpush1.bf16.msra.mxu0 %v1259_v37  ;;  %1209 = vmatpush1.bf16.msra.mxu1 %v1259_v37 }
  0x42   : > { %781 = vmatprep.subr.bf16.mxu0 %v1292_v1  ;;  %1198 = vmatprep.subr.bf16.mxu1 %v1292_v1 }
  0x44   : > { %436 = vmatmul.mubr.bf16.gmra.mxu0 %v1083_v38  ;;  %600 = vmatmul.mubr.bf16.gmra.mxu1 %v1457_v42 }
  0x45   : > { %782 = vmatpush1.bf16.msra.mxu0 %v1260_v41  ;;  %1210 = vmatpush1.bf16.msra.mxu1 %v1260_v41 }
  0x46   : > { %783 = vmatprep.subr.bf16.mxu0 %v1292_v1  ;;  %1199 = vmatprep.subr.bf16.mxu1 %v1292_v1 }
  0x47   : > { %1103 = vmatprep.mubr.msk.bf16.mxu0 %vm382_vm0, %v1086_v43  ;;  %1127 = vmatprep.mubr.msk.bf16.mxu1 %vm382_vm0, %v1461_v44 }
  0x49   : > { %784 = vmatpush1.bf16.msra.mxu0 %v1261_v45  ;;  %1211 = vmatpush1.bf16.msra.mxu1 %v1261_v45 }
  0x4a   : > { %785 = vmatprep.subr.bf16.mxu0 %v1292_v1  ;;  %1200 = vmatprep.subr.bf16.mxu1 %v1292_v1 }
  0x4c   : > { %444 = vmatmul.mubr.bf16.gmra.mxu0 %v1085_v46  ;;  %608 = vmatmul.mubr.bf16.gmra.mxu1 %v1109_v50 }
  0x4d   : > { %786 = vmatpush1.bf16.msra.mxu0 %v1263_v49  ;;  %1212 = vmatpush1.bf16.msra.mxu1 %v1263_v49 }
  0x4e   : > { %787 = vmatprep.subr.bf16.mxu0 %v1292_v1  ;;  %1201 = vmatprep.subr.bf16.mxu1 %v1292_v1 }
  0x4f   : > { %1104 = vmatprep.mubr.msk.bf16.mxu0 %vm382_vm0, %v1088_v51  ;;  %1128 = vmatprep.mubr.msk.bf16.mxu1 %vm382_vm0, %v1112_v52 }
  0x51   : > { %788 = vmatpush1.bf16.msra.mxu0 %v1267_v53  ;;  %1213 = vmatpush1.bf16.msra.mxu1 %v1267_v53 }
  0x52   : > { %789 = vmatprep.subr.bf16.mxu0 %v1292_v1  ;;  %1202 = vmatprep.subr.bf16.mxu1 %v1292_v1 }
  0x54   : > { %452 = vmatmul.mubr.bf16.gmra.mxu0 %v1087_v54  ;;  %616 = vmatmul.mubr.bf16.gmra.mxu1 %v1111_v56 }
  0x55   : > { %790 = vmatpush1.bf16.msra.mxu0 %v1269_v55  ;;  %1214 = vmatpush1.bf16.msra.mxu1 %v1269_v55 }
  0x56   : > { %791 = vmatprep.subr.bf16.mxu0 %v1292_v1  ;;  %1203 = vmatprep.subr.bf16.mxu1 %v1292_v1 }
  0x57   : > { %1173 = vmatprep.mubr.msk.bf16.mxu0 %vm382_vm0, %v1442_v36  ;;  %1175 = vmatprep.mubr.msk.bf16.mxu1 %vm382_vm0, %v1112_v52 }
  0x59   : > { %792 = vmatpush1.bf16.msra.mxu0 %v1273_v57  ;;  %1215 = vmatpush1.bf16.msra.mxu1 %v1273_v57 }
  0x5a   : > { %801 = vmatprep.subr.bf16.mxu0 %v1292_v1  ;;  %1204 = vmatprep.subr.bf16.mxu1 %v1292_v1 }
  0x5d   : > { %802 = vmatpush2.bf16.msra.mxu0 %v1275_v58  ;;  %1216 = vmatpush2.bf16.msra.mxu1 %v1275_v58 }
  0x5e   : > { %803 = vmatprep.subr.bf16.mxu0 %v1292_v1  ;;  %1205 = vmatprep.subr.bf16.mxu1 %v1292_v1 }
  0x61   : > { %804 = vmatpush2.bf16.msra.mxu0 %v1279_v59  ;;  %1217 = vmatpush2.bf16.msra.mxu1 %v1279_v59 }
  0x62   : > { %805 = vmatprep.subr.bf16.mxu0 %v1292_v1  ;;  %1206 = vmatprep.subr.bf16.mxu1 %v1292_v1 }
  0x65   : > { %806 = vmatpush2.bf16.msra.mxu0 %v1280_v60  ;;  %1218 = vmatpush2.bf16.msra.mxu1 %v1280_v60 }
  0x66   : > { %807 = vmatprep.subr.bf16.mxu0 %v1292_v1  ;;  %1207 = vmatprep.subr.bf16.mxu1 %v1292_v1 }
  0x69   : > { %808 = vmatpush2.bf16.msra.mxu0 %v1281_v61  ;;  %1219 = vmatpush2.bf16.msra.mxu1 %v1281_v61 }
  0x6c   : > { %810 = vmatmul.mubr.bf16.vlgmr.msra.gmra.mxu0 %v1457_v42  ;;  %826 = vmatmul.mubr.bf16.vlgmr.msra.gmra.mxu1 %v1111_v56 }
  0x6d   : > { %1174 = vmatprep.mubr.msk.bf16.mxu0 %vm382_vm0, %v1461_v44  ;;  %1176 = vmatprep.mubr.msk.bf16.mxu1 %vm382_vm0, %v1160_v63 }
  0x74   : > { %818 = vmatmul.mubr.bf16.gmra.mxu0 %v1109_v50  ;;  %834 = vmatmul.mubr.bf16.gmra.mxu1 %v1159_v0 }
  0xfc   : > { %v429_v2 = vpop.f32.mrf.mxu0  ;;  %v593_v3 = vpop.f32.mrf.mxu1 }
  0xfd   : > { %v594_v33 = vadd.f32 %v593_v3, %v429_v2 }
  0xfe   : > { %v431_v1 = vpop.f32.mrf.mxu0  ;;  %v595_v4 = vpop.f32.mrf.mxu1 }
 0x100   : > { %v432_v5 = vpop.f32.mrf.mxu0  ;;  %v596_v6 = vpop.f32.mrf.mxu1 }
 0x101   : > { %v597_v40 = vadd.f32 %v596_v6, %v432_v5 }
 0x102   : > { %v434_v7 = vpop.f32.mrf.mxu0  ;;  %v598_v8 = vpop.f32.mrf.mxu1 }
 0x104   : > { %v437_v9 = vpop.f32.mrf.mxu0  ;;  %v601_v10 = vpop.f32.mrf.mxu1 }
 0x105   : > { %v602_v50 = vadd.f32 %v601_v10, %v437_v9 }
 0x106   : > { %v439_v11 = vpop.f32.mrf.mxu0  ;;  %v603_v12 = vpop.f32.mrf.mxu1 }
 0x108   : > { %v440_v13 = vpop.f32.mrf.mxu0  ;;  %v604_v14 = vpop.f32.mrf.mxu1 }
 0x109   : > { %v605_v61 = vadd.f32 %v604_v14, %v440_v13 }
 0x10a   : > { %v442_v15 = vpop.f32.mrf.mxu0  ;;  %v606_v16 = vpop.f32.mrf.mxu1 }
 0x10c   : > { %v445_v17 = vpop.f32.mrf.mxu0  ;;  %v609_v18 = vpop.f32.mrf.mxu1 }
 0x10d   : > { %v610_v34 = vadd.f32 %v609_v18, %v445_v17 }
 0x10e   : > { %v447_v19 = vpop.f32.mrf.mxu0  ;;  %v611_v20 = vpop.f32.mrf.mxu1 }
 0x110   : > { %v448_v21 = vpop.f32.mrf.mxu0  ;;  %v612_v22 = vpop.f32.mrf.mxu1 }
 0x111   : > { %v613_v43 = vadd.f32 %v612_v22, %v448_v21 }
 0x112   : > { %v450_v23 = vpop.f32.mrf.mxu0  ;;  %v614_v24 = vpop.f32.mrf.mxu1 }
 0x114   : > { %v453_v25 = vpop.f32.mrf.mxu0  ;;  %v617_v26 = vpop.f32.mrf.mxu1 }
 0x115   : > { %v618_v54 = vadd.f32 %v617_v26, %v453_v25 }
 0x116   : > { %v455_v27 = vpop.f32.mrf.mxu0  ;;  %v619_v28 = vpop.f32.mrf.mxu1 }
 0x118   : > { %v456_v29 = vpop.f32.mrf.mxu0  ;;  %v620_v30 = vpop.f32.mrf.mxu1 }
 0x119   : > { %v621_v6 = vadd.f32 %v620_v30, %v456_v29 }
 0x11a   : > { %v458_v31 = vpop.f32.mrf.mxu0  ;;  %v622_v32 = vpop.f32.mrf.mxu1 }
 0x12c   : > { %v811_v35 = vpop.f32.mrf.mxu0  ;;  %v827_v37 = vpop.f32.mrf.mxu1 }
 0x12d   : > { %v842_v36 = vadd.f32 %v811_v35, %v594_v33  ;;  %v846_v38 = vadd.f32 %v827_v37, %v610_v34 }
 0x12e   : > { %v813_v39 = vpop.f32.mrf.mxu0  ;;  %v829_v42 = vpop.f32.mrf.mxu1 }
 0x12f   : > { %v1188_v41 = vpack.c.bf16 %v842_v36, %v842_v36  ;;  %v1192_v44 = vpack.c.bf16 %v846_v38, %v846_v38  ;;  %v873_v57 = vmul.f32 %v842_v36, %v842_v36  ;;  %v850_v62 = vsel %vm382_vm0, %v842_v36, 0.0 }
 0x130   : > { %v814_v45 = vpop.f32.mrf.mxu0  ;;  %v830_v47 = vpop.f32.mrf.mxu1  ;;  %v877_v18 = vmul.f32 %v846_v38, %v846_v38  ;;  %v857_v26 = vsel %vm382_vm0, %v846_v38, 0.0 }
 0x131   : > { %936 = vst.msk [vmem:[%s1534_s25] sm:$0xf] %vm935_vm1, %v1188_v41  ;;  %v843_v46 = vadd.f32 %v814_v45, %v597_v40  ;;  %940 = vst.msk [vmem:[%s1534_s25 + $0x10] sm:$0xf] %vm935_vm1, %v1192_v44  ;;  %v847_v48 = vadd.f32 %v830_v47, %v613_v43  ;;  %v881_v10 = vsel %vm382_vm0, %v873_v57, 0.0 }
 0x132   : > { %v816_v49 = vpop.f32.mrf.mxu0  ;;  %v832_v53 = vpop.f32.mrf.mxu1  ;;  %v888_v31 = vsel %vm382_vm0, %v877_v18, 0.0 }
 0x133   : > { %v874_v51 = vmul.f32 %v843_v46, %v843_v46  ;;  %v1189_v52 = vpack.c.bf16 %v843_v46, %v843_v46  ;;  %v1193_v55 = vpack.c.bf16 %v847_v48, %v847_v48  ;;  %v851_v58 = vsel %vm382_vm0, %v843_v46, 0.0 }
 0x134   : > { %v819_v56 = vpop.f32.mrf.mxu0  ;;  %v835_v60 = vpop.f32.mrf.mxu1  ;;  %v852_v7 = vadd.f32 %v851_v58, %v850_v62  ;;  %v878_v27 = vmul.f32 %v847_v48, %v847_v48  ;;  %v859_v32 = vsel %vm382_vm0, %v847_v48, 0.0 }
 0x135   : > { %937 = vst.msk [vmem:[%s1534_s25 + $0x4] sm:$0xf] %vm935_vm1, %v1189_v52  ;;  %v844_v59 = vadd.f32 %v819_v56, %v602_v50  ;;  %941 = vst.msk [vmem:[%s1534_s25 + $0x14] sm:$0xf] %vm935_vm1, %v1193_v55  ;;  %v848_v63 = vadd.f32 %v835_v60, %v618_v54  ;;  %v882_v2 = vsel %vm382_vm0, %v874_v51, 0.0 }
 0x136   : > { %v821_v0 = vpop.f32.mrf.mxu0  ;;  %v837_v5 = vpop.f32.mrf.mxu1  ;;  %v883_v14 = vadd.f32 %v882_v2, %v881_v10  ;;  %v890_v36 = vsel %vm382_vm0, %v878_v27, 0.0 }
 0x137   : > { %v853_v3 = vsel %vm382_vm0, %v844_v59, 0.0  ;;  %v875_v1 = vmul.f32 %v844_v59, %v844_v59  ;;  %v1190_v4 = vpack.c.bf16 %v844_v59, %v844_v59  ;;  %v1194_v8 = vpack.c.bf16 %v848_v63, %v848_v63 }
 0x138   : > { %v822_v9 = vpop.f32.mrf.mxu0  ;;  %v838_v13 = vpop.f32.mrf.mxu1  ;;  %v854_v15 = vadd.f32 %v853_v3, %v852_v7  ;;  %v879_v33 = vmul.f32 %v848_v63, %v848_v63  ;;  %v861_v37 = vsel %vm382_vm0, %v848_v63, 0.0 }
 0x139   : > { %v884_v11 = vsel %vm382_vm0, %v875_v1, 0.0  ;;  %938 = vst.msk [vmem:[%s1534_s25 + $0x8] sm:$0xf] %vm935_vm1, %v1190_v4  ;;  %v845_v12 = vadd.f32 %v822_v9, %v605_v61  ;;  %942 = vst.msk [vmem:[%s1534_s25 + $0x18] sm:$0xf] %vm935_vm1, %v1194_v8  ;;  %v849_v16 = vadd.f32 %v838_v13, %v621_v6 }
 0x13a   : > { %v824_v17 = vpop.f32.mrf.mxu0  ;;  %v840_v22 = vpop.f32.mrf.mxu1  ;;  %v885_v23 = vadd.f32 %v884_v11, %v883_v14  ;;  %v892_v41 = vsel %vm382_vm0, %v879_v33, 0.0 }
 0x13b   : > { %v855_v19 = vsel %vm382_vm0, %v845_v12, 0.0  ;;  %v876_v20 = vmul.f32 %v845_v12, %v845_v12  ;;  %v1191_v21 = vpack.c.bf16 %v845_v12, %v845_v12  ;;  %v1195_v25 = vpack.c.bf16 %v849_v16, %v849_v16 }
 0x13c   : > { %v856_v24 = vadd.f32 %v855_v19, %v854_v15  ;;  %v880_v38 = vmul.f32 %v849_v16, %v849_v16  ;;  %v863_v42 = vsel %vm382_vm0, %v849_v16, 0.0 }
 0x13d   : > { %v886_v28 = vsel %vm382_vm0, %v876_v20, 0.0  ;;  %939 = vst.msk [vmem:[%s1534_s25 + $0xc] sm:$0xf] %vm935_vm1, %v1191_v21  ;;  %943 = vst.msk [vmem:[%s1534_s25 + $0x1c] sm:$0xf] %vm935_vm1, %v1195_v25 }
 0x13e   : > { %v858_v29 = vadd.f32 %v857_v26, %v856_v24  ;;  %v887_v30 = vadd.f32 %v886_v28, %v885_v23  ;;  %v894_v45 = vsel %vm382_vm0, %v880_v38, 0.0 }
 0x140   : > { %v889_v34 = vadd.f32 %v888_v31, %v887_v30  ;;  %v860_v35 = vadd.f32 %v859_v32, %v858_v29 }
 0x142   : > { %v862_v39 = vadd.f32 %v861_v37, %v860_v35  ;;  %v891_v40 = vadd.f32 %v890_v36, %v889_v34 }
 0x144   : > { %v864_v43 = vadd.f32 %v863_v42, %v862_v39  ;;  %v893_v44 = vadd.f32 %v892_v41, %v891_v40 }
 0x146   : > { %v865_v46 = vrot.slane %v864_v43, 4  ;;  %v895_v47 = vadd.f32 %v894_v45, %v893_v44 }
 0x148   : > { %v866_v48 = vadd.f32 %v865_v46, %v864_v43  ;;  %v896_v49 = vrot.slane %v895_v47, 4 }
 0x14a   : > { %v867_v50 = vrot.slane %v866_v48, 2  ;;  %v897_v51 = vadd.f32 %v896_v49, %v895_v47 }
 0x14c   : > { %v868_v52 = vadd.f32 %v867_v50, %v866_v48  ;;  %v898_v53 = vrot.slane %v897_v51, 2 }
 0x14e   : > { %v869_v54 = vrot.slane %v868_v52, 1  ;;  %v899_v55 = vadd.f32 %v898_v53, %v897_v51 }
 0x150   : > { %v870_v56 = vadd.f32 %v869_v54, %v868_v52  ;;  %v900_v57 = vrot.slane %v899_v55, 1 }
 0x152   : > { %872 = vst.msk [vmem:[%s211_s28] sm:$0x1] %vm871_vm2, %v870_v56  ;;  %v901_v58 = vadd.f32 %v900_v57, %v899_v55 }
 0x154   : > { %902 = vst.msk [vmem:[%s214_s5] sm:$0x1] %vm871_vm2, %v901_v58 }
 0x155 PF: > { %s15_s15 = sadd.s32 1, %s1290_s15  }
 0x156   : > { %p12_p4 = scmp.ge.s32.totalorder %s15_s15, 4  }
 0x158   :  { %14 = sbr.rel (!%p12_p4) target bundleno = 1 (0x1), region = 84 }

</bundles_post_ra>
